<compile_context>
chip_gen: v6e
topology: v6e:2x2x1
jax: 0.10.0
libtpu: 0.0.40
codegen_flags: <defaults>
</compile_context>

<pallas_src>
import functools

import jax
import jax.numpy as jnp
from jax.experimental import pallas as pl
from jax.experimental.pallas import tpu as pltpu


def _gated_attn_kernel(x_ref, wab_ref, bab_ref, wc_ref, bc_ref, a_out_ref,
                       *, D, C, mxu_dtype):
    """One N-tile: A = (tanh(x@Wa+ba) * sigmoid(x@Wb+bb)) @ Wc^T + bc."""
    x = x_ref[...]
    if mxu_dtype is not None and x.dtype != mxu_dtype:
        # Only x needs a per-step cast (weights arrive already in bf16).
        x = x.astype(mxu_dtype)

    # Fused a|b pre-activations: (tile_n, 2D) in one MXU pass, f32 accumulation.
    h = jnp.dot(x, wab_ref[...], preferred_element_type=jnp.float32)
    h = h + bab_ref[...]                                          # (1, 2D) f32 broadcast

    a = jnp.tanh(h[:, :D])                                        # EUP, f32
    b = jax.nn.sigmoid(h[:, D:])                                  # EUP, f32
    gated = a * b                                                 # (tile_n, D) f32

    if C == 1:
        # wc_ref is (1, D) f32: VPU multiply + cross-lane reduce (XLU); avoids
        # a nearly-empty-output MXU fill/drain.
        A = jnp.sum(gated * wc_ref[...], axis=-1, keepdims=True)  # (tile_n, 1)
    else:
        gated_mm = gated
        if mxu_dtype is not None:
            gated_mm = gated_mm.astype(mxu_dtype)
        # wc_ref is pre-transposed (D, C) — natural (K, N) MXU layout.
        A = jnp.dot(gated_mm, wc_ref[...], preferred_element_type=jnp.float32)

    A = A + bc_ref[...]                                           # (1, C) f32 broadcast
    a_out_ref[...] = A.astype(a_out_ref.dtype)


def _choose_tile(N, tile_n):
    """Large tile (amortize ~0.35us/step, fill MXU rows) but keep >=2 grid
    steps so the 'parallel' axis shards across v7x's two TensorCores; 8-sublane
    aligned."""
    half = -(-N // 2)                       # cdiv(N, 2)
    half_aligned = max(8, -(-half // 8) * 8)
    return min(tile_n, half_aligned)


@functools.partial(
    jax.jit,
    static_argnames=("tile_n", "use_bf16_matmul", "vmem_limit_bytes"))
def attn_net_gated(x, wab, bab, wc, bc, *, tile_n=512, use_bf16_matmul=True,
                   vmem_limit_bytes=None):
    """Pallas wrapper.

    x:   (N, L)   f32 or bf16 (bf16 halves the binding HBM traffic on v6e/v7x)
    wab: (L, 2D)  = concat([Wa^T, Wb^T], axis=1)
    bab: (1, 2D)  = concat([ba, bb], axis=1)
    wc:  (C, D)   (PyTorch attention_c.weight layout)
    bc:  (1, C)
    Returns (A, x) like the PyTorch module.
    """
    N, L = x.shape
    D2 = wab.shape[1]
    D = D2 // 2
    C = wc.shape[0]

    mxu_dtype = jnp.bfloat16 if use_bf16_matmul else None

    # Wrapper-side weight prep (one-time, resident across the grid).
    wab_k = wab.astype(jnp.bfloat16) if use_bf16_matmul else wab
    bab_k = bab.astype(jnp.float32)
    bc_k = bc.astype(jnp.float32)
    if C == 1:
        wc_k = wc.astype(jnp.float32)        # (1, D), consumed on the VPU in f32
    else:
        wc_k = wc.T                          # (D, C), natural MXU layout
        if use_bf16_matmul:
            wc_k = wc_k.astype(jnp.bfloat16)

    tile_eff = _choose_tile(N, tile_n)
    num_tiles = -(-N // tile_eff)            # cdiv; ragged last block is masked
                                             # on writeback by Pallas (no jnp.pad)

    kernel = functools.partial(_gated_attn_kernel, D=D, C=C, mxu_dtype=mxu_dtype)

    A = pl.pallas_call(
        kernel,
        out_shape=jax.ShapeDtypeStruct((N, C), x.dtype),
        grid_spec=pltpu.PrefetchScalarGridSpec(
            num_scalar_prefetch=0,
            grid=(num_tiles,),
            in_specs=[
                # x: tiled over rows (ragged last tile handled by Pallas).
                pl.BlockSpec((tile_eff, L), lambda i: (i, 0)),
                # Fused Wa|Wb (L, 2D) and bias (1, 2D): resident across grid.
                pl.BlockSpec((L, D2), lambda i: (0, 0)),
                pl.BlockSpec((1, D2), lambda i: (0, 0)),
                # Wc: (1, D) for C==1 (VPU) or (D, C) pre-transposed (MXU).
                pl.BlockSpec(wc_k.shape, lambda i: (0, 0)),
                pl.BlockSpec((1, C), lambda i: (0, 0)),
            ],
            out_specs=pl.BlockSpec((tile_eff, C), lambda i: (i, 0)),
        ),
        compiler_params=pltpu.CompilerParams(
            dimension_semantics=("parallel",),   # shards grid across TCs on v7x
            vmem_limit_bytes=vmem_limit_bytes),  # set ~20-24MiB on v5e if
                                                 # tile_n=1024 with f32 operands
    )(x, wab_k, bab_k, wc_k, bc_k)

    # Module returns (A, x); x passes through untouched.
    return A, x


def init_params(key, L, D, n_classes, dtype=jnp.float32):
    """PyTorch-Linear-style init (uniform +-1/sqrt(fan_in))."""
    ks = jax.random.split(key, 6)
    la = 1.0 / jnp.sqrt(L)
    ld = 1.0 / jnp.sqrt(D)
    wa = jax.random.uniform(ks[0], (L, D), dtype, -la, la)          # attention_a
    ba = jax.random.uniform(ks[1], (1, D), dtype, -la, la)
    wb = jax.random.uniform(ks[2], (L, D), dtype, -la, la)          # attention_b
    bb = jax.random.uniform(ks[3], (1, D), dtype, -la, la)
    wc = jax.random.uniform(ks[4], (n_classes, D), dtype, -ld, ld)  # attention_c
    bc = jax.random.uniform(ks[5], (1, n_classes), dtype, -ld, ld)
    return wa, ba, wb, bb, wc, bc


def reference(x, wa, ba, wb, bb, wc, bc):
    a = jnp.tanh(x @ wa + ba)
    b = jax.nn.sigmoid(x @ wb + bb)
    return (a * b) @ wc.T + bc, x


if __name__ == "__main__":
    # Module-default dims (L=1024, D=256); N deliberately NOT a multiple of the
    # tile so the ragged-last-block path (no jnp.pad) is exercised. With
    # tile_n=512 and N=300 the adaptive tile becomes 152 -> a 2-step grid.
    N, L, D = 300, 1024, 256
    key = jax.random.PRNGKey(0)
    kx, kp = jax.random.split(key)
    x = jax.random.normal(kx, (N, L), jnp.float32)

    for C in (1, 3):   # VPU head (C=1) and MXU head (C>1)
        wa, ba, wb, bb, wc, bc = init_params(jax.random.fold_in(kp, C), L, D, C)

        # Wrapper-side fusion of the two parallel Linear layers.
        wab = jnp.concatenate([wa, wb], axis=1)   # (L, 2D)
        bab = jnp.concatenate([ba, bb], axis=1)   # (1, 2D)

        A_ref, _ = reference(x, wa, ba, wb, bb, wc, bc)

        # 1) f32-operand path — tight correctness check.
        A32, x_out = attn_net_gated(x, wab, bab, wc, bc,
                                    tile_n=512, use_bf16_matmul=False)
        A32 = jax.block_until_ready(A32)
        x_out = jax.block_until_ready(x_out)
        assert A32.shape == (N, C)
        assert x_out.shape == (N, L)
        assert jnp.allclose(A32, A_ref, atol=1e-4, rtol=1e-4), \
            f"f32 path mismatch (C={C})"
        assert jnp.array_equal(x_out, x), "x passthrough mismatch"

        # 2) bf16-MXU-operand path (perf default on every generation) — relaxed.
        Abf, _ = attn_net_gated(x, wab, bab, wc, bc,
                                tile_n=512, use_bf16_matmul=True)
        Abf = jax.block_until_ready(Abf)
        assert jnp.allclose(Abf, A_ref, atol=2e-2, rtol=2e-2), \
            f"bf16 path mismatch (C={C})"

    print("KERNEL_OK")
</pallas_src>

<mosaic_0001>
module attributes {stable_mosaic.version = 11 : i64} {
  func.func @_gated_attn_kernel(%arg0: i32, %arg1: memref<152x1024xf32, #tpu.memory_space<vmem>>, %arg2: memref<1024x512xf32, #tpu.memory_space<vmem>>, %arg3: memref<1x512xf32, #tpu.memory_space<vmem>>, %arg4: memref<1x256xf32, #tpu.memory_space<vmem>>, %arg5: memref<1x1xf32, #tpu.memory_space<vmem>>, %arg6: memref<152x1xf32, #tpu.memory_space<vmem>>) attributes {dimension_semantics = [#tpu.dimension_semantics<parallel>], iteration_bounds = array<i64: 2>, scalar_prefetch = 0 : i64, scratch_operands = 0 : i64, tpu.core_type = #tpu.core_type<tc>, window_params = [{transform_indices = @transform_0, window_bounds = array<i64: 152, 1024>}, {pipeline_mode = #tpu.pipeline_mode<synchronous>, transform_indices = @transform_1, window_bounds = array<i64: 1024, 512>}, {pipeline_mode = #tpu.pipeline_mode<synchronous>, transform_indices = @transform_2, window_bounds = array<i64: 1, 512>}, {pipeline_mode = #tpu.pipeline_mode<synchronous>, transform_indices = @transform_3, window_bounds = array<i64: 1, 256>}, {pipeline_mode = #tpu.pipeline_mode<synchronous>, transform_indices = @transform_4, window_bounds = array<i64: 1, 1>}, {transform_indices = @transform_5, window_bounds = array<i64: 152, 1>}]} {
    %c0 = arith.constant 0 : index
    %c0_0 = arith.constant 0 : index
    %0 = vector.load %arg1[%c0, %c0_0] : memref<152x1024xf32, #tpu.memory_space<vmem>>, vector<152x1024xf32>
    %c0_1 = arith.constant 0 : index
    %c0_2 = arith.constant 0 : index
    %1 = vector.load %arg2[%c0_1, %c0_2] : memref<1024x512xf32, #tpu.memory_space<vmem>>, vector<1024x512xf32>
    %cst = arith.constant dense<0.000000e+00> : vector<152x512xf32>
    %2 = tpu.matmul %0, %1, %cst {dimension_numbers = #tpu.dot_dimension_numbers<[1], [0], [0], [1], [0, 0, 1, 1], [], []>} : vector<152x1024xf32>, vector<1024x512xf32>, vector<152x512xf32> -> vector<152x512xf32>
    %c0_3 = arith.constant 0 : index
    %c0_4 = arith.constant 0 : index
    %3 = vector.load %arg3[%c0_3, %c0_4] : memref<1x512xf32, #tpu.memory_space<vmem>>, vector<1x512xf32>
    %4 = vector.broadcast %3 : vector<1x512xf32> to vector<152x512xf32>
    %5 = arith.addf %2, %4 : vector<152x512xf32>
    %6 = vector.extract_strided_slice %5 {offsets = [0, 0], sizes = [152, 256], strides = [1, 1]} : vector<152x512xf32> to vector<152x256xf32>
    %7 = math.tanh %6 : vector<152x256xf32>
    %8 = vector.extract_strided_slice %5 {offsets = [0, 256], sizes = [152, 256], strides = [1, 1]} : vector<152x512xf32> to vector<152x256xf32>
    %9 = arith.negf %8 : vector<152x256xf32>
    %10 = math.exp %9 : vector<152x256xf32>
    %cst_5 = arith.constant 1.000000e+00 : f32
    %11 = vector.broadcast %cst_5 : f32 to vector<152x256xf32>
    %12 = arith.addf %11, %10 : vector<152x256xf32>
    %13 = arith.divf %11, %12 : vector<152x256xf32>
    %14 = arith.mulf %7, %13 : vector<152x256xf32>
    %c0_6 = arith.constant 0 : index
    %c0_7 = arith.constant 0 : index
    %15 = vector.load %arg4[%c0_6, %c0_7] : memref<1x256xf32, #tpu.memory_space<vmem>>, vector<1x256xf32>
    %16 = vector.broadcast %15 : vector<1x256xf32> to vector<152x256xf32>
    %17 = arith.mulf %14, %16 : vector<152x256xf32>
    %cst_8 = arith.constant dense<0.000000e+00> : vector<152xf32>
    %18 = vector.multi_reduction <add>, %17, %cst_8 [1] : vector<152x256xf32> to vector<152xf32>
    %19 = vector.shape_cast %18 : vector<152xf32> to vector<152x1xf32>
    %c0_9 = arith.constant 0 : index
    %c0_10 = arith.constant 0 : index
    %20 = vector.load %arg5[%c0_9, %c0_10] : memref<1x1xf32, #tpu.memory_space<vmem>>, vector<1x1xf32>
    %21 = vector.broadcast %20 : vector<1x1xf32> to vector<152x1xf32>
    %22 = arith.addf %19, %21 : vector<152x1xf32>
    %c0_11 = arith.constant 0 : index
    %c0_12 = arith.constant 0 : index
    %23 = vector.load %arg6[%c0_11, %c0_12] : memref<152x1xf32, #tpu.memory_space<vmem>>, vector<152x1xf32>
    tpu.vector_store %arg6[%c0_11, %c0_12], %22 {strides = array<i32>} : memref<152x1xf32, #tpu.memory_space<vmem>>, vector<152x1xf32>,
    return
  }
  func.func @transform_0(%arg0: i32) -> (i32, i32) {
    %c0_i32 = arith.constant 0 : i32
    %c0_i32_0 = arith.constant 0 : i32
    return %arg0, %c0_i32 : i32, i32
  }
  func.func @transform_1(%arg0: i32) -> (i32, i32) {
    %c0_i32 = arith.constant 0 : i32
    %c0_i32_0 = arith.constant 0 : i32
    %c0_i32_1 = arith.constant 0 : i32
    return %c0_i32, %c0_i32_0 : i32, i32
  }
  func.func @transform_2(%arg0: i32) -> (i32, i32) {
    %c0_i32 = arith.constant 0 : i32
    %c0_i32_0 = arith.constant 0 : i32
    %c0_i32_1 = arith.constant 0 : i32
    return %c0_i32, %c0_i32_0 : i32, i32
  }
  func.func @transform_3(%arg0: i32) -> (i32, i32) {
    %c0_i32 = arith.constant 0 : i32
    %c0_i32_0 = arith.constant 0 : i32
    %c0_i32_1 = arith.constant 0 : i32
    return %c0_i32, %c0_i32_0 : i32, i32
  }
  func.func @transform_4(%arg0: i32) -> (i32, i32) {
    %c0_i32 = arith.constant 0 : i32
    %c0_i32_0 = arith.constant 0 : i32
    %c0_i32_1 = arith.constant 0 : i32
    return %c0_i32, %c0_i32_0 : i32, i32
  }
  func.func @transform_5(%arg0: i32) -> (i32, i32) {
    %c0_i32 = arith.constant 0 : i32
    %c0_i32_0 = arith.constant 0 : i32
    return %arg0, %c0_i32 : i32, i32
  }
}

</mosaic_0001>

<bundles_post_ra>
// kernel: attn_net_gated.1
= control target key start
LH: loop header
LB: loop body
LE: loop exit
PB: predicated region body
PF: predicated region fallthrough
CT: control target
= control target key end

     0   :  { %s4804_s0 = inlined_call_operand.hbm [shape: f32[300,1024], index: 0, kind: input, shape index: {}]   ;;  %s4805_s1 = inlined_call_operand.hbm [shape: f32[1024,512], index: 1, kind: input, shape index: {}]   ;;  %s4806_s2 = inlined_call_operand.hbm [shape: f32[1,512], index: 2, kind: input, shape index: {}]   ;;  %s4807_s3 = inlined_call_operand.hbm [shape: f32[1,256], index: 3, kind: input, shape index: {}]   ;;  %s4808_s4 = inlined_call_operand.<no memory space> [shape: f32[1,1], index: 4, kind: input, shape index: {}]   ;;  %s4809_s5 = inlined_call_operand.vmem [shape: f32[300,1], index: 5, kind: output, shape index: {}]  }
   0x1   :  { %v10_v0 = vstv %s4808_s4 }
   0x2   :  { %11 = vst [vmem:[#allocation2] sm:$0x1] %v10_v0 }
   0x3   :  { %12 = vsyncpa [#allocation4], 0 }
   0x4   :  { %14 = vsyncpa [#allocation4 + $0x1], 0 }
   0x5   :  { %15 = vsyncpa [#allocation6], 0 }
   0x6   :  { %16 = vsyncpa [#allocation9], 0  ;;  %s3667_s20 = smov 0   ;;  %s3669_s21 = smov 0  }
   0x7   :  { %s3671_s22 = smov 0   ;;  %s3673_s23 = smov 0  }
   0x8 LB: > { %s2961_s4 = sadd.s32 4294967295, %s3624_s23   ;;  %p42_p0 = scmp.ne.s32.totalorder %s3616_s21, %s3612_s20  ;;  %s3624_s23 = sphi %s3673_s23, %s4906_s23   ;;  %s3620_s22 = sphi %s3671_s22, %s4909_s22   ;;  %s3616_s21 = sphi %s3669_s21, %s4908_s21   ;;  %s3612_s20 = sphi %s3667_s20, %s4907_s20  }
   0x9   : > { %p3689_p1 = scmp.eq.s32.totalorder %s2961_s4, 0  ;;  %p2963_p2 = scmp.ge.s32.totalorder %s3624_s23, 1 }
   0xa   : > { %p163_p3 = scmp.lt.s32.totalorder %s3624_s23, 3  ;;  %s3626_s27 = smov [#allocation5]  }
   0xb   : > { %s4817_s24 = scalar_select %p3689_p1, 1, 0 }
   0xc   : > { %p3697_p4 = por %p3689_p1, %p42_p0  ;;  %p3701_p5 = pnand %p2963_p2, %p163_p3 }
   0xd   : > { %s175_s28 = sshll.u32 %s3626_s27, 4  ;;  %s3627_s30 = smov [#allocation7]   ;;  %s176_s28 = int_to_ptr.vmem [resolvable:$true] %s175_s28 }
   0xe   : > { %s4818_s25 = scalar_select %p3697_p4, 1, 0 }
   0xf   : > { %s4819_s26 = scalar_select %p3701_p5, 1, 0 }
  0x10   : > { %p3035_p6 = pneg %p3701_p5  ;;  %s189_s6 = sshll.u32 %s3627_s30, 4  ;;  %s190_s6 = int_to_ptr.vmem [resolvable:$true] %s189_s6 }
  0x11   : > { %s3628_s7 = smov [#allocation8]   ;;  %s3487_s9 = scalar_lea.vmem %s176_s28, 65536 }
  0x12   : > { %p3709_p7 = pnand %p3035_p6, %p3689_p1  ;;  %s200_s8 = sshll.u32 %s3628_s7, 4  ;;  %s201_s8 = int_to_ptr.vmem [resolvable:$true] %s200_s8 }
  0x13   : > { %p3488_p9 = scmp.ne.s32.totalorder %s176_s28, %s3487_s9  ;;  %p3495_p12 = scmp.lt.s32.totalorder %s176_s28, %s176_s28 }
  0x14   : > { %p3478_p8 = pneg %p3709_p7  ;;  %p3496_p13 = scmp.lt.s32.totalorder %s3487_s9, %s3487_s9 }
  0x16   : > { %p3490_p10 = pnand %p3488_p9, %p3478_p8  ;;  %p3497_p0 = por %p3496_p13, %p3495_p12 }
  0x18   : > { %p3491_p11 = pneg %p3490_p10 }
  0x1a   : > { %p3498_p2 = pnand %p3497_p0, %p3491_p11 }
  0x1c   : > { %3501 = shalt.err (!%p3498_p2)
}
  0x1d   : > { %s3629_s10 = smov 512   ;;  %s3630_s11 = smov 32  }
  0x1e   : > { %3038 = dma.hbm_to_vmem [thread:$0]  (!%p3709_p7), %s4805_s1, 65536, %s176_s28, [#allocation6], %s3629_s10, %s3629_s10, %s3630_s11  }
  0x1f   : > { %s3513_s14 = scalar_lea.vmem %s190_s6, 64  ;;  %p3521_p10 = scmp.lt.s32.totalorder %s190_s6, %s190_s6 }
  0x20   : > { %p3514_p3 = scmp.ne.s32.totalorder %s190_s6, %s3513_s14  ;;  %p3522_p1 = scmp.lt.s32.totalorder %s3513_s14, %s3513_s14 }
  0x22   : > { %p3516_p6 = pnand %p3514_p3, %p3478_p8  ;;  %p3523_p12 = por %p3522_p1, %p3521_p10 }
  0x24   : > { %p3517_p9 = pneg %p3516_p6 }
  0x26   : > { %p3524_p11 = pnand %p3523_p12, %p3517_p9 }
  0x28   : > { %3527 = shalt.err (!%p3524_p11)
}
  0x29   : > { %3041 = dma.hbm_to_vmem [thread:$0]  (!%p3709_p7), %s4806_s2, 64, %s190_s6, [#allocation6]  }
  0x2a   : > { %s3539_s17 = scalar_lea.vmem %s201_s8, 32  ;;  %p3547_p3 = scmp.lt.s32.totalorder %s201_s8, %s201_s8 }
  0x2b   : > { %p3540_p13 = scmp.ne.s32.totalorder %s201_s8, %s3539_s17  ;;  %p3548_p6 = scmp.lt.s32.totalorder %s3539_s17, %s3539_s17 }
  0x2d   : > { %p3542_p0 = pnand %p3540_p13, %p3478_p8  ;;  %p3549_p4 = por %p3548_p6, %p3547_p3 }
  0x2f   : > { %p3543_p2 = pneg %p3542_p0 }
  0x31   : > { %p3550_p1 = pnand %p3549_p4, %p3543_p2 }
  0x33   : > { %3553 = shalt.err (!%p3550_p1)
}
  0x34   : > { %3044 = dma.hbm_to_vmem [thread:$0]  (!%p3709_p7), %s4807_s3, 32, %s201_s8, [#allocation9]  }
  0x35   : > { %s3740_s20 = sadd.s32 1, %s3624_s23   ;;  %s29_s28 = sadd.s32 1, %s3620_s22 }
  0x36   : > { %s26_s27 = ssub.s32 %s3624_s23, %s3740_s20  ;;  %p36_p8 = scmp.ne.s32.totalorder %s3620_s22, %s3616_s21 }
  0x37   : > { %p27_p4 = scmp.eq.s32.totalorder %s26_s27, 0  ;;  %p37_p9 = scmp.eq.s32.totalorder %s3624_s23, 0 }
  0x38   : > { %p3052_p10 = scmp.lt.s32.totalorder %s3624_s23, 2  ;;  %s214_s30 = sand.u32 1, %s3620_s22  }
  0x39   : > { %s3750_s29 = scalar_select %p27_p4, %s3620_s22, %s29_s28  }
  0x3a   : > { %p38_p12 = por %p37_p9, %p36_p8  ;;  %s3019_s6 = smul.u32 1216, %s214_s30 }
  0x3b   : > { %s3018_s7 = smul.u32 19456, %s3624_s23  ;;  %s3765_s14 = scalar_lea.sflag [#allocation4], %s214_s30 }
  0x3c   : > { %p3754_p11 = pnand %p3052_p10, %p38_p12  ;;  %s218_s12 = scalar_lea.vmem [#allocation3], %s3019_s6 }
  0x3d   : > { %s3761_s11 = scalar_lea.hbm %s4804_s0, %s3018_s7  ;;  %s226_s13 = sshll.u32 %s218_s12, 4  ;;  %s3763_s13 = int_to_ptr.vmem [resolvable:$true] %s226_s13 }
  0x3e   : > { %s3554_s15 = scalar_lea.hbm %s3761_s11, 19456  ;;  %p3556_p13 = pneg %p3754_p11 }
  0x3f   : > { %p3555_p7 = scmp.ne.s32.totalorder %s3761_s11, %s3554_s15  ;;  %s3559_s18 = scalar_lea.hbm %s4804_s0, 38912 }
  0x40   : > { %p3560_p3 = scmp.lt.s32.totalorder %s3761_s11, %s4804_s0  ;;  %p3561_p6 = scmp.lt.s32.totalorder %s3559_s18, %s3554_s15 }
  0x41   : > { %p3557_p0 = pnand %p3556_p13, %p3555_p7 }
  0x42   : > { %p3562_p1 = por %p3561_p6, %p3560_p3 }
  0x43   : > { %p3558_p2 = pneg %p3557_p0 }
  0x45   : > { %p3563_p4 = pnand %p3562_p1, %p3558_p2 }
  0x47   : > { %3566 = shalt.err (!%p3563_p4)
}
  0x48   : > { %s3567_s28 = scalar_lea.vmem %s3763_s13, 19456  ;;  %s3631_s30 = smov [#allocation3]  }
  0x49   : > { %p3568_p8 = scmp.ne.s32.totalorder %s3763_s13, %s3567_s28  ;;  %s3572_s6 = sshll.u32 %s3631_s30, 4  ;;  %s3573_s6 = int_to_ptr.vmem [resolvable:$false] %s3572_s6 }
  0x4a   : > { %s3574_s7 = scalar_lea.vmem %s3573_s6, 38912  ;;  %p3575_p12 = scmp.lt.s32.totalorder %s3763_s13, %s3573_s6 }
  0x4b   : > { %p3570_p9 = pnand %p3568_p8, %p3556_p13  ;;  %p3576_p7 = scmp.lt.s32.totalorder %s3574_s7, %s3567_s28 }
  0x4d   : > { %p3571_p10 = pneg %p3570_p9  ;;  %p3577_p0 = por %p3576_p7, %p3575_p12 }
  0x4f   : > { %p3578_p5 = pnand %p3577_p0, %p3571_p10 }
  0x51   : > { %3581 = shalt.err (!%p3578_p5)
}
  0x52   : > { %s3632_s8 = smov 1024   ;;  %s3633_s10 = smov 64  }
  0x53   : > { %3048 = dma.hbm_to_vmem [thread:$0]  (!%p3754_p11), %s3761_s11, 19456, %s3763_s13, %s3765_s14, %s3632_s8, %s3632_s8, %s3633_s10  }
  0x54   : > { %p4822_p13 = scmp.ne.s32.totalorder %s4819_s26, 0 }
  0x56   : > { %238 = sbr.rel (%p4822_p13) target bundleno = 925 (0x39d), region = 40 }
  0x5b   : > { %s240_s12 = sand.u32 1, %s3616_s21   ;;  %p4823_p2 = scmp.ne.s32.totalorder %s4818_s25, 0 }
  0x5c   : > { %s3020_s15 = smul.u32 1216, %s240_s12  ;;  %s241_s16 = scalar_lea.sflag [#allocation4], %s240_s12 }
  0x5e   : > { %s3789_s17 = scalar_lea.vmem [#allocation3], %s3020_s15 }
  0x5f   : > { %3599 = dma.done.wait (%p4823_p2), %s241_s16, 19456  }
  0x60   : > { %3601 = vsyncadd (%p4823_p2), %s241_s16, 4294947840  ;;  %p4824_p5 = scmp.ne.s32.totalorder %s4817_s24, 0 }
  0x62   : > { %3603 = dma.done.wait (%p4824_p5), [#allocation6], 65600  }
  0x63   : > { %3605 = vsyncadd (%p4824_p5), [#allocation6], 4294901696 }
  0x64   : > { %3607 = dma.done.wait (%p4824_p5), [#allocation9], 32  }
  0x65   : > { %3609 = vsyncadd (%p4824_p5), [#allocation9], 4294967264  ;;  %v503_v1 = vld [vmem:[#allocation5 + $0x1e8] sm:$0xff]  ;;  %v502_v2 = vld [vmem:[#allocation5 + $0x1e0] sm:$0xff]  ;;  %s284_s24 = smul.u32 19, %s2961_s4  ;;  %vm2845_vm0 = vcmask 7168  }
  0x66   : > { %v631_v3 = vld [vmem:[#allocation5 + $0x5e8] sm:$0xff]  ;;  %976 = vmatprep.subr.mxu0 %v503_v1  ;;  %v630_v5 = vld [vmem:[#allocation5 + $0x5e0] sm:$0xff] }
  0x67   : > { %1155 = vmatprep.subr.mxu1 %v631_v3  ;;  %v499_v4 = vld [vmem:[#allocation5 + $0x1c8] sm:$0xff]  ;;  %v498_v6 = vld [vmem:[#allocation5 + $0x1c0] sm:$0xff]  ;;  %977 = vmatpush1.msra.mxu0 %v502_v2  ;;  %p285_p11 = scmp.lt.s32.totalorder %s284_s24, 37 }
  0x68   : > { %1156 = vmatpush1.msra.mxu1 %v630_v5  ;;  %v627_v7 = vld [vmem:[#allocation5 + $0x5c8] sm:$0xff]  ;;  %v626_v9 = vld [vmem:[#allocation5 + $0x5c0] sm:$0xff]  ;;  %978 = vmatprep.subr.mxu0 %v499_v4 }
  0x69   : > { %v495_v8 = vld [vmem:[#allocation5 + $0x1a8] sm:$0xff]  ;;  %1157 = vmatprep.subr.mxu1 %v627_v7  ;;  %v494_v10 = vld [vmem:[#allocation5 + $0x1a0] sm:$0xff]  ;;  %979 = vmatpush1.msra.mxu0 %v498_v6  ;;  %s4911_s24 = smov (!%p285_p11, %s284_s24), 37 }
  0x6a   : > { %v623_v11 = vld [vmem:[#allocation5 + $0x5a8] sm:$0xff]  ;;  %1158 = vmatpush1.msra.mxu1 %v626_v9  ;;  %v622_v13 = vld [vmem:[#allocation5 + $0x5a0] sm:$0xff]  ;;  %980 = vmatprep.subr.mxu0 %v495_v8  ;;  %s2974_s25 = sshll.u32 %s4911_s24, 3 }
  0x6b   : > { %v491_v12 = vld [vmem:[#allocation5 + $0x188] sm:$0xff]  ;;  %1159 = vmatprep.subr.mxu1 %v623_v11  ;;  %v490_v15 = vld [vmem:[#allocation5 + $0x180] sm:$0xff]  ;;  %981 = vmatpush1.msra.mxu0 %v494_v10  ;;  %s4751_s11 = scalar_lea.vmem %s4809_s5, %s2974_s25 }
  0x6c   : > { %v619_v14 = vld [vmem:[#allocation5 + $0x588] sm:$0xff]  ;;  %v618_v16 = vld [vmem:[#allocation5 + $0x580] sm:$0xff]  ;;  %1160 = vmatpush1.msra.mxu1 %v622_v13  ;;  %982 = vmatprep.subr.mxu0 %v491_v12 }
  0x6d   : > { %v487_v17 = vld [vmem:[#allocation5 + $0x168] sm:$0xff]  ;;  %1161 = vmatprep.subr.mxu1 %v619_v14  ;;  %v486_v19 = vld [vmem:[#allocation5 + $0x160] sm:$0xff]  ;;  %983 = vmatpush1.msra.mxu0 %v490_v15 }
  0x6e   : > { %v615_v18 = vld [vmem:[#allocation5 + $0x568] sm:$0xff]  ;;  %v614_v20 = vld [vmem:[#allocation5 + $0x560] sm:$0xff]  ;;  %1162 = vmatpush1.msra.mxu1 %v618_v16  ;;  %984 = vmatprep.subr.mxu0 %v487_v17 }
  0x6f   : > { %v483_v21 = vld [vmem:[#allocation5 + $0x148] sm:$0xff]  ;;  %1163 = vmatprep.subr.mxu1 %v615_v18  ;;  %v482_v23 = vld [vmem:[#allocation5 + $0x140] sm:$0xff]  ;;  %985 = vmatpush1.msra.mxu0 %v486_v19 }
  0x70   : > { %v611_v22 = vld [vmem:[#allocation5 + $0x548] sm:$0xff]  ;;  %v610_v24 = vld [vmem:[#allocation5 + $0x540] sm:$0xff]  ;;  %1164 = vmatpush1.msra.mxu1 %v614_v20  ;;  %986 = vmatprep.subr.mxu0 %v483_v21 }
  0x71   : > { %v479_v25 = vld [vmem:[#allocation5 + $0x128] sm:$0xff]  ;;  %1165 = vmatprep.subr.mxu1 %v611_v22  ;;  %v478_v27 = vld [vmem:[#allocation5 + $0x120] sm:$0xff]  ;;  %987 = vmatpush1.msra.mxu0 %v482_v23 }
  0x72   : > { %v607_v26 = vld [vmem:[#allocation5 + $0x528] sm:$0xff]  ;;  %v606_v28 = vld [vmem:[#allocation5 + $0x520] sm:$0xff]  ;;  %1166 = vmatpush1.msra.mxu1 %v610_v24  ;;  %988 = vmatprep.subr.mxu0 %v479_v25 }
  0x73   : > { %v475_v29 = vld [vmem:[#allocation5 + $0x108] sm:$0xff]  ;;  %1167 = vmatprep.subr.mxu1 %v607_v26  ;;  %v474_v31 = vld [vmem:[#allocation5 + $0x100] sm:$0xff]  ;;  %989 = vmatpush1.msra.mxu0 %v478_v27 }
  0x74   : > { %v603_v30 = vld [vmem:[#allocation5 + $0x508] sm:$0xff]  ;;  %v602_v32 = vld [vmem:[#allocation5 + $0x500] sm:$0xff]  ;;  %1168 = vmatpush1.msra.mxu1 %v606_v28  ;;  %990 = vmatprep.subr.mxu0 %v475_v29 }
  0x75   : > { %v471_v33 = vld [vmem:[#allocation5 + $0xe8] sm:$0xff]  ;;  %1169 = vmatprep.subr.mxu1 %v603_v30  ;;  %v470_v35 = vld [vmem:[#allocation5 + $0xe0] sm:$0xff]  ;;  %991 = vmatpush1.msra.mxu0 %v474_v31 }
  0x76   : > { %v599_v34 = vld [vmem:[#allocation5 + $0x4e8] sm:$0xff]  ;;  %v598_v36 = vld [vmem:[#allocation5 + $0x4e0] sm:$0xff]  ;;  %1170 = vmatpush1.msra.mxu1 %v602_v32  ;;  %992 = vmatprep.subr.mxu0 %v471_v33 }
  0x77   : > { %v467_v37 = vld [vmem:[#allocation5 + $0xc8] sm:$0xff]  ;;  %1171 = vmatprep.subr.mxu1 %v599_v34  ;;  %v466_v39 = vld [vmem:[#allocation5 + $0xc0] sm:$0xff]  ;;  %993 = vmatpush1.msra.mxu0 %v470_v35 }
  0x78   : > { %v595_v38 = vld [vmem:[#allocation5 + $0x4c8] sm:$0xff]  ;;  %v594_v40 = vld [vmem:[#allocation5 + $0x4c0] sm:$0xff]  ;;  %1172 = vmatpush1.msra.mxu1 %v598_v36  ;;  %994 = vmatprep.subr.mxu0 %v467_v37 }
  0x79   : > { %v463_v41 = vld [vmem:[#allocation5 + $0xa8] sm:$0xff]  ;;  %1173 = vmatprep.subr.mxu1 %v595_v38  ;;  %v462_v43 = vld [vmem:[#allocation5 + $0xa0] sm:$0xff]  ;;  %995 = vmatpush1.msra.mxu0 %v466_v39 }
  0x7a   : > { %v591_v42 = vld [vmem:[#allocation5 + $0x4a8] sm:$0xff]  ;;  %v590_v44 = vld [vmem:[#allocation5 + $0x4a0] sm:$0xff]  ;;  %1174 = vmatpush1.msra.mxu1 %v594_v40  ;;  %996 = vmatprep.subr.mxu0 %v463_v41 }
  0x7b   : > { %v459_v45 = vld [vmem:[#allocation5 + $0x88] sm:$0xff]  ;;  %1175 = vmatprep.subr.mxu1 %v591_v42  ;;  %v458_v47 = vld [vmem:[#allocation5 + $0x80] sm:$0xff]  ;;  %997 = vmatpush1.msra.mxu0 %v462_v43 }
  0x7c   : > { %v587_v46 = vld [vmem:[#allocation5 + $0x488] sm:$0xff]  ;;  %v586_v48 = vld [vmem:[#allocation5 + $0x480] sm:$0xff]  ;;  %1176 = vmatpush1.msra.mxu1 %v590_v44  ;;  %998 = vmatprep.subr.mxu0 %v459_v45 }
  0x7d   : > { %v455_v49 = vld [vmem:[#allocation5 + $0x68] sm:$0xff]  ;;  %1177 = vmatprep.subr.mxu1 %v587_v46  ;;  %v454_v51 = vld [vmem:[#allocation5 + $0x60] sm:$0xff]  ;;  %999 = vmatpush1.msra.mxu0 %v458_v47 }
  0x7e   : > { %v583_v50 = vld [vmem:[#allocation5 + $0x468] sm:$0xff]  ;;  %v582_v52 = vld [vmem:[#allocation5 + $0x460] sm:$0xff]  ;;  %1178 = vmatpush1.msra.mxu1 %v586_v48  ;;  %1000 = vmatprep.subr.mxu0 %v455_v49 }
  0x7f   : > { %v451_v53 = vld [vmem:[#allocation5 + $0x48] sm:$0xff]  ;;  %1179 = vmatprep.subr.mxu1 %v583_v50  ;;  %v450_v55 = vld [vmem:[#allocation5 + $0x40] sm:$0xff]  ;;  %1001 = vmatpush1.msra.mxu0 %v454_v51 }
  0x80   : > { %v579_v54 = vld [vmem:[#allocation5 + $0x448] sm:$0xff]  ;;  %v578_v56 = vld [vmem:[#allocation5 + $0x440] sm:$0xff]  ;;  %1180 = vmatpush1.msra.mxu1 %v582_v52  ;;  %1002 = vmatprep.subr.mxu0 %v451_v53 }
  0x81   : > { %v447_v57 = vld [vmem:[#allocation5 + $0x28] sm:$0xff]  ;;  %1181 = vmatprep.subr.mxu1 %v579_v54  ;;  %v446_v59 = vld [vmem:[#allocation5 + $0x20] sm:$0xff]  ;;  %1003 = vmatpush1.msra.mxu0 %v450_v55 }
  0x82   : > { %v575_v58 = vld [vmem:[#allocation5 + $0x428] sm:$0xff]  ;;  %v574_v60 = vld [vmem:[#allocation5 + $0x420] sm:$0xff]  ;;  %1182 = vmatpush1.msra.mxu1 %v578_v56  ;;  %1004 = vmatprep.subr.mxu0 %v447_v57 }
  0x83   : > { %v443_v61 = vld [vmem:[#allocation5 + $0x8] sm:$0xff]  ;;  %1183 = vmatprep.subr.mxu1 %v575_v58  ;;  %v442_v63 = vld [vmem:[#allocation5] sm:$0xff]  ;;  %1005 = vmatpush1.msra.mxu0 %v446_v59 }
  0x84   : > { %v571_v62 = vld [vmem:[#allocation5 + $0x408] sm:$0xff]  ;;  %v570_v0 = vld [vmem:[#allocation5 + $0x400] sm:$0xff]  ;;  %1184 = vmatpush1.msra.mxu1 %v574_v60  ;;  %1006 = vmatprep.subr.mxu0 %v443_v61 }
  0x85   : > { %v567_v1 = vld [vmem:[#allocation5 + $0x3e8] sm:$0xff]  ;;  %1185 = vmatprep.subr.mxu1 %v571_v62  ;;  %v566_v3 = vld [vmem:[#allocation5 + $0x3e0] sm:$0xff]  ;;  %1007 = vmatpush1.msra.mxu0 %v442_v63 }
  0x86   : > { %v695_v2 = vld [vmem:[#allocation5 + $0x7e8] sm:$0xff]  ;;  %v694_v4 = vld [vmem:[#allocation5 + $0x7e0] sm:$0xff]  ;;  %1186 = vmatpush1.msra.mxu1 %v570_v0  ;;  %1008 = vmatprep.subr.mxu0 %v567_v1 }
  0x87   : > { %v563_v5 = vld [vmem:[#allocation5 + $0x3c8] sm:$0xff]  ;;  %1187 = vmatprep.subr.mxu1 %v695_v2  ;;  %v562_v7 = vld [vmem:[#allocation5 + $0x3c0] sm:$0xff]  ;;  %1009 = vmatpush2.msra.mxu0 %v566_v3  ;;  %v293_v3 = vld [vmem:[%s3789_s17 + $0x18] sm:$0xff] }
  0x88   : > { %v691_v6 = vld [vmem:[#allocation5 + $0x7c8] sm:$0xff]  ;;  %v690_v8 = vld [vmem:[#allocation5 + $0x7c0] sm:$0xff]  ;;  %1188 = vmatpush2.msra.mxu1 %v694_v4  ;;  %1010 = vmatprep.subr.mxu0 %v563_v5  ;;  %v292_v5 = vld [vmem:[%s3789_s17 + $0x10] sm:$0xff] }
  0x89   : > { %v559_v9 = vld [vmem:[#allocation5 + $0x3a8] sm:$0xff]  ;;  %1189 = vmatprep.subr.mxu1 %v691_v6  ;;  %v558_v11 = vld [vmem:[#allocation5 + $0x3a0] sm:$0xff]  ;;  %1011 = vmatpush2.msra.mxu0 %v562_v7 }
  0x8a   : > { %v687_v10 = vld [vmem:[#allocation5 + $0x7a8] sm:$0xff]  ;;  %v686_v12 = vld [vmem:[#allocation5 + $0x7a0] sm:$0xff]  ;;  %1190 = vmatpush2.msra.mxu1 %v690_v8  ;;  %1012 = vmatprep.subr.mxu0 %v559_v9 }
  0x8b   : > { %v555_v13 = vld [vmem:[#allocation5 + $0x388] sm:$0xff]  ;;  %1191 = vmatprep.subr.mxu1 %v687_v10  ;;  %v554_v15 = vld [vmem:[#allocation5 + $0x380] sm:$0xff]  ;;  %1013 = vmatpush2.msra.mxu0 %v558_v11 }
  0x8c   : > { %v683_v14 = vld [vmem:[#allocation5 + $0x788] sm:$0xff]  ;;  %v682_v16 = vld [vmem:[#allocation5 + $0x780] sm:$0xff]  ;;  %1192 = vmatpush2.msra.mxu1 %v686_v12  ;;  %1014 = vmatprep.subr.mxu0 %v555_v13  ;;  %v301_v12 = vld [vmem:[%s3789_s17 + $0x58] sm:$0xff] }
  0x8d   : > { %v551_v17 = vld [vmem:[#allocation5 + $0x368] sm:$0xff]  ;;  %1193 = vmatprep.subr.mxu1 %v683_v14  ;;  %v550_v19 = vld [vmem:[#allocation5 + $0x360] sm:$0xff]  ;;  %1015 = vmatpush2.msra.mxu0 %v554_v15  ;;  %v300_v14 = vld [vmem:[%s3789_s17 + $0x50] sm:$0xff] }
  0x8e   : > { %v679_v18 = vld [vmem:[#allocation5 + $0x768] sm:$0xff]  ;;  %v678_v20 = vld [vmem:[#allocation5 + $0x760] sm:$0xff]  ;;  %1194 = vmatpush2.msra.mxu1 %v682_v16  ;;  %1016 = vmatprep.subr.mxu0 %v551_v17 }
  0x8f   : > { %v547_v21 = vld [vmem:[#allocation5 + $0x348] sm:$0xff]  ;;  %1195 = vmatprep.subr.mxu1 %v679_v18  ;;  %v546_v23 = vld [vmem:[#allocation5 + $0x340] sm:$0xff]  ;;  %1017 = vmatpush2.msra.mxu0 %v550_v19 }
  0x90   : > { %v675_v22 = vld [vmem:[#allocation5 + $0x748] sm:$0xff]  ;;  %v674_v24 = vld [vmem:[#allocation5 + $0x740] sm:$0xff]  ;;  %1196 = vmatpush2.msra.mxu1 %v678_v20  ;;  %1018 = vmatprep.subr.mxu0 %v547_v21 }
  0x91   : > { %v543_v25 = vld [vmem:[#allocation5 + $0x328] sm:$0xff]  ;;  %1197 = vmatprep.subr.mxu1 %v675_v22  ;;  %v542_v27 = vld [vmem:[#allocation5 + $0x320] sm:$0xff]  ;;  %1019 = vmatpush2.msra.mxu0 %v546_v23  ;;  %v309_v22 = vld [vmem:[%s3789_s17 + $0x98] sm:$0xff] }
  0x92   : > { %v671_v26 = vld [vmem:[#allocation5 + $0x728] sm:$0xff]  ;;  %v670_v28 = vld [vmem:[#allocation5 + $0x720] sm:$0xff]  ;;  %1198 = vmatpush2.msra.mxu1 %v674_v24  ;;  %1020 = vmatprep.subr.mxu0 %v543_v25  ;;  %v308_v25 = vld [vmem:[%s3789_s17 + $0x90] sm:$0xff] }
  0x93   : > { %v539_v29 = vld [vmem:[#allocation5 + $0x308] sm:$0xff]  ;;  %1199 = vmatprep.subr.mxu1 %v671_v26  ;;  %v538_v31 = vld [vmem:[#allocation5 + $0x300] sm:$0xff]  ;;  %1021 = vmatpush2.msra.mxu0 %v542_v27 }
  0x94   : > { %v667_v30 = vld [vmem:[#allocation5 + $0x708] sm:$0xff]  ;;  %v666_v32 = vld [vmem:[#allocation5 + $0x700] sm:$0xff]  ;;  %1200 = vmatpush2.msra.mxu1 %v670_v28  ;;  %1022 = vmatprep.subr.mxu0 %v539_v29 }
  0x95   : > { %v535_v33 = vld [vmem:[#allocation5 + $0x2e8] sm:$0xff]  ;;  %1201 = vmatprep.subr.mxu1 %v667_v30  ;;  %v534_v35 = vld [vmem:[#allocation5 + $0x2e0] sm:$0xff]  ;;  %1023 = vmatpush2.msra.mxu0 %v538_v31 }
  0x96   : > { %v663_v34 = vld [vmem:[#allocation5 + $0x6e8] sm:$0xff]  ;;  %v662_v36 = vld [vmem:[#allocation5 + $0x6e0] sm:$0xff]  ;;  %1202 = vmatpush2.msra.mxu1 %v666_v32  ;;  %1024 = vmatprep.subr.mxu0 %v535_v33  ;;  %v317_v33 = vld [vmem:[%s3789_s17 + $0xd8] sm:$0xff] }
  0x97   : > { %v531_v37 = vld [vmem:[#allocation5 + $0x2c8] sm:$0xff]  ;;  %1203 = vmatprep.subr.mxu1 %v663_v34  ;;  %v530_v39 = vld [vmem:[#allocation5 + $0x2c0] sm:$0xff]  ;;  %1025 = vmatpush2.msra.mxu0 %v534_v35 }
  0x98   : > { %v659_v38 = vld [vmem:[#allocation5 + $0x6c8] sm:$0xff]  ;;  %v658_v40 = vld [vmem:[#allocation5 + $0x6c0] sm:$0xff]  ;;  %1204 = vmatpush2.msra.mxu1 %v662_v36  ;;  %1026 = vmatprep.subr.mxu0 %v531_v37  ;;  %v316_v36 = vld [vmem:[%s3789_s17 + $0xd0] sm:$0xff] }
  0x99   : > { %v527_v41 = vld [vmem:[#allocation5 + $0x2a8] sm:$0xff]  ;;  %1205 = vmatprep.subr.mxu1 %v659_v38  ;;  %v526_v43 = vld [vmem:[#allocation5 + $0x2a0] sm:$0xff]  ;;  %1027 = vmatpush2.msra.mxu0 %v530_v39 }
  0x9a   : > { %v655_v42 = vld [vmem:[#allocation5 + $0x6a8] sm:$0xff]  ;;  %v654_v44 = vld [vmem:[#allocation5 + $0x6a0] sm:$0xff]  ;;  %1206 = vmatpush2.msra.mxu1 %v658_v40  ;;  %1028 = vmatprep.subr.mxu0 %v527_v41 }
  0x9b   : > { %v523_v45 = vld [vmem:[#allocation5 + $0x288] sm:$0xff]  ;;  %1207 = vmatprep.subr.mxu1 %v655_v42  ;;  %v522_v47 = vld [vmem:[#allocation5 + $0x280] sm:$0xff]  ;;  %1029 = vmatpush2.msra.mxu0 %v526_v43 }
  0x9c   : > { %v651_v46 = vld [vmem:[#allocation5 + $0x688] sm:$0xff]  ;;  %v650_v48 = vld [vmem:[#allocation5 + $0x680] sm:$0xff]  ;;  %1208 = vmatpush2.msra.mxu1 %v654_v44  ;;  %1030 = vmatprep.subr.mxu0 %v523_v45  ;;  %v325_v44 = vld [vmem:[%s3789_s17 + $0x118] sm:$0xff] }
  0x9d   : > { %v519_v49 = vld [vmem:[#allocation5 + $0x268] sm:$0xff]  ;;  %1209 = vmatprep.subr.mxu1 %v651_v46  ;;  %v518_v51 = vld [vmem:[#allocation5 + $0x260] sm:$0xff]  ;;  %1031 = vmatpush2.msra.mxu0 %v522_v47  ;;  %v324_v46 = vld [vmem:[%s3789_s17 + $0x110] sm:$0xff] }
  0x9e   : > { %v647_v50 = vld [vmem:[#allocation5 + $0x668] sm:$0xff]  ;;  %v646_v52 = vld [vmem:[#allocation5 + $0x660] sm:$0xff]  ;;  %1210 = vmatpush2.msra.mxu1 %v650_v48  ;;  %1032 = vmatprep.subr.mxu0 %v519_v49 }
  0x9f   : > { %v515_v53 = vld [vmem:[#allocation5 + $0x248] sm:$0xff]  ;;  %1211 = vmatprep.subr.mxu1 %v647_v50  ;;  %v514_v55 = vld [vmem:[#allocation5 + $0x240] sm:$0xff]  ;;  %1033 = vmatpush2.msra.mxu0 %v518_v51 }
  0xa0   : > { %v643_v54 = vld [vmem:[#allocation5 + $0x648] sm:$0xff]  ;;  %v642_v56 = vld [vmem:[#allocation5 + $0x640] sm:$0xff]  ;;  %1212 = vmatpush2.msra.mxu1 %v646_v52  ;;  %1034 = vmatprep.subr.mxu0 %v515_v53 }
  0xa1   : > { %v511_v57 = vld [vmem:[#allocation5 + $0x228] sm:$0xff]  ;;  %1213 = vmatprep.subr.mxu1 %v643_v54  ;;  %v510_v59 = vld [vmem:[#allocation5 + $0x220] sm:$0xff]  ;;  %1035 = vmatpush2.msra.mxu0 %v514_v55  ;;  %v333_v55 = vld [vmem:[%s3789_s17 + $0x158] sm:$0xff] }
  0xa2   : > { %v639_v58 = vld [vmem:[#allocation5 + $0x628] sm:$0xff]  ;;  %v638_v60 = vld [vmem:[#allocation5 + $0x620] sm:$0xff]  ;;  %1214 = vmatpush2.msra.mxu1 %v642_v56  ;;  %1036 = vmatprep.subr.mxu0 %v511_v57 }
  0xa3   : > { %v507_v61 = vld [vmem:[#allocation5 + $0x208] sm:$0xff]  ;;  %1215 = vmatprep.subr.mxu1 %v639_v58  ;;  %v506_v63 = vld [vmem:[#allocation5 + $0x200] sm:$0xff]  ;;  %1037 = vmatpush2.msra.mxu0 %v510_v59  ;;  %v332_v59 = vld [vmem:[%s3789_s17 + $0x150] sm:$0xff] }
  0xa4   : > { %v291_v62 = vld [vmem:[%s3789_s17 + $0x8] sm:$0xff]  ;;  %1216 = vmatpush2.msra.mxu1 %v638_v60  ;;  %v290_v1 = vld [vmem:[%s3789_s17] sm:$0xff]  ;;  %1038 = vmatprep.subr.mxu0 %v507_v61 }
  0xa5   : > { %v635_v0 = vld [vmem:[#allocation5 + $0x608] sm:$0xff]  ;;  %v634_v2 = vld [vmem:[#allocation5 + $0x600] sm:$0xff]  ;;  %1040 = vmatprep.mubr.f32.mxu0 %v291_v62  ;;  %1039 = vmatpush2.msra.mxu0 %v506_v63 }
  0xa6   : > { %v759_v4 = vld [vmem:[#allocation5 + $0x9e8] sm:$0xff]  ;;  %1217 = vmatprep.subr.mxu1 %v635_v0  ;;  %v758_v6 = vld [vmem:[#allocation5 + $0x9e0] sm:$0xff]  ;;  %1041 = vmatmul.mubr.f32.vlgmr.msra.gmra.mxu0 %v290_v1  ;;  %v341_v0 = vld [vmem:[%s3789_s17 + $0x198] sm:$0xff] }
  0xa7   : > { %1218 = vmatpush2.msra.mxu1 %v634_v2  ;;  %v887_v7 = vld [vmem:[#allocation5 + $0xde8] sm:$0xff]  ;;  %1219 = vmatprep.mubr.f32.mxu1 %v293_v3  ;;  %v886_v10 = vld [vmem:[#allocation5 + $0xde0] sm:$0xff] }
  0xa8   : > { %v299_v8 = vld [vmem:[%s3789_s17 + $0x48] sm:$0xff]  ;;  %1334 = vmatprep.subr.mxu0 %v759_v4  ;;  %1220 = vmatmul.mubr.f32.vlgmr.msra.gmra.mxu1 %v292_v5  ;;  %v298_v11 = vld [vmem:[%s3789_s17 + $0x40] sm:$0xff]  ;;  %v340_v4 = vld [vmem:[%s3789_s17 + $0x190] sm:$0xff] }
  0xa9   : > { %v755_v9 = vld [vmem:[#allocation5 + $0x9c8] sm:$0xff]  ;;  %1335 = vmatpush1.msra.mxu0 %v758_v6  ;;  %1513 = vmatprep.subr.mxu1 %v887_v7  ;;  %v754_v13 = vld [vmem:[#allocation5 + $0x9c0] sm:$0xff] }
  0xaa   : > { %1046 = vmatprep.mubr.f32.mxu0 %v299_v8  ;;  %1336 = vmatprep.subr.mxu0 %v755_v9  ;;  %v751_v15 = vld [vmem:[#allocation5 + $0x9a8] sm:$0xff]  ;;  %v750_v17 = vld [vmem:[#allocation5 + $0x9a0] sm:$0xff] }
  0xab   : > { %1514 = vmatpush1.msra.mxu1 %v886_v10  ;;  %v883_v16 = vld [vmem:[#allocation5 + $0xdc8] sm:$0xff]  ;;  %1047 = vmatmul.mubr.f32.gmra.mxu0 %v298_v11  ;;  %v882_v18 = vld [vmem:[#allocation5 + $0xdc0] sm:$0xff] }
  0xac   : > { %1225 = vmatprep.mubr.f32.mxu1 %v301_v12  ;;  %1337 = vmatpush1.msra.mxu0 %v754_v13  ;;  %v307_v19 = vld [vmem:[%s3789_s17 + $0x88] sm:$0xff]  ;;  %v306_v21 = vld [vmem:[%s3789_s17 + $0x80] sm:$0xff]  ;;  %v349_v12 = vld [vmem:[%s3789_s17 + $0x1d8] sm:$0xff] }
  0xad   : > { %1226 = vmatmul.mubr.f32.gmra.mxu1 %v300_v14  ;;  %v879_v20 = vld [vmem:[#allocation5 + $0xda8] sm:$0xff]  ;;  %1338 = vmatprep.subr.mxu0 %v751_v15  ;;  %v878_v24 = vld [vmem:[#allocation5 + $0xda0] sm:$0xff]  ;;  %v348_v14 = vld [vmem:[%s3789_s17 + $0x1d0] sm:$0xff] }
  0xae   : > { %1515 = vmatprep.subr.mxu1 %v883_v16  ;;  %1339 = vmatpush1.msra.mxu0 %v750_v17  ;;  %v747_v23 = vld [vmem:[#allocation5 + $0x988] sm:$0xff]  ;;  %v746_v26 = vld [vmem:[#allocation5 + $0x980] sm:$0xff] }
  0xaf   : > { %1516 = vmatpush1.msra.mxu1 %v882_v18  ;;  %1052 = vmatprep.mubr.f32.mxu0 %v307_v19  ;;  %v743_v27 = vld [vmem:[#allocation5 + $0x968] sm:$0xff]  ;;  %v742_v30 = vld [vmem:[#allocation5 + $0x960] sm:$0xff] }
  0xb0   : > { %1517 = vmatprep.subr.mxu1 %v879_v20  ;;  %1053 = vmatmul.mubr.f32.gmra.mxu0 %v306_v21  ;;  %v875_v28 = vld [vmem:[#allocation5 + $0xd88] sm:$0xff]  ;;  %v874_v31 = vld [vmem:[#allocation5 + $0xd80] sm:$0xff] }
  0xb1   : > { %1231 = vmatprep.mubr.f32.mxu1 %v309_v22  ;;  %1340 = vmatprep.subr.mxu0 %v747_v23  ;;  %v315_v29 = vld [vmem:[%s3789_s17 + $0xc8] sm:$0xff]  ;;  %v314_v32 = vld [vmem:[%s3789_s17 + $0xc0] sm:$0xff]  ;;  %v357_v23 = vld [vmem:[%s3789_s17 + $0x218] sm:$0xff] }
  0xb2   : > { %1518 = vmatpush1.msra.mxu1 %v878_v24  ;;  %1341 = vmatpush1.msra.mxu0 %v746_v26  ;;  %v739_v34 = vld [vmem:[#allocation5 + $0x948] sm:$0xff]  ;;  %v738_v37 = vld [vmem:[#allocation5 + $0x940] sm:$0xff] }
  0xb3   : > { %1232 = vmatmul.mubr.f32.gmra.mxu1 %v308_v25  ;;  %1342 = vmatprep.subr.mxu0 %v743_v27  ;;  %v871_v35 = vld [vmem:[#allocation5 + $0xd68] sm:$0xff]  ;;  %v870_v38 = vld [vmem:[#allocation5 + $0xd60] sm:$0xff]  ;;  %v356_v27 = vld [vmem:[%s3789_s17 + $0x210] sm:$0xff] }
  0xb4   : > { %1519 = vmatprep.subr.mxu1 %v875_v28  ;;  %1058 = vmatprep.mubr.f32.mxu0 %v315_v29  ;;  %v867_v39 = vld [vmem:[#allocation5 + $0xd48] sm:$0xff]  ;;  %v866_v42 = vld [vmem:[#allocation5 + $0xd40] sm:$0xff] }
  0xb5   : > { %1343 = vmatpush1.msra.mxu0 %v742_v30  ;;  %1520 = vmatpush1.msra.mxu1 %v874_v31  ;;  %v323_v40 = vld [vmem:[%s3789_s17 + $0x108] sm:$0xff]  ;;  %v322_v43 = vld [vmem:[%s3789_s17 + $0x100] sm:$0xff] }
  0xb6   : > { %1059 = vmatmul.mubr.f32.gmra.mxu0 %v314_v32  ;;  %1237 = vmatprep.mubr.f32.mxu1 %v317_v33  ;;  %v735_v41 = vld [vmem:[#allocation5 + $0x928] sm:$0xff]  ;;  %v734_v45 = vld [vmem:[#allocation5 + $0x920] sm:$0xff]  ;;  %v365_v32 = vld [vmem:[%s3789_s17 + $0x258] sm:$0xff] }
  0xb7   : > { %1344 = vmatprep.subr.mxu0 %v739_v34  ;;  %1521 = vmatprep.subr.mxu1 %v871_v35  ;;  %v731_v47 = vld [vmem:[#allocation5 + $0x908] sm:$0xff]  ;;  %v730_v49 = vld [vmem:[#allocation5 + $0x900] sm:$0xff] }
  0xb8   : > { %1238 = vmatmul.mubr.f32.gmra.mxu1 %v316_v36  ;;  %1345 = vmatpush1.msra.mxu0 %v738_v37  ;;  %v863_v48 = vld [vmem:[#allocation5 + $0xd28] sm:$0xff]  ;;  %v862_v50 = vld [vmem:[#allocation5 + $0xd20] sm:$0xff]  ;;  %v364_v36 = vld [vmem:[%s3789_s17 + $0x250] sm:$0xff] }
  0xb9   : > { %1522 = vmatpush1.msra.mxu1 %v870_v38  ;;  %1064 = vmatprep.mubr.f32.mxu0 %v323_v40  ;;  %v331_v51 = vld [vmem:[%s3789_s17 + $0x148] sm:$0xff]  ;;  %v330_v54 = vld [vmem:[%s3789_s17 + $0x140] sm:$0xff] }
  0xba   : > { %1523 = vmatprep.subr.mxu1 %v867_v39  ;;  %1346 = vmatprep.subr.mxu0 %v735_v41  ;;  %v727_v52 = vld [vmem:[#allocation5 + $0x8e8] sm:$0xff]  ;;  %v726_v56 = vld [vmem:[#allocation5 + $0x8e0] sm:$0xff] }
  0xbb   : > { %1524 = vmatpush1.msra.mxu1 %v866_v42  ;;  %1065 = vmatmul.mubr.f32.gmra.mxu0 %v322_v43  ;;  %v859_v53 = vld [vmem:[#allocation5 + $0xd08] sm:$0xff]  ;;  %v858_v57 = vld [vmem:[#allocation5 + $0xd00] sm:$0xff] }
  0xbc   : > { %1243 = vmatprep.mubr.f32.mxu1 %v325_v44  ;;  %1347 = vmatpush1.msra.mxu0 %v734_v45  ;;  %v723_v58 = vld [vmem:[#allocation5 + $0x8c8] sm:$0xff]  ;;  %v854_v61 = vld [vmem:[#allocation5 + $0xce0] sm:$0xff]  ;;  %v373_v45 = vld [vmem:[%s3789_s17 + $0x298] sm:$0xff] }
  0xbd   : > { %1244 = vmatmul.mubr.f32.gmra.mxu1 %v324_v46  ;;  %1348 = vmatprep.subr.mxu0 %v731_v47  ;;  %v855_v60 = vld [vmem:[#allocation5 + $0xce8] sm:$0xff]  ;;  %v722_v63 = vld [vmem:[#allocation5 + $0x8c0] sm:$0xff]  ;;  %v372_v47 = vld [vmem:[%s3789_s17 + $0x290] sm:$0xff] }
  0xbe   : > { %1525 = vmatprep.subr.mxu1 %v863_v48  ;;  %1349 = vmatpush1.msra.mxu0 %v730_v49  ;;  %v339_v62 = vld [vmem:[%s3789_s17 + $0x188] sm:$0xff]  ;;  %v338_v1 = vld [vmem:[%s3789_s17 + $0x180] sm:$0xff] }
  0xbf   : > { %1526 = vmatpush1.msra.mxu1 %v862_v50  ;;  %1070 = vmatprep.mubr.f32.mxu0 %v331_v51  ;;  %v719_v2 = vld [vmem:[#allocation5 + $0x8a8] sm:$0xff]  ;;  %v718_v5 = vld [vmem:[#allocation5 + $0x8a0] sm:$0xff] }
  0xc0   : > { %1350 = vmatprep.subr.mxu0 %v727_v52  ;;  %1527 = vmatprep.subr.mxu1 %v859_v53  ;;  %v851_v3 = vld [vmem:[#allocation5 + $0xcc8] sm:$0xff]  ;;  %v850_v6 = vld [vmem:[#allocation5 + $0xcc0] sm:$0xff] }
  0xc1   : > { %1071 = vmatmul.mubr.f32.gmra.mxu0 %v330_v54  ;;  %1249 = vmatprep.mubr.f32.mxu1 %v333_v55  ;;  %v847_v7 = vld [vmem:[#allocation5 + $0xca8] sm:$0xff]  ;;  %v846_v10 = vld [vmem:[#allocation5 + $0xca0] sm:$0xff]  ;;  %v381_v55 = vld [vmem:[%s3789_s17 + $0x2d8] sm:$0xff] }
  0xc2   : > { %1351 = vmatpush1.msra.mxu0 %v726_v56  ;;  %1528 = vmatpush1.msra.mxu1 %v858_v57  ;;  %v347_v8 = vld [vmem:[%s3789_s17 + $0x1c8] sm:$0xff]  ;;  %v346_v11 = vld [vmem:[%s3789_s17 + $0x1c0] sm:$0xff] }
  0xc3   : > { %1352 = vmatprep.subr.mxu0 %v723_v58  ;;  %1250 = vmatmul.mubr.f32.gmra.mxu1 %v332_v59  ;;  %v715_v9 = vld [vmem:[#allocation5 + $0x888] sm:$0xff]  ;;  %v714_v13 = vld [vmem:[#allocation5 + $0x880] sm:$0xff]  ;;  %v380_v59 = vld [vmem:[%s3789_s17 + $0x2d0] sm:$0xff] }
  0xc4   : > { %1529 = vmatprep.subr.mxu1 %v855_v60  ;;  %1076 = vmatprep.mubr.f32.mxu0 %v339_v62  ;;  %v711_v15 = vld [vmem:[#allocation5 + $0x868] sm:$0xff]  ;;  %v710_v17 = vld [vmem:[#allocation5 + $0x860] sm:$0xff] }
  0xc5   : > { %1530 = vmatpush1.msra.mxu1 %v854_v61  ;;  %1353 = vmatpush1.msra.mxu0 %v722_v63  ;;  %v843_v16 = vld [vmem:[#allocation5 + $0xc88] sm:$0xff]  ;;  %v842_v18 = vld [vmem:[#allocation5 + $0xc80] sm:$0xff] }
  0xc6   : > { %1255 = vmatprep.mubr.f32.mxu1 %v341_v0  ;;  %1077 = vmatmul.mubr.f32.gmra.mxu0 %v338_v1  ;;  %v355_v19 = vld [vmem:[%s3789_s17 + $0x208] sm:$0xff]  ;;  %v354_v22 = vld [vmem:[%s3789_s17 + $0x200] sm:$0xff]  ;;  %v389_v0 = vld [vmem:[%s3789_s17 + $0x318] sm:$0xff] }
  0xc7   : > { %1354 = vmatprep.subr.mxu0 %v719_v2  ;;  %1531 = vmatprep.subr.mxu1 %v851_v3  ;;  %v707_v20 = vld [vmem:[#allocation5 + $0x848] sm:$0xff]  ;;  %v706_v24 = vld [vmem:[#allocation5 + $0x840] sm:$0xff] }
  0xc8   : > { %1256 = vmatmul.mubr.f32.gmra.mxu1 %v340_v4  ;;  %1355 = vmatpush1.msra.mxu0 %v718_v5  ;;  %v839_v21 = vld [vmem:[#allocation5 + $0xc68] sm:$0xff]  ;;  %v838_v25 = vld [vmem:[#allocation5 + $0xc60] sm:$0xff]  ;;  %v388_v4 = vld [vmem:[%s3789_s17 + $0x310] sm:$0xff] }
  0xc9   : > { %1532 = vmatpush1.msra.mxu1 %v850_v6  ;;  %1082 = vmatprep.mubr.f32.mxu0 %v347_v8  ;;  %v703_v26 = vld [vmem:[#allocation5 + $0x828] sm:$0xff]  ;;  %v834_v29 = vld [vmem:[#allocation5 + $0xc40] sm:$0xff] }
  0xca   : > { %1533 = vmatprep.subr.mxu1 %v847_v7  ;;  %1356 = vmatprep.subr.mxu0 %v715_v9  ;;  %v835_v28 = vld [vmem:[#allocation5 + $0xc48] sm:$0xff]  ;;  %v702_v31 = vld [vmem:[#allocation5 + $0x820] sm:$0xff] }
  0xcb   : > { %1534 = vmatpush1.msra.mxu1 %v846_v10  ;;  %1083 = vmatmul.mubr.f32.gmra.mxu0 %v346_v11  ;;  %v363_v30 = vld [vmem:[%s3789_s17 + $0x248] sm:$0xff]  ;;  %v362_v33 = vld [vmem:[%s3789_s17 + $0x240] sm:$0xff] }
  0xcc   : > { %1261 = vmatprep.mubr.f32.mxu1 %v349_v12  ;;  %1357 = vmatpush1.msra.mxu0 %v714_v13  ;;  %v699_v34 = vld [vmem:[#allocation5 + $0x808] sm:$0xff]  ;;  %v698_v37 = vld [vmem:[#allocation5 + $0x800] sm:$0xff]  ;;  %v397_v13 = vld [vmem:[%s3789_s17 + $0x358] sm:$0xff] }
  0xcd   : > { %1262 = vmatmul.mubr.f32.gmra.mxu1 %v348_v14  ;;  %1358 = vmatprep.subr.mxu0 %v711_v15  ;;  %v831_v35 = vld [vmem:[#allocation5 + $0xc28] sm:$0xff]  ;;  %v830_v38 = vld [vmem:[#allocation5 + $0xc20] sm:$0xff]  ;;  %v396_v15 = vld [vmem:[%s3789_s17 + $0x350] sm:$0xff] }
  0xce   : > { %1535 = vmatprep.subr.mxu1 %v843_v16  ;;  %1359 = vmatpush1.msra.mxu0 %v710_v17  ;;  %v823_v39 = vld [vmem:[#allocation5 + $0xbe8] sm:$0xff]  ;;  %v822_v42 = vld [vmem:[#allocation5 + $0xbe0] sm:$0xff] }
  0xcf   : > { %1536 = vmatpush1.msra.mxu1 %v842_v18  ;;  %1088 = vmatprep.mubr.f32.mxu0 %v355_v19  ;;  %v827_v40 = vld [vmem:[#allocation5 + $0xc08] sm:$0xff]  ;;  %v826_v43 = vld [vmem:[#allocation5 + $0xc00] sm:$0xff] }
  0xd0   : > { %1360 = vmatprep.subr.mxu0 %v707_v20  ;;  %1537 = vmatprep.subr.mxu1 %v839_v21  ;;  %v371_v41 = vld [vmem:[%s3789_s17 + $0x288] sm:$0xff]  ;;  %v370_v44 = vld [vmem:[%s3789_s17 + $0x280] sm:$0xff] }
  0xd1   : > { %1089 = vmatmul.mubr.f32.gmra.mxu0 %v354_v22  ;;  %1267 = vmatprep.mubr.f32.mxu1 %v357_v23  ;;  %v951_v46 = vld [vmem:[#allocation5 + $0xfe8] sm:$0xff]  ;;  %v950_v49 = vld [vmem:[#allocation5 + $0xfe0] sm:$0xff]  ;;  %v405_v23 = vld [vmem:[%s3789_s17 + $0x398] sm:$0xff] }
  0xd2   : > { %1361 = vmatpush1.msra.mxu0 %v706_v24  ;;  %1538 = vmatpush1.msra.mxu1 %v838_v25  ;;  %v819_v48 = vld [vmem:[#allocation5 + $0xbc8] sm:$0xff]  ;;  %v818_v50 = vld [vmem:[#allocation5 + $0xbc0] sm:$0xff] }
  0xd3   : > { %1362 = vmatprep.subr.mxu0 %v703_v26  ;;  %1268 = vmatmul.mubr.f32.gmra.mxu1 %v356_v27  ;;  %v379_v51 = vld [vmem:[%s3789_s17 + $0x2c8] sm:$0xff]  ;;  %v378_v54 = vld [vmem:[%s3789_s17 + $0x2c0] sm:$0xff]  ;;  %v404_v27 = vld [vmem:[%s3789_s17 + $0x390] sm:$0xff] }
  0xd4   : > { %1539 = vmatprep.subr.mxu1 %v835_v28  ;;  %1094 = vmatprep.mubr.f32.mxu0 %v363_v30  ;;  %v815_v52 = vld [vmem:[#allocation5 + $0xba8] sm:$0xff]  ;;  %v814_v56 = vld [vmem:[#allocation5 + $0xba0] sm:$0xff] }
  0xd5   : > { %1540 = vmatpush1.msra.mxu1 %v834_v29  ;;  %1363 = vmatpush1.msra.mxu0 %v702_v31  ;;  %v947_v53 = vld [vmem:[#allocation5 + $0xfc8] sm:$0xff]  ;;  %v946_v57 = vld [vmem:[#allocation5 + $0xfc0] sm:$0xff] }
  0xd6   : > { %1273 = vmatprep.mubr.f32.mxu1 %v365_v32  ;;  %1095 = vmatmul.mubr.f32.gmra.mxu0 %v362_v33  ;;  %v811_v58 = vld [vmem:[#allocation5 + $0xb88] sm:$0xff]  ;;  %v942_v61 = vld [vmem:[#allocation5 + $0xfa0] sm:$0xff] }
  0xd7   : > { %1364 = vmatprep.subr.mxu0 %v699_v34  ;;  %1541 = vmatprep.subr.mxu1 %v831_v35  ;;  %v943_v60 = vld [vmem:[#allocation5 + $0xfa8] sm:$0xff]  ;;  %v810_v63 = vld [vmem:[#allocation5 + $0xb80] sm:$0xff]  ;;  %v413_v34 = vld [vmem:[%s3789_s17 + $0x3d8] sm:$0xff] }
  0xd8   : > { %1274 = vmatmul.mubr.f32.gmra.mxu1 %v364_v36  ;;  %1365 = vmatpush1.msra.mxu0 %v698_v37  ;;  %v387_v62 = vld [vmem:[%s3789_s17 + $0x308] sm:$0xff]  ;;  %v386_v1 = vld [vmem:[%s3789_s17 + $0x300] sm:$0xff]  ;;  %v412_v37 = vld [vmem:[%s3789_s17 + $0x3d0] sm:$0xff] }
  0xd9   : > { %1542 = vmatpush1.msra.mxu1 %v830_v38  ;;  %1366 = vmatprep.subr.mxu0 %v823_v39  ;;  %v807_v2 = vld [vmem:[#allocation5 + $0xb68] sm:$0xff]  ;;  %v806_v5 = vld [vmem:[#allocation5 + $0xb60] sm:$0xff] }
  0xda   : > { %1543 = vmatprep.subr.mxu1 %v827_v40  ;;  %1100 = vmatprep.mubr.f32.mxu0 %v371_v41  ;;  %v939_v3 = vld [vmem:[#allocation5 + $0xf88] sm:$0xff]  ;;  %v938_v6 = vld [vmem:[#allocation5 + $0xf80] sm:$0xff] }
  0xdb   : > { %1367 = vmatpush2.msra.mxu0 %v822_v42  ;;  %1544 = vmatpush1.msra.mxu1 %v826_v43  ;;  %v803_v7 = vld [vmem:[#allocation5 + $0xb48] sm:$0xff]  ;;  %v802_v10 = vld [vmem:[#allocation5 + $0xb40] sm:$0xff] }
  0xdc   : > { %1101 = vmatmul.mubr.f32.gmra.mxu0 %v370_v44  ;;  %1279 = vmatprep.mubr.f32.mxu1 %v373_v45  ;;  %v935_v8 = vld [vmem:[#allocation5 + $0xf68] sm:$0xff]  ;;  %v934_v11 = vld [vmem:[#allocation5 + $0xf60] sm:$0xff]  ;;  %v421_v45 = vld [vmem:[%s3789_s17 + $0x418] sm:$0xff] }
  0xdd   : > { %1545 = vmatprep.subr.mxu1 %v951_v46  ;;  %1280 = vmatmul.mubr.f32.gmra.mxu1 %v372_v47  ;;  %v395_v9 = vld [vmem:[%s3789_s17 + $0x348] sm:$0xff]  ;;  %v394_v12 = vld [vmem:[%s3789_s17 + $0x340] sm:$0xff]  ;;  %v420_v47 = vld [vmem:[%s3789_s17 + $0x410] sm:$0xff] }
  0xde   : > { %1368 = vmatprep.subr.mxu0 %v819_v48  ;;  %1546 = vmatpush2.msra.mxu1 %v950_v49  ;;  %v931_v14 = vld [vmem:[#allocation5 + $0xf48] sm:$0xff]  ;;  %v930_v17 = vld [vmem:[#allocation5 + $0xf40] sm:$0xff] }
  0xdf   : > { %1369 = vmatpush2.msra.mxu0 %v818_v50  ;;  %1106 = vmatprep.mubr.f32.mxu0 %v379_v51  ;;  %v799_v16 = vld [vmem:[#allocation5 + $0xb28] sm:$0xff]  ;;  %v798_v18 = vld [vmem:[#allocation5 + $0xb20] sm:$0xff] }
  0xe0   : > { %1370 = vmatprep.subr.mxu0 %v815_v52  ;;  %1547 = vmatprep.subr.mxu1 %v947_v53  ;;  %v403_v19 = vld [vmem:[%s3789_s17 + $0x388] sm:$0xff]  ;;  %v402_v22 = vld [vmem:[%s3789_s17 + $0x380] sm:$0xff] }
  0xe1   : > { %1107 = vmatmul.mubr.f32.gmra.mxu0 %v378_v54  ;;  %1285 = vmatprep.mubr.f32.mxu1 %v381_v55  ;;  %v795_v20 = vld [vmem:[#allocation5 + $0xb08] sm:$0xff]  ;;  %v794_v24 = vld [vmem:[#allocation5 + $0xb00] sm:$0xff]  ;;  %v429_v55 = vld [vmem:[%s3789_s17 + $0x458] sm:$0xff] }
  0xe2   : > { %1371 = vmatpush2.msra.mxu0 %v814_v56  ;;  %1548 = vmatpush2.msra.mxu1 %v946_v57  ;;  %v927_v21 = vld [vmem:[#allocation5 + $0xf28] sm:$0xff]  ;;  %v926_v25 = vld [vmem:[#allocation5 + $0xf20] sm:$0xff] }
  0xe3   : > { %1372 = vmatprep.subr.mxu0 %v811_v58  ;;  %1286 = vmatmul.mubr.f32.gmra.mxu1 %v380_v59  ;;  %v791_v26 = vld [vmem:[#allocation5 + $0xae8] sm:$0xff]  ;;  %v790_v29 = vld [vmem:[#allocation5 + $0xae0] sm:$0xff]  ;;  %v428_v59 = vld [vmem:[%s3789_s17 + $0x450] sm:$0xff] }
  0xe4   : > { %1549 = vmatprep.subr.mxu1 %v943_v60  ;;  %1112 = vmatprep.mubr.f32.mxu0 %v387_v62  ;;  %v923_v28 = vld [vmem:[#allocation5 + $0xf08] sm:$0xff]  ;;  %v922_v30 = vld [vmem:[#allocation5 + $0xf00] sm:$0xff] }
  0xe5   : > { %1550 = vmatpush2.msra.mxu1 %v942_v61  ;;  %1373 = vmatpush2.msra.mxu0 %v810_v63  ;;  %v411_v31 = vld [vmem:[%s3789_s17 + $0x3c8] sm:$0xff]  ;;  %v410_v33 = vld [vmem:[%s3789_s17 + $0x3c0] sm:$0xff] }
  0xe6   : > { %1291 = vmatprep.mubr.f32.mxu1 %v389_v0  ;;  %1113 = vmatmul.mubr.f32.gmra.mxu0 %v386_v1  ;;  %v919_v32 = vld [vmem:[#allocation5 + $0xee8] sm:$0xff]  ;;  %v918_v36 = vld [vmem:[#allocation5 + $0xee0] sm:$0xff] }
  0xe7   : > { %1374 = vmatprep.subr.mxu0 %v807_v2  ;;  %1551 = vmatprep.subr.mxu1 %v939_v3  ;;  %v787_v35 = vld [vmem:[#allocation5 + $0xac8] sm:$0xff]  ;;  %v786_v38 = vld [vmem:[#allocation5 + $0xac0] sm:$0xff]  ;;  %v437_v2 = vld [vmem:[%s3789_s17 + $0x498] sm:$0xff] }
  0xe8   : > { %1292 = vmatmul.mubr.f32.gmra.mxu1 %v388_v4  ;;  %1375 = vmatpush2.msra.mxu0 %v806_v5  ;;  %v783_v39 = vld [vmem:[#allocation5 + $0xaa8] sm:$0xff]  ;;  %v782_v42 = vld [vmem:[#allocation5 + $0xaa0] sm:$0xff]  ;;  %v436_v5 = vld [vmem:[%s3789_s17 + $0x490] sm:$0xff] }
  0xe9   : > { %1552 = vmatpush2.msra.mxu1 %v938_v6  ;;  %1376 = vmatprep.subr.mxu0 %v803_v7  ;;  %v915_v40 = vld [vmem:[#allocation5 + $0xec8] sm:$0xff]  ;;  %v914_v43 = vld [vmem:[#allocation5 + $0xec0] sm:$0xff] }
  0xea   : > { %1553 = vmatprep.subr.mxu1 %v935_v8  ;;  %1118 = vmatprep.mubr.f32.mxu0 %v395_v9  ;;  %v419_v41 = vld [vmem:[%s3789_s17 + $0x408] sm:$0xff]  ;;  %v418_v44 = vld [vmem:[%s3789_s17 + $0x400] sm:$0xff] }
  0xeb   : > { %1377 = vmatpush2.msra.mxu0 %v802_v10  ;;  %1554 = vmatpush2.msra.mxu1 %v934_v11  ;;  %v911_v46 = vld [vmem:[#allocation5 + $0xea8] sm:$0xff]  ;;  %v910_v49 = vld [vmem:[#allocation5 + $0xea0] sm:$0xff] }
  0xec   : > { %1119 = vmatmul.mubr.f32.gmra.mxu0 %v394_v12  ;;  %1297 = vmatprep.mubr.f32.mxu1 %v397_v13  ;;  %v779_v48 = vld [vmem:[#allocation5 + $0xa88] sm:$0xff]  ;;  %v778_v50 = vld [vmem:[#allocation5 + $0xa80] sm:$0xff] }
  0xed   : > { %1555 = vmatprep.subr.mxu1 %v931_v14  ;;  %1298 = vmatmul.mubr.f32.gmra.mxu1 %v396_v15  ;;  %v427_v51 = vld [vmem:[%s3789_s17 + $0x448] sm:$0xff]  ;;  %v426_v54 = vld [vmem:[%s3789_s17 + $0x440] sm:$0xff]  ;;  %v297_v15 = vld [vmem:[%s3789_s17 + $0x38] sm:$0xff] }
  0xee   : > { %1378 = vmatprep.subr.mxu0 %v799_v16  ;;  %1556 = vmatpush2.msra.mxu1 %v930_v17  ;;  %v775_v52 = vld [vmem:[#allocation5 + $0xa68] sm:$0xff]  ;;  %v774_v56 = vld [vmem:[#allocation5 + $0xa60] sm:$0xff]  ;;  %v505_v16 = vld [vmem:[#allocation5 + $0x1f8] sm:$0xff] }
  0xef   : > { %1379 = vmatpush2.msra.mxu0 %v798_v18  ;;  %1124 = vmatprep.mubr.f32.mxu0 %v403_v19  ;;  %v907_v53 = vld [vmem:[#allocation5 + $0xe88] sm:$0xff]  ;;  %v906_v57 = vld [vmem:[#allocation5 + $0xe80] sm:$0xff]  ;;  %v296_v17 = vld [vmem:[%s3789_s17 + $0x30] sm:$0xff] }
  0xf0   : > { %1380 = vmatprep.subr.mxu0 %v795_v20  ;;  %1557 = vmatprep.subr.mxu1 %v927_v21  ;;  %v771_v58 = vld [vmem:[#allocation5 + $0xa48] sm:$0xff]  ;;  %v770_v61 = vld [vmem:[#allocation5 + $0xa40] sm:$0xff]  ;;  %v504_v18 = vld [vmem:[#allocation5 + $0x1f0] sm:$0xff] }
  0xf1   : > { %1125 = vmatmul.mubr.f32.gmra.mxu0 %v402_v22  ;;  %1303 = vmatprep.mubr.f32.mxu1 %v405_v23  ;;  %v903_v60 = vld [vmem:[#allocation5 + $0xe68] sm:$0xff]  ;;  %v902_v62 = vld [vmem:[#allocation5 + $0xe60] sm:$0xff]  ;;  %v633_v19 = vld [vmem:[#allocation5 + $0x5f8] sm:$0xff] }
  0xf2   : > { %1381 = vmatpush2.msra.mxu0 %v794_v24  ;;  %1558 = vmatpush2.msra.mxu1 %v926_v25  ;;  %v435_v63 = vld [vmem:[%s3789_s17 + $0x488] sm:$0xff]  ;;  %v434_v1 = vld [vmem:[%s3789_s17 + $0x480] sm:$0xff]  ;;  %v501_v21 = vld [vmem:[#allocation5 + $0x1d8] sm:$0xff] }
  0xf3   : > { %1382 = vmatprep.subr.mxu0 %v791_v26  ;;  %1304 = vmatmul.mubr.f32.gmra.mxu1 %v404_v27  ;;  %v899_v0 = vld [vmem:[#allocation5 + $0xe48] sm:$0xff]  ;;  %v898_v4 = vld [vmem:[#allocation5 + $0xe40] sm:$0xff]  ;;  %v632_v22 = vld [vmem:[#allocation5 + $0x5f0] sm:$0xff] }
  0xf4   : > { %1559 = vmatprep.subr.mxu1 %v923_v28  ;;  %1383 = vmatpush2.msra.mxu0 %v790_v29  ;;  %v767_v3 = vld [vmem:[#allocation5 + $0xa28] sm:$0xff]  ;;  %v766_v6 = vld [vmem:[#allocation5 + $0xa20] sm:$0xff]  ;;  %v305_v24 = vld [vmem:[%s3789_s17 + $0x78] sm:$0xff] }
  0xf5   : > { %1560 = vmatpush2.msra.mxu1 %v922_v30  ;;  %1130 = vmatprep.mubr.f32.mxu0 %v411_v31  ;;  %v895_v7 = vld [vmem:[#allocation5 + $0xe28] sm:$0xff]  ;;  %v894_v9 = vld [vmem:[#allocation5 + $0xe20] sm:$0xff]  ;;  %v500_v25 = vld [vmem:[#allocation5 + $0x1d0] sm:$0xff] }
  0xf6   : > { %1561 = vmatprep.subr.mxu1 %v919_v32  ;;  %1131 = vmatmul.mubr.f32.gmra.mxu0 %v410_v33  ;;  %v763_v8 = vld [vmem:[#allocation5 + $0xa08] sm:$0xff]  ;;  %v762_v10 = vld [vmem:[#allocation5 + $0xa00] sm:$0xff]  ;;  %v304_v26 = vld [vmem:[%s3789_s17 + $0x70] sm:$0xff] }
  0xf7   : > { %1309 = vmatprep.mubr.f32.mxu1 %v413_v34  ;;  %1384 = vmatprep.subr.mxu0 %v787_v35  ;;  %v295_v11 = vld [vmem:[%s3789_s17 + $0x28] sm:$0xff]  ;;  %v294_v13 = vld [vmem:[%s3789_s17 + $0x20] sm:$0xff]  ;;  %v497_v27 = vld [vmem:[#allocation5 + $0x1b8] sm:$0xff] }
  0xf8   : > { %1562 = vmatpush2.msra.mxu1 %v918_v36  ;;  %1385 = vmatpush2.msra.mxu0 %v786_v38  ;;  %v891_v12 = vld [vmem:[#allocation5 + $0xe08] sm:$0xff]  ;;  %v890_v14 = vld [vmem:[#allocation5 + $0xe00] sm:$0xff]  ;;  %v629_v28 = vld [vmem:[#allocation5 + $0x5d8] sm:$0xff] }
  0xf9   : > { %1310 = vmatmul.mubr.f32.gmra.mxu1 %v412_v37  ;;  %1386 = vmatprep.subr.mxu0 %v783_v39  ;;  %v303_v20 = vld [vmem:[%s3789_s17 + $0x68] sm:$0xff]  ;;  %v302_v23 = vld [vmem:[%s3789_s17 + $0x60] sm:$0xff]  ;;  %v496_v29 = vld [vmem:[#allocation5 + $0x1b0] sm:$0xff] }
  0xfa   : > { %1563 = vmatprep.subr.mxu1 %v915_v40  ;;  %1136 = vmatprep.mubr.f32.mxu0 %v419_v41  ;;  %v628_v30 = vld [vmem:[#allocation5 + $0x5d0] sm:$0xff]  ;;  %v311_v31 = vld [vmem:[%s3789_s17 + $0xa8] sm:$0xff]  ;;  %v625_v32 = vld [vmem:[#allocation5 + $0x5b8] sm:$0xff] }
  0xfb   : > { %1387 = vmatpush2.msra.mxu0 %v782_v42  ;;  %1564 = vmatpush2.msra.mxu1 %v914_v43  ;;  %v310_v33 = vld [vmem:[%s3789_s17 + $0xa0] sm:$0xff]  ;;  %v313_v34 = vld [vmem:[%s3789_s17 + $0xb8] sm:$0xff]  ;;  %v624_v36 = vld [vmem:[#allocation5 + $0x5b0] sm:$0xff] }
  0xfc   : > { %1137 = vmatmul.mubr.f32.gmra.mxu0 %v418_v44  ;;  %1315 = vmatprep.mubr.f32.mxu1 %v421_v45  ;;  %v493_v35 = vld [vmem:[#allocation5 + $0x198] sm:$0xff]  ;;  %v312_v37 = vld [vmem:[%s3789_s17 + $0xb0] sm:$0xff]  ;;  %v319_v41 = vld [vmem:[%s3789_s17 + $0xe8] sm:$0xff] }
  0xfd   : > { %1565 = vmatprep.subr.mxu1 %v911_v46  ;;  %1316 = vmatmul.mubr.f32.gmra.mxu1 %v420_v47  ;;  %v492_v38 = vld [vmem:[#allocation5 + $0x190] sm:$0xff]  ;;  %v489_v39 = vld [vmem:[#allocation5 + $0x178] sm:$0xff]  ;;  %v318_v44 = vld [vmem:[%s3789_s17 + $0xe0] sm:$0xff] }
  0xfe   : > { %1388 = vmatprep.subr.mxu0 %v779_v48  ;;  %1566 = vmatpush2.msra.mxu1 %v910_v49  ;;  %v621_v40 = vld [vmem:[#allocation5 + $0x598] sm:$0xff]  ;;  %v488_v42 = vld [vmem:[#allocation5 + $0x170] sm:$0xff] }
  0xff   : > { %1389 = vmatpush2.msra.mxu0 %v778_v50  ;;  %1142 = vmatprep.mubr.f32.mxu0 %v427_v51  ;;  %v620_v43 = vld [vmem:[#allocation5 + $0x590] sm:$0xff]  ;;  %v321_v45 = vld [vmem:[%s3789_s17 + $0xf8] sm:$0xff] }
 0x100   : > { %1390 = vmatprep.subr.mxu0 %v775_v52  ;;  %1567 = vmatprep.subr.mxu1 %v907_v53  ;;  %v485_v46 = vld [vmem:[#allocation5 + $0x158] sm:$0xff]  ;;  %v320_v48 = vld [vmem:[%s3789_s17 + $0xf0] sm:$0xff]  ;;  %v327_v52 = vld [vmem:[%s3789_s17 + $0x128] sm:$0xff] }
 0x101   : > { %1143 = vmatmul.mubr.f32.gmra.mxu0 %v426_v54  ;;  %1321 = vmatprep.mubr.f32.mxu1 %v429_v55  ;;  %v617_v47 = vld [vmem:[#allocation5 + $0x578] sm:$0xff]  ;;  %v484_v49 = vld [vmem:[#allocation5 + $0x150] sm:$0xff]  ;;  %v326_v55 = vld [vmem:[%s3789_s17 + $0x120] sm:$0xff] }
 0x102   : > { %1391 = vmatpush2.msra.mxu0 %v774_v56  ;;  %1568 = vmatpush2.msra.mxu1 %v906_v57  ;;  %v616_v50 = vld [vmem:[#allocation5 + $0x570] sm:$0xff]  ;;  %v613_v51 = vld [vmem:[#allocation5 + $0x558] sm:$0xff] }
 0x103   : > { %1392 = vmatprep.subr.mxu0 %v771_v58  ;;  %1322 = vmatmul.mubr.f32.gmra.mxu1 %v428_v59  ;;  %v481_v53 = vld [vmem:[#allocation5 + $0x138] sm:$0xff]  ;;  %v612_v54 = vld [vmem:[#allocation5 + $0x550] sm:$0xff] }
 0x104   : > { %1569 = vmatprep.subr.mxu1 %v903_v60  ;;  %1393 = vmatpush2.msra.mxu0 %v770_v61  ;;  %v329_v56 = vld [vmem:[%s3789_s17 + $0x138] sm:$0xff]  ;;  %v480_v57 = vld [vmem:[#allocation5 + $0x130] sm:$0xff] }
 0x105   : > { %1570 = vmatpush2.msra.mxu1 %v902_v62  ;;  %1148 = vmatprep.mubr.f32.mxu0 %v435_v63  ;;  %v328_v58 = vld [vmem:[%s3789_s17 + $0x130] sm:$0xff]  ;;  %v477_v59 = vld [vmem:[#allocation5 + $0x118] sm:$0xff]  ;;  %v335_v63 = vld [vmem:[%s3789_s17 + $0x168] sm:$0xff] }
 0x106   : > { %1571 = vmatprep.subr.mxu1 %v899_v0  ;;  %1149 = vmatmul.mubr.f32.gmra.mxu0 %v434_v1  ;;  %v609_v60 = vld [vmem:[#allocation5 + $0x538] sm:$0xff]  ;;  %v476_v61 = vld [vmem:[#allocation5 + $0x110] sm:$0xff] }
 0x107   : > { %1327 = vmatprep.mubr.f32.mxu1 %v437_v2  ;;  %1394 = vmatprep.subr.mxu0 %v767_v3  ;;  %v608_v62 = vld [vmem:[#allocation5 + $0x530] sm:$0xff]  ;;  %v473_v0 = vld [vmem:[#allocation5 + $0xf8] sm:$0xff]  ;;  %v334_v2 = vld [vmem:[%s3789_s17 + $0x160] sm:$0xff] }
 0x108   : > { %1572 = vmatpush2.msra.mxu1 %v898_v4  ;;  %1395 = vmatpush2.msra.mxu0 %v766_v6  ;;  %v605_v1 = vld [vmem:[#allocation5 + $0x518] sm:$0xff]  ;;  %v472_v4 = vld [vmem:[#allocation5 + $0xf0] sm:$0xff] }
 0x109   : > { %1328 = vmatmul.mubr.f32.gmra.mxu1 %v436_v5  ;;  %1573 = vmatprep.subr.mxu1 %v895_v7  ;;  %v337_v3 = vld [vmem:[%s3789_s17 + $0x178] sm:$0xff]  ;;  %v604_v5 = vld [vmem:[#allocation5 + $0x510] sm:$0xff] }
 0x10a   : > { %1396 = vmatprep.subr.mxu0 %v763_v8  ;;  %1574 = vmatpush2.msra.mxu1 %v894_v9  ;;  %v469_v6 = vld [vmem:[#allocation5 + $0xd8] sm:$0xff]  ;;  %v336_v7 = vld [vmem:[%s3789_s17 + $0x170] sm:$0xff] }
 0x10b   : > { %1397 = vmatpush2.msra.mxu0 %v762_v10  ;;  %1398 = vmatprep.mubr.f32.mxu0 %v295_v11  ;;  %v601_v8 = vld [vmem:[#allocation5 + $0x4f8] sm:$0xff]  ;;  %v600_v9 = vld [vmem:[#allocation5 + $0x4f0] sm:$0xff]  ;;  %v343_v10 = vld [vmem:[%s3789_s17 + $0x1a8] sm:$0xff] }
 0x10c   : > { %1575 = vmatprep.subr.mxu1 %v891_v12  ;;  %1399 = vmatmul.mubr.f32.vlgmr.msra.gmra.mxu0 %v294_v13  ;;  %v468_v11 = vld [vmem:[#allocation5 + $0xd0] sm:$0xff]  ;;  %v345_v12 = vld [vmem:[%s3789_s17 + $0x1b8] sm:$0xff]  ;;  %v342_v13 = vld [vmem:[%s3789_s17 + $0x1a0] sm:$0xff] }
 0x10d   : > { %1576 = vmatpush2.msra.mxu1 %v890_v14  ;;  %1577 = vmatprep.mubr.f32.mxu1 %v297_v15  ;;  %v465_v14 = vld [vmem:[#allocation5 + $0xb8] sm:$0xff] }
 0x10e   : > { %1692 = vmatprep.subr.mxu0 %v505_v16  ;;  %1578 = vmatmul.mubr.f32.vlgmr.msra.gmra.mxu1 %v296_v17  ;;  %v597_v15 = vld [vmem:[#allocation5 + $0x4d8] sm:$0xff]  ;;  %v344_v16 = vld [vmem:[%s3789_s17 + $0x1b0] sm:$0xff] }
 0x10f   : > { %1693 = vmatpush1.msra.mxu0 %v504_v18  ;;  %1871 = vmatprep.subr.mxu1 %v633_v19  ;;  %v464_v17 = vld [vmem:[#allocation5 + $0xb0] sm:$0xff]  ;;  %v593_v19 = vld [vmem:[#allocation5 + $0x4b8] sm:$0xff] }
 0x110   : > { %1404 = vmatprep.mubr.f32.mxu0 %v303_v20  ;;  %1694 = vmatprep.subr.mxu0 %v501_v21  ;;  %v596_v18 = vld [vmem:[#allocation5 + $0x4d0] sm:$0xff]  ;;  %v351_v20 = vld [vmem:[%s3789_s17 + $0x1e8] sm:$0xff]  ;;  %v461_v21 = vld [vmem:[#allocation5 + $0x98] sm:$0xff] }
 0x111   : > { %1872 = vmatpush1.msra.mxu1 %v632_v22  ;;  %1405 = vmatmul.mubr.f32.gmra.mxu0 %v302_v23  ;;  %v592_v22 = vld [vmem:[#allocation5 + $0x4b0] sm:$0xff]  ;;  %v350_v23 = vld [vmem:[%s3789_s17 + $0x1e0] sm:$0xff] }
 0x112   : > { %1583 = vmatprep.mubr.f32.mxu1 %v305_v24  ;;  %1695 = vmatpush1.msra.mxu0 %v500_v25  ;;  %v353_v24 = vld [vmem:[%s3789_s17 + $0x1f8] sm:$0xff]  ;;  %v460_v25 = vld [vmem:[#allocation5 + $0x90] sm:$0xff] }
 0x113   : > { %1584 = vmatmul.mubr.f32.gmra.mxu1 %v304_v26  ;;  %1696 = vmatprep.subr.mxu0 %v497_v27  ;;  %v352_v26 = vld [vmem:[%s3789_s17 + $0x1f0] sm:$0xff]  ;;  %v457_v27 = vld [vmem:[#allocation5 + $0x78] sm:$0xff] }
 0x114   : > { %1873 = vmatprep.subr.mxu1 %v629_v28  ;;  %1697 = vmatpush1.msra.mxu0 %v496_v29  ;;  %v589_v28 = vld [vmem:[#allocation5 + $0x498] sm:$0xff]  ;;  %v456_v29 = vld [vmem:[#allocation5 + $0x70] sm:$0xff] }
 0x115   : > { %1874 = vmatpush1.msra.mxu1 %v628_v30  ;;  %1410 = vmatprep.mubr.f32.mxu0 %v311_v31  ;;  %v588_v30 = vld [vmem:[#allocation5 + $0x490] sm:$0xff]  ;;  %v359_v31 = vld [vmem:[%s3789_s17 + $0x228] sm:$0xff] }
 0x116   : > { %1875 = vmatprep.subr.mxu1 %v625_v32  ;;  %1411 = vmatmul.mubr.f32.gmra.mxu0 %v310_v33  ;;  %v453_v32 = vld [vmem:[#allocation5 + $0x58] sm:$0xff] }
 0x117   : > { %1589 = vmatprep.mubr.f32.mxu1 %v313_v34  ;;  %1698 = vmatprep.subr.mxu0 %v493_v35  ;;  %v585_v33 = vld [vmem:[#allocation5 + $0x478] sm:$0xff]  ;;  %v358_v34 = vld [vmem:[%s3789_s17 + $0x220] sm:$0xff] }
 0x118   : > { %1876 = vmatpush1.msra.mxu1 %v624_v36  ;;  %1699 = vmatpush1.msra.mxu0 %v492_v38  ;;  %v361_v35 = vld [vmem:[%s3789_s17 + $0x238] sm:$0xff]  ;;  %v452_v36 = vld [vmem:[#allocation5 + $0x50] sm:$0xff] }
 0x119   : > { %1590 = vmatmul.mubr.f32.gmra.mxu1 %v312_v37  ;;  %1700 = vmatprep.subr.mxu0 %v489_v39  ;;  %v584_v37 = vld [vmem:[#allocation5 + $0x470] sm:$0xff]  ;;  %v449_v38 = vld [vmem:[#allocation5 + $0x38] sm:$0xff] }
 0x11a   : > { %1877 = vmatprep.subr.mxu1 %v621_v40  ;;  %1416 = vmatprep.mubr.f32.mxu0 %v319_v41  ;;  %v360_v39 = vld [vmem:[%s3789_s17 + $0x230] sm:$0xff]  ;;  %v581_v40 = vld [vmem:[#allocation5 + $0x458] sm:$0xff] }
 0x11b   : > { %1701 = vmatpush1.msra.mxu0 %v488_v42  ;;  %1878 = vmatpush1.msra.mxu1 %v620_v43  ;;  %v580_v41 = vld [vmem:[#allocation5 + $0x450] sm:$0xff]  ;;  %v367_v42 = vld [vmem:[%s3789_s17 + $0x268] sm:$0xff] }
 0x11c   : > { %1417 = vmatmul.mubr.f32.gmra.mxu0 %v318_v44  ;;  %1595 = vmatprep.mubr.f32.mxu1 %v321_v45  ;;  %v448_v43 = vld [vmem:[#allocation5 + $0x30] sm:$0xff]  ;;  %v369_v44 = vld [vmem:[%s3789_s17 + $0x278] sm:$0xff]  ;;  %v366_v45 = vld [vmem:[%s3789_s17 + $0x260] sm:$0xff] }
 0x11d   : > { %1702 = vmatprep.subr.mxu0 %v485_v46  ;;  %1879 = vmatprep.subr.mxu1 %v617_v47  ;;  %v445_v46 = vld [vmem:[#allocation5 + $0x18] sm:$0xff] }
 0x11e   : > { %1596 = vmatmul.mubr.f32.gmra.mxu1 %v320_v48  ;;  %1703 = vmatpush1.msra.mxu0 %v484_v49  ;;  %v577_v47 = vld [vmem:[#allocation5 + $0x438] sm:$0xff]  ;;  %v368_v48 = vld [vmem:[%s3789_s17 + $0x270] sm:$0xff] }
 0x11f   : > { %1880 = vmatpush1.msra.mxu1 %v616_v50  ;;  %1422 = vmatprep.mubr.f32.mxu0 %v327_v52  ;;  %v444_v49 = vld [vmem:[#allocation5 + $0x10] sm:$0xff]  ;;  %v573_v52 = vld [vmem:[#allocation5 + $0x418] sm:$0xff] }
 0x120   : > { %1881 = vmatprep.subr.mxu1 %v613_v51  ;;  %1704 = vmatprep.subr.mxu0 %v481_v53  ;;  %v576_v50 = vld [vmem:[#allocation5 + $0x430] sm:$0xff]  ;;  %v569_v51 = vld [vmem:[#allocation5 + $0x3f8] sm:$0xff]  ;;  %v375_v53 = vld [vmem:[%s3789_s17 + $0x2a8] sm:$0xff] }
 0x121   : > { %1882 = vmatpush1.msra.mxu1 %v612_v54  ;;  %1423 = vmatmul.mubr.f32.gmra.mxu0 %v326_v55  ;;  %v568_v54 = vld [vmem:[#allocation5 + $0x3f0] sm:$0xff] }
 0x122   : > { %1601 = vmatprep.mubr.f32.mxu1 %v329_v56  ;;  %1705 = vmatpush1.msra.mxu0 %v480_v57  ;;  %v572_v55 = vld [vmem:[#allocation5 + $0x410] sm:$0xff]  ;;  %v374_v56 = vld [vmem:[%s3789_s17 + $0x2a0] sm:$0xff]  ;;  %v377_v57 = vld [vmem:[%s3789_s17 + $0x2b8] sm:$0xff] }
 0x123   : > { %1602 = vmatmul.mubr.f32.gmra.mxu1 %v328_v58  ;;  %1706 = vmatprep.subr.mxu0 %v477_v59  ;;  %v697_v58 = vld [vmem:[#allocation5 + $0x7f8] sm:$0xff]  ;;  %v376_v59 = vld [vmem:[%s3789_s17 + $0x2b0] sm:$0xff] }
 0x124   : > { %1883 = vmatprep.subr.mxu1 %v609_v60  ;;  %1707 = vmatpush1.msra.mxu0 %v476_v61  ;;  %v565_v60 = vld [vmem:[#allocation5 + $0x3d8] sm:$0xff]  ;;  %v696_v61 = vld [vmem:[#allocation5 + $0x7f0] sm:$0xff] }
 0x125   : > { %1884 = vmatpush1.msra.mxu1 %v608_v62  ;;  %1428 = vmatprep.mubr.f32.mxu0 %v335_v63  ;;  %v564_v62 = vld [vmem:[#allocation5 + $0x3d0] sm:$0xff]  ;;  %v383_v63 = vld [vmem:[%s3789_s17 + $0x2e8] sm:$0xff] }
 0x126   : > { %1708 = vmatprep.subr.mxu0 %v473_v0  ;;  %1885 = vmatprep.subr.mxu1 %v605_v1  ;;  %v561_v0 = vld [vmem:[#allocation5 + $0x3b8] sm:$0xff] }
 0x127   : > { %1429 = vmatmul.mubr.f32.gmra.mxu0 %v334_v2  ;;  %1607 = vmatprep.mubr.f32.mxu1 %v337_v3  ;;  %v693_v1 = vld [vmem:[#allocation5 + $0x7d8] sm:$0xff]  ;;  %v382_v2 = vld [vmem:[%s3789_s17 + $0x2e0] sm:$0xff] }
 0x128   : > { %1709 = vmatpush1.msra.mxu0 %v472_v4  ;;  %1886 = vmatpush1.msra.mxu1 %v604_v5  ;;  %v385_v3 = vld [vmem:[%s3789_s17 + $0x2f8] sm:$0xff]  ;;  %v560_v4 = vld [vmem:[#allocation5 + $0x3b0] sm:$0xff] }
 0x129   : > { %1710 = vmatprep.subr.mxu0 %v469_v6  ;;  %1608 = vmatmul.mubr.f32.gmra.mxu1 %v336_v7  ;;  %v692_v5 = vld [vmem:[#allocation5 + $0x7d0] sm:$0xff]  ;;  %v557_v6 = vld [vmem:[#allocation5 + $0x398] sm:$0xff] }
 0x12a   : > { %1887 = vmatprep.subr.mxu1 %v601_v8  ;;  %1434 = vmatprep.mubr.f32.mxu0 %v343_v10  ;;  %v384_v7 = vld [vmem:[%s3789_s17 + $0x2f0] sm:$0xff]  ;;  %v689_v8 = vld [vmem:[#allocation5 + $0x7b8] sm:$0xff]  ;;  %v391_v10 = vld [vmem:[%s3789_s17 + $0x328] sm:$0xff] }
 0x12b   : > { %1888 = vmatpush1.msra.mxu1 %v600_v9  ;;  %1711 = vmatpush1.msra.mxu0 %v468_v11  ;;  %v688_v9 = vld [vmem:[#allocation5 + $0x7b0] sm:$0xff] }
 0x12c   : > { %1613 = vmatprep.mubr.f32.mxu1 %v345_v12  ;;  %1435 = vmatmul.mubr.f32.gmra.mxu0 %v342_v13  ;;  %v556_v11 = vld [vmem:[#allocation5 + $0x390] sm:$0xff]  ;;  %v393_v12 = vld [vmem:[%s3789_s17 + $0x338] sm:$0xff]  ;;  %v390_v13 = vld [vmem:[%s3789_s17 + $0x320] sm:$0xff] }
 0x12d   : > { %1712 = vmatprep.subr.mxu0 %v465_v14  ;;  %1889 = vmatprep.subr.mxu1 %v597_v15  ;;  %v553_v14 = vld [vmem:[#allocation5 + $0x378] sm:$0xff] }
 0x12e   : > { %1614 = vmatmul.mubr.f32.gmra.mxu1 %v344_v16  ;;  %1713 = vmatpush1.msra.mxu0 %v464_v17  ;;  %v685_v15 = vld [vmem:[#allocation5 + $0x798] sm:$0xff]  ;;  %v392_v16 = vld [vmem:[%s3789_s17 + $0x330] sm:$0xff] }
 0x12f   : > { %1890 = vmatpush1.msra.mxu1 %v596_v18  ;;  %1440 = vmatprep.mubr.f32.mxu0 %v351_v20  ;;  %v552_v17 = vld [vmem:[#allocation5 + $0x370] sm:$0xff]  ;;  %v681_v20 = vld [vmem:[#allocation5 + $0x778] sm:$0xff] }
 0x130   : > { %1891 = vmatprep.subr.mxu1 %v593_v19  ;;  %1714 = vmatprep.subr.mxu0 %v461_v21  ;;  %v684_v18 = vld [vmem:[#allocation5 + $0x790] sm:$0xff]  ;;  %v549_v19 = vld [vmem:[#allocation5 + $0x358] sm:$0xff]  ;;  %v399_v21 = vld [vmem:[%s3789_s17 + $0x368] sm:$0xff] }
 0x131   : > { %1892 = vmatpush1.msra.mxu1 %v592_v22  ;;  %1441 = vmatmul.mubr.f32.gmra.mxu0 %v350_v23  ;;  %v548_v22 = vld [vmem:[#allocation5 + $0x350] sm:$0xff] }
 0x132   : > { %1619 = vmatprep.mubr.f32.mxu1 %v353_v24  ;;  %1715 = vmatpush1.msra.mxu0 %v460_v25  ;;  %v680_v23 = vld [vmem:[#allocation5 + $0x770] sm:$0xff]  ;;  %v398_v24 = vld [vmem:[%s3789_s17 + $0x360] sm:$0xff]  ;;  %v401_v25 = vld [vmem:[%s3789_s17 + $0x378] sm:$0xff] }
 0x133   : > { %1620 = vmatmul.mubr.f32.gmra.mxu1 %v352_v26  ;;  %1716 = vmatprep.subr.mxu0 %v457_v27  ;;  %v677_v26 = vld [vmem:[#allocation5 + $0x758] sm:$0xff]  ;;  %v400_v27 = vld [vmem:[%s3789_s17 + $0x370] sm:$0xff] }
 0x134   : > { %1893 = vmatprep.subr.mxu1 %v589_v28  ;;  %1717 = vmatpush1.msra.mxu0 %v456_v29  ;;  %v545_v28 = vld [vmem:[#allocation5 + $0x338] sm:$0xff]  ;;  %v676_v29 = vld [vmem:[#allocation5 + $0x750] sm:$0xff] }
 0x135   : > { %1894 = vmatpush1.msra.mxu1 %v588_v30  ;;  %1446 = vmatprep.mubr.f32.mxu0 %v359_v31  ;;  %v544_v30 = vld [vmem:[#allocation5 + $0x330] sm:$0xff]  ;;  %v407_v31 = vld [vmem:[%s3789_s17 + $0x3a8] sm:$0xff] }
 0x136   : > { %1718 = vmatprep.subr.mxu0 %v453_v32  ;;  %1895 = vmatprep.subr.mxu1 %v585_v33  ;;  %v541_v32 = vld [vmem:[#allocation5 + $0x318] sm:$0xff] }
 0x137   : > { %1447 = vmatmul.mubr.f32.gmra.mxu0 %v358_v34  ;;  %1625 = vmatprep.mubr.f32.mxu1 %v361_v35  ;;  %v673_v33 = vld [vmem:[#allocation5 + $0x738] sm:$0xff]  ;;  %v406_v34 = vld [vmem:[%s3789_s17 + $0x3a0] sm:$0xff] }
 0x138   : > { %1719 = vmatpush1.msra.mxu0 %v452_v36  ;;  %1896 = vmatpush1.msra.mxu1 %v584_v37  ;;  %v409_v35 = vld [vmem:[%s3789_s17 + $0x3b8] sm:$0xff]  ;;  %v540_v36 = vld [vmem:[#allocation5 + $0x310] sm:$0xff] }
 0x139   : > { %1720 = vmatprep.subr.mxu0 %v449_v38  ;;  %1626 = vmatmul.mubr.f32.gmra.mxu1 %v360_v39  ;;  %v672_v37 = vld [vmem:[#allocation5 + $0x730] sm:$0xff]  ;;  %v537_v38 = vld [vmem:[#allocation5 + $0x2f8] sm:$0xff] }
 0x13a   : > { %1897 = vmatprep.subr.mxu1 %v581_v40  ;;  %1452 = vmatprep.mubr.f32.mxu0 %v367_v42  ;;  %v408_v39 = vld [vmem:[%s3789_s17 + $0x3b0] sm:$0xff]  ;;  %v669_v40 = vld [vmem:[#allocation5 + $0x718] sm:$0xff] }
 0x13b   : > { %1898 = vmatpush1.msra.mxu1 %v580_v41  ;;  %1721 = vmatpush1.msra.mxu0 %v448_v43  ;;  %v536_v41 = vld [vmem:[#allocation5 + $0x2f0] sm:$0xff]  ;;  %v956_v43 = vlaneseq }
 0x13c   : > { %1631 = vmatprep.mubr.f32.mxu1 %v369_v44  ;;  %1453 = vmatmul.mubr.f32.gmra.mxu0 %v366_v45  ;;  %v668_v42 = vld [vmem:[#allocation5 + $0x710] sm:$0xff]  ;;  %v415_v44 = vld [vmem:[%s3789_s17 + $0x3e8] sm:$0xff]  ;;  %v665_v45 = vld [vmem:[#allocation5 + $0x6f8] sm:$0xff] }
 0x13d   : > { %1722 = vmatprep.subr.mxu0 %v445_v46  ;;  %1899 = vmatprep.subr.mxu1 %v577_v47  ;;  %v414_v46 = vld [vmem:[%s3789_s17 + $0x3e0] sm:$0xff]  ;;  %v417_v47 = vld [vmem:[%s3789_s17 + $0x3f8] sm:$0xff] }
 0x13e   : > { %1632 = vmatmul.mubr.f32.gmra.mxu1 %v368_v48  ;;  %1723 = vmatpush1.msra.mxu0 %v444_v49  ;;  %v533_v48 = vld [vmem:[#allocation5 + $0x2d8] sm:$0xff]  ;;  %v664_v49 = vld [vmem:[#allocation5 + $0x6f0] sm:$0xff] }
 0x13f   : > { %1900 = vmatpush1.msra.mxu1 %v576_v50  ;;  %1724 = vmatprep.subr.mxu0 %v569_v51  ;;  %v416_v50 = vld [vmem:[%s3789_s17 + $0x3f0] sm:$0xff] }
 0x140   : > { %1901 = vmatprep.subr.mxu1 %v573_v52  ;;  %1458 = vmatprep.mubr.f32.mxu0 %v375_v53  ;;  %v532_v51 = vld [vmem:[#allocation5 + $0x2d0] sm:$0xff]  ;;  %v3943_v52 = vshrl.u32 %v956_v43, 7  ;;  %v529_v53 = vld [vmem:[#allocation5 + $0x2b8] sm:$0xff] }
 0x141   : > { %1725 = vmatpush2.msra.mxu0 %v568_v54  ;;  %1902 = vmatpush1.msra.mxu1 %v572_v55  ;;  %v661_v54 = vld [vmem:[#allocation5 + $0x6d8] sm:$0xff]  ;;  %v423_v55 = vld [vmem:[%s3789_s17 + $0x428] sm:$0xff] }
 0x142   : > { %1459 = vmatmul.mubr.f32.gmra.mxu0 %v374_v56  ;;  %1637 = vmatprep.mubr.f32.mxu1 %v377_v57  ;;  %4825 = vst [vmem:[#allocation13_spill] sm:$0xff] %v3943_v52  ;;  %v528_v56 = vld [vmem:[#allocation5 + $0x2b0] sm:$0xff] }
 0x143   : > { %1903 = vmatprep.subr.mxu1 %v697_v58  ;;  %1638 = vmatmul.mubr.f32.gmra.mxu1 %v376_v59  ;;  %v660_v57 = vld [vmem:[#allocation5 + $0x6d0] sm:$0xff]  ;;  %v422_v58 = vld [vmem:[%s3789_s17 + $0x420] sm:$0xff]  ;;  %v425_v59 = vld [vmem:[%s3789_s17 + $0x438] sm:$0xff] }
 0x144   : > { %1726 = vmatprep.subr.mxu0 %v565_v60  ;;  %1904 = vmatpush2.msra.mxu1 %v696_v61  ;;  %v657_v60 = vld [vmem:[#allocation5 + $0x6b8] sm:$0xff]  ;;  %v4814_v61 = vsub.s32 0, %v3943_v52 }
 0x145   : > { %1727 = vmatpush2.msra.mxu0 %v564_v62  ;;  %1464 = vmatprep.mubr.f32.mxu0 %v383_v63  ;;  %v424_v62 = vld [vmem:[%s3789_s17 + $0x430] sm:$0xff]  ;;  %v525_v63 = vld [vmem:[#allocation5 + $0x298] sm:$0xff] }
 0x146   : > { %1728 = vmatprep.subr.mxu0 %v561_v0  ;;  %1905 = vmatprep.subr.mxu1 %v693_v1  ;;  %v3950_v0 = vld [vmem:[#allocation7] sm:$0xf]  ;;  %v656_v1 = vld [vmem:[#allocation5 + $0x6b0] sm:$0xff] }
 0x147   : > { %1465 = vmatmul.mubr.f32.gmra.mxu0 %v382_v2  ;;  %1643 = vmatprep.mubr.f32.mxu1 %v385_v3  ;;  %v524_v2 = vld [vmem:[#allocation5 + $0x290] sm:$0xff]  ;;  %v431_v3 = vld [vmem:[%s3789_s17 + $0x468] sm:$0xff] }
 0x148   : > { %1729 = vmatpush2.msra.mxu0 %v560_v4  ;;  %1906 = vmatpush2.msra.mxu1 %v692_v5  ;;  %v521_v4 = vld [vmem:[#allocation5 + $0x278] sm:$0xff] }
 0x149   : > { %1730 = vmatprep.subr.mxu0 %v557_v6  ;;  %1644 = vmatmul.mubr.f32.gmra.mxu1 %v384_v7  ;;  %v653_v5 = vld [vmem:[#allocation5 + $0x698] sm:$0xff]  ;;  %v430_v6 = vld [vmem:[%s3789_s17 + $0x460] sm:$0xff]  ;;  %v3957_v7 = vrot.slane %v3950_v0, %v4814_v61 }
 0x14a   : > { %1907 = vmatprep.subr.mxu1 %v689_v8  ;;  %1470 = vmatprep.mubr.f32.mxu0 %v391_v10  ;;  %v433_v8 = vld [vmem:[%s3789_s17 + $0x478] sm:$0xff]  ;;  %v652_v10 = vld [vmem:[#allocation5 + $0x690] sm:$0xff] }
 0x14b   : > { %1908 = vmatpush2.msra.mxu1 %v688_v9  ;;  %1731 = vmatpush2.msra.mxu0 %v556_v11  ;;  %v520_v9 = vld [vmem:[#allocation5 + $0x270] sm:$0xff]  ;;  %v517_v11 = vld [vmem:[#allocation5 + $0x258] sm:$0xff] }
 0x14c   : > { %1649 = vmatprep.mubr.f32.mxu1 %v393_v12  ;;  %1471 = vmatmul.mubr.f32.gmra.mxu0 %v390_v13  ;;  %v432_v12 = vld [vmem:[%s3789_s17 + $0x470] sm:$0xff]  ;;  %v649_v13 = vld [vmem:[#allocation5 + $0x678] sm:$0xff] }
 0x14d   : > { %1732 = vmatprep.subr.mxu0 %v553_v14  ;;  %1909 = vmatprep.subr.mxu1 %v685_v15  ;;  %v516_v15 = vld [vmem:[#allocation5 + $0x250] sm:$0xff] }
 0x14e   : > { %1650 = vmatmul.mubr.f32.gmra.mxu1 %v392_v16  ;;  %1733 = vmatpush2.msra.mxu0 %v552_v17  ;;  %v648_v16 = vld [vmem:[#allocation5 + $0x670] sm:$0xff] }
 0x14f   : > { %1910 = vmatpush2.msra.mxu1 %v684_v18  ;;  %1734 = vmatprep.subr.mxu0 %v549_v19  ;;  %v439_v18 = vld [vmem:[%s3789_s17 + $0x4a8] sm:$0xff]  ;;  %v645_v19 = vld [vmem:[#allocation5 + $0x658] sm:$0xff] }
 0x150   : > { %1911 = vmatprep.subr.mxu1 %v681_v20  ;;  %1476 = vmatprep.mubr.f32.mxu0 %v399_v21 }
 0x151   : > { %1735 = vmatpush2.msra.mxu0 %v548_v22  ;;  %1912 = vmatpush2.msra.mxu1 %v680_v23  ;;  %v438_v22 = vld [vmem:[%s3789_s17 + $0x4a0] sm:$0xff]  ;;  %v441_v23 = vld [vmem:[%s3789_s17 + $0x4b8] sm:$0xff] }
 0x152   : > { %1477 = vmatmul.mubr.f32.gmra.mxu0 %v398_v24  ;;  %1655 = vmatprep.mubr.f32.mxu1 %v401_v25  ;;  %v513_v25 = vld [vmem:[#allocation5 + $0x238] sm:$0xff] }
 0x153   : > { %1913 = vmatprep.subr.mxu1 %v677_v26  ;;  %1656 = vmatmul.mubr.f32.gmra.mxu1 %v400_v27  ;;  %v644_v26 = vld [vmem:[#allocation5 + $0x650] sm:$0xff] }
 0x154   : > { %1736 = vmatprep.subr.mxu0 %v545_v28  ;;  %1914 = vmatpush2.msra.mxu1 %v676_v29  ;;  %v440_v28 = vld [vmem:[%s3789_s17 + $0x4b0] sm:$0xff] }
 0x155   : > { %1737 = vmatpush2.msra.mxu0 %v544_v30  ;;  %1482 = vmatprep.mubr.f32.mxu0 %v407_v31  ;;  %v512_v29 = vld [vmem:[#allocation5 + $0x230] sm:$0xff]  ;;  %v641_v31 = vld [vmem:[#allocation5 + $0x638] sm:$0xff] }
 0x156   : > { %1738 = vmatprep.subr.mxu0 %v541_v32  ;;  %1915 = vmatprep.subr.mxu1 %v673_v33  ;;  %v509_v32 = vld [vmem:[#allocation5 + $0x218] sm:$0xff] }
 0x157   : > { %1483 = vmatmul.mubr.f32.gmra.mxu0 %v406_v34  ;;  %1661 = vmatprep.mubr.f32.mxu1 %v409_v35  ;;  %v640_v35 = vld [vmem:[#allocation5 + $0x630] sm:$0xff] }
 0x158   : > { %1739 = vmatpush2.msra.mxu0 %v540_v36  ;;  %1916 = vmatpush2.msra.mxu1 %v672_v37  ;;  %v508_v36 = vld [vmem:[#allocation5 + $0x210] sm:$0xff] }
 0x159   : > { %1740 = vmatprep.subr.mxu0 %v537_v38  ;;  %1662 = vmatmul.mubr.f32.gmra.mxu1 %v408_v39  ;;  %v637_v38 = vld [vmem:[#allocation5 + $0x618] sm:$0xff] }
 0x15a   : > { %1917 = vmatprep.subr.mxu1 %v669_v40  ;;  %1741 = vmatpush2.msra.mxu0 %v536_v41  ;;  %v636_v41 = vld [vmem:[#allocation5 + $0x610] sm:$0xff] }
 0x15b   : > { %1918 = vmatpush2.msra.mxu1 %v668_v42  ;;  %1488 = vmatprep.mubr.f32.mxu0 %v415_v44  ;;  %v761_v42 = vld [vmem:[#allocation5 + $0x9f8] sm:$0xff]  ;;  %v3323_v44 = vld [vmem:[%s3789_s17 + $0x8] sm:$0xff] }
 0x15c   : > { %1919 = vmatprep.subr.mxu1 %v665_v45  ;;  %1489 = vmatmul.mubr.f32.gmra.mxu0 %v414_v46  ;;  %v760_v45 = vld [vmem:[#allocation5 + $0x9f0] sm:$0xff] }
 0x15d   : > { %1667 = vmatprep.mubr.f32.mxu1 %v417_v47  ;;  %1742 = vmatprep.subr.mxu0 %v533_v48  ;;  %v3324_v47 = vld [vmem:[%s3789_s17] sm:$0xff]  ;;  %v889_v48 = vld [vmem:[#allocation5 + $0xdf8] sm:$0xff] }
 0x15e   : > { %1920 = vmatpush2.msra.mxu1 %v664_v49  ;;  %1743 = vmatpush2.msra.mxu0 %v532_v51  ;;  %v3325_v51 = vld [vmem:[%s3789_s17 + $0x18] sm:$0xff] }
 0x15f   : > { %1668 = vmatmul.mubr.f32.gmra.mxu1 %v416_v50  ;;  %1744 = vmatprep.subr.mxu0 %v529_v53  ;;  %v757_v53 = vld [vmem:[#allocation5 + $0x9d8] sm:$0xff] }
 0x160   : > { %1921 = vmatprep.subr.mxu1 %v661_v54  ;;  %1494 = vmatprep.mubr.f32.mxu0 %v423_v55  ;;  %v888_v54 = vld [vmem:[#allocation5 + $0xdf0] sm:$0xff] }
 0x161   : > { %1745 = vmatpush2.msra.mxu0 %v528_v56  ;;  %1922 = vmatpush2.msra.mxu1 %v660_v57  ;;  %v3326_v56 = vld [vmem:[%s3789_s17 + $0x10] sm:$0xff] }
 0x162   : > { %1495 = vmatmul.mubr.f32.gmra.mxu0 %v422_v58  ;;  %1673 = vmatprep.mubr.f32.mxu1 %v425_v59  ;;  %v3327_v58 = vld [vmem:[%s3789_s17 + $0x48] sm:$0xff]  ;;  %v756_v59 = vld [vmem:[#allocation5 + $0x9d0] sm:$0xff] }
 0x163   : > { %1923 = vmatprep.subr.mxu1 %v657_v60  ;;  %1674 = vmatmul.mubr.f32.gmra.mxu1 %v424_v62  ;;  %v753_v62 = vld [vmem:[#allocation5 + $0x9b8] sm:$0xff] }
 0x164   : > { %1746 = vmatprep.subr.mxu0 %v525_v63  ;;  %1924 = vmatpush2.msra.mxu1 %v656_v1  ;;  %v885_v63 = vld [vmem:[#allocation5 + $0xdd8] sm:$0xff] }
 0x165   : > { %1747 = vmatpush2.msra.mxu0 %v524_v2  ;;  %1500 = vmatprep.mubr.f32.mxu0 %v431_v3  ;;  %v3328_v2 = vld [vmem:[%s3789_s17 + $0x40] sm:$0xff]  ;;  %v3329_v3 = vld [vmem:[%s3789_s17 + $0x58] sm:$0xff] }
 0x166   : > { %1748 = vmatprep.subr.mxu0 %v521_v4  ;;  %1925 = vmatprep.subr.mxu1 %v653_v5  ;;  %v1042_v14 = vpop.f32.mrf.mxu0  ;;  %v752_v4 = vld [vmem:[#allocation5 + $0x9b0] sm:$0xff] }
 0x167   : > { %1501 = vmatmul.mubr.f32.gmra.mxu0 %v430_v6  ;;  %1679 = vmatprep.mubr.f32.mxu1 %v433_v8  ;;  %v1043_v17 = vadd.f32 %v1042_v14, %v3957_v7  ;;  %v884_v5 = vld [vmem:[#allocation5 + $0xdd0] sm:$0xff] }
 0x168   : > { %1749 = vmatpush2.msra.mxu0 %v520_v9  ;;  %1926 = vmatpush2.msra.mxu1 %v652_v10  ;;  %v1221_v20 = vpop.f32.mrf.mxu1  ;;  %v3963_v21 = vpop.f32.mrf.mxu0  ;;  %v3330_v9 = vld [vmem:[%s3789_s17 + $0x50] sm:$0xff]  ;;  %v881_v10 = vld [vmem:[#allocation5 + $0xdb8] sm:$0xff] }
 0x169   : > { %1750 = vmatprep.subr.mxu0 %v517_v11  ;;  %4826 = vst [vmem:[#allocation14_spill] sm:$0xff] %v3963_v21  ;;  %1680 = vmatmul.mubr.f32.gmra.mxu1 %v432_v12  ;;  %v3967_v24 = vadd.f32 %v1221_v20, %v1043_v17  ;;  %v880_v14 = vld [vmem:[#allocation5 + $0xdb0] sm:$0xff]  ;;  %v745_v20 = vld [vmem:[#allocation5 + $0x978] sm:$0xff] }
 0x16a   : > { %1927 = vmatprep.subr.mxu1 %v649_v13  ;;  %1751 = vmatpush2.msra.mxu0 %v516_v15  ;;  %v3969_v27 = vpop.f32.mrf.mxu1  ;;  %v749_v13 = vld [vmem:[#allocation5 + $0x998] sm:$0xff]  ;;  %v3331_v15 = vld [vmem:[%s3789_s17 + $0x88] sm:$0xff] }
 0x16b   : > { %1928 = vmatpush2.msra.mxu1 %v648_v16  ;;  %4827 = vst [vmem:[#allocation15_spill] sm:$0xff] %v3969_v27  ;;  %1506 = vmatprep.mubr.f32.mxu0 %v439_v18  ;;  %v1048_v30 = vpop.f32.mrf.mxu0  ;;  %v748_v16 = vld [vmem:[#allocation5 + $0x990] sm:$0xff]  ;;  %v3332_v18 = vld [vmem:[%s3789_s17 + $0x80] sm:$0xff] }
 0x16c   : > { %1929 = vmatprep.subr.mxu1 %v645_v19  ;;  %1507 = vmatmul.mubr.f32.gmra.mxu0 %v438_v22  ;;  %v1049_v33 = vadd.f32 %v1048_v30, %v3957_v7  ;;  %v3333_v19 = vld [vmem:[%s3789_s17 + $0x98] sm:$0xff]  ;;  %v876_v30 = vld [vmem:[#allocation5 + $0xd90] sm:$0xff]  ;;  %v3380_v27 = vld [vmem:[%s3789_s17 + $0x380] sm:$0xff] }
 0x16d   : > { %1685 = vmatprep.mubr.f32.mxu1 %v441_v23  ;;  %v1227_v34 = vpop.f32.mrf.mxu1  ;;  %1752 = vmatprep.subr.mxu0 %v513_v25  ;;  %v3973_v37 = vpop.f32.mrf.mxu0  ;;  %v877_v22 = vld [vmem:[#allocation5 + $0xd98] sm:$0xff] }
 0x16e   : > { %1930 = vmatpush2.msra.mxu1 %v644_v26  ;;  %1753 = vmatpush2.msra.mxu0 %v512_v29  ;;  %v3975_v39 = vadd.f32 %v1227_v34, %v1049_v33  ;;  %v744_v26 = vld [vmem:[#allocation5 + $0x970] sm:$0xff]  ;;  %v3335_v34 = vld [vmem:[%s3789_s17 + $0xc8] sm:$0xff] }
 0x16f   : > { %1686 = vmatmul.mubr.f32.gmra.mxu1 %v440_v28  ;;  %v3977_v40 = vpop.f32.mrf.mxu1  ;;  %1931 = vmatprep.subr.mxu1 %v641_v31  ;;  %v3334_v29 = vld [vmem:[%s3789_s17 + $0x90] sm:$0xff] }
 0x170   : > { %1754 = vmatprep.subr.mxu0 %v509_v32  ;;  %1932 = vmatpush2.msra.mxu1 %v640_v35  ;;  %v1054_v43 = vpop.f32.mrf.mxu0  ;;  %v741_v32 = vld [vmem:[#allocation5 + $0x958] sm:$0xff] }
 0x171   : > { %1755 = vmatpush2.msra.mxu0 %v508_v36  ;;  %1756 = vmatprep.mubr.f32.mxu0 %v3323_v44  ;;  %v1055_v46 = vadd.f32 %v1054_v43, %v3957_v7  ;;  %v873_v35 = vld [vmem:[#allocation5 + $0xd78] sm:$0xff] }
 0x172   : > { %1933 = vmatprep.subr.mxu1 %v637_v38  ;;  %1757 = vmatmul.mubr.f32.vlgmr.msra.gmra.mxu0 %v3324_v47  ;;  %v3982_v50 = vpop.f32.mrf.mxu0  ;;  %v3336_v38 = vld [vmem:[%s3789_s17 + $0xc0] sm:$0xff]  ;;  %v3337_v44 = vld [vmem:[%s3789_s17 + $0xd8] sm:$0xff]  ;;  %v3338_v47 = vld [vmem:[%s3789_s17 + $0xd0] sm:$0xff] }
 0x173   : > { %1934 = vmatpush2.msra.mxu1 %v636_v41  ;;  %v1233_v49 = vpop.f32.mrf.mxu1  ;;  %1935 = vmatprep.mubr.f32.mxu1 %v3325_v51  ;;  %v740_v41 = vld [vmem:[#allocation5 + $0x950] sm:$0xff] }
 0x174   : > { %2050 = vmatprep.subr.mxu0 %v761_v42  ;;  %v3985_v55 = vadd.f32 %v1233_v49, %v1055_v46  ;;  %1936 = vmatmul.mubr.f32.vlgmr.msra.gmra.mxu1 %v3326_v56  ;;  %v872_v42 = vld [vmem:[#allocation5 + $0xd70] sm:$0xff] }
 0x175   : > { %2051 = vmatpush1.msra.mxu0 %v760_v45  ;;  %v3988_v57 = vpop.f32.mrf.mxu1  ;;  %2229 = vmatprep.subr.mxu1 %v889_v48  ;;  %v869_v45 = vld [vmem:[#allocation5 + $0xd58] sm:$0xff]  ;;  %v868_v49 = vld [vmem:[#allocation5 + $0xd50] sm:$0xff] }
 0x176   : > { %1762 = vmatprep.mubr.f32.mxu0 %v3327_v58  ;;  %v1060_v60 = vpop.f32.mrf.mxu0  ;;  %2052 = vmatprep.subr.mxu0 %v757_v53  ;;  %v737_v48 = vld [vmem:[#allocation5 + $0x938] sm:$0xff]  ;;  %v736_v56 = vld [vmem:[#allocation5 + $0x930] sm:$0xff] }
 0x177   : > { %2230 = vmatpush1.msra.mxu1 %v888_v54  ;;  %v1061_v1 = vadd.f32 %v1060_v60, %v3957_v7  ;;  %1763 = vmatmul.mubr.f32.gmra.mxu0 %v3328_v2  ;;  %v3339_v54 = vld [vmem:[%s3789_s17 + $0x108] sm:$0xff]  ;;  %v865_v60 = vld [vmem:[#allocation5 + $0xd38] sm:$0xff]  ;;  %v732_v2 = vld [vmem:[#allocation5 + $0x910] sm:$0xff] }
 0x178   : > { %1941 = vmatprep.mubr.f32.mxu1 %v3329_v3  ;;  %v1239_v6 = vpop.f32.mrf.mxu1  ;;  %v3994_v8 = vpop.f32.mrf.mxu0  ;;  %2053 = vmatpush1.msra.mxu0 %v756_v59  ;;  %v733_v59 = vld [vmem:[#allocation5 + $0x918] sm:$0xff]  ;;  %v864_v3 = vld [vmem:[#allocation5 + $0xd30] sm:$0xff] }
 0x179   : > { %1942 = vmatmul.mubr.f32.gmra.mxu1 %v3330_v9  ;;  %v3997_v11 = vadd.f32 %v1239_v6, %v1061_v1  ;;  %2054 = vmatprep.subr.mxu0 %v753_v62  ;;  %v3341_v1 = vld [vmem:[%s3789_s17 + $0x118] sm:$0xff]  ;;  %v3342_v6 = vld [vmem:[%s3789_s17 + $0x110] sm:$0xff] }
 0x17a   : > { %2231 = vmatprep.subr.mxu1 %v885_v63  ;;  %v3999_v12 = vpop.f32.mrf.mxu1  ;;  %2055 = vmatpush1.msra.mxu0 %v752_v4  ;;  %v3340_v63 = vld [vmem:[%s3789_s17 + $0x100] sm:$0xff]  ;;  %v729_v9 = vld [vmem:[#allocation5 + $0x8f8] sm:$0xff] }
 0x17b   : > { %2232 = vmatpush1.msra.mxu1 %v884_v5  ;;  %1768 = vmatprep.mubr.f32.mxu0 %v3331_v15  ;;  %v1066_v17 = vpop.f32.mrf.mxu0 }
 0x17c   : > { %2233 = vmatprep.subr.mxu1 %v881_v10  ;;  %1769 = vmatmul.mubr.f32.gmra.mxu0 %v3332_v18  ;;  %v1067_v23 = vadd.f32 %v1066_v17, %v3957_v7  ;;  %v3343_v17 = vld [vmem:[%s3789_s17 + $0x148] sm:$0xff]  ;;  %v860_v18 = vld [vmem:[#allocation5 + $0xd10] sm:$0xff] }
 0x17d   : > { %1947 = vmatprep.mubr.f32.mxu1 %v3333_v19  ;;  %v1245_v25 = vpop.f32.mrf.mxu1  ;;  %2056 = vmatprep.subr.mxu0 %v749_v13  ;;  %v4005_v28 = vpop.f32.mrf.mxu0  ;;  %v861_v13 = vld [vmem:[#allocation5 + $0xd18] sm:$0xff] }
 0x17e   : > { %2234 = vmatpush1.msra.mxu1 %v880_v14  ;;  %2057 = vmatpush1.msra.mxu0 %v748_v16  ;;  %v4008_v31 = vadd.f32 %v1245_v25, %v1067_v23  ;;  %v728_v16 = vld [vmem:[#allocation5 + $0x8f0] sm:$0xff]  ;;  %v725_v19 = vld [vmem:[#allocation5 + $0x8d8] sm:$0xff] }
 0x17f   : > { %1948 = vmatmul.mubr.f32.gmra.mxu1 %v3334_v29  ;;  %2058 = vmatprep.subr.mxu0 %v745_v20  ;;  %v4010_v33 = vpop.f32.mrf.mxu1  ;;  %v857_v23 = vld [vmem:[#allocation5 + $0xcf8] sm:$0xff] }
 0x180   : > { %2235 = vmatprep.subr.mxu1 %v877_v22  ;;  %1774 = vmatprep.mubr.f32.mxu0 %v3335_v34  ;;  %v3344_v22 = vld [vmem:[%s3789_s17 + $0x140] sm:$0xff]  ;;  %v3345_v29 = vld [vmem:[%s3789_s17 + $0x158] sm:$0xff]  ;;  %v724_v34 = vld [vmem:[#allocation5 + $0x8d0] sm:$0xff] }
 0x181   : > { %2059 = vmatpush1.msra.mxu0 %v744_v26  ;;  %v1072_v36 = vpop.f32.mrf.mxu0  ;;  %2236 = vmatpush1.msra.mxu1 %v876_v30  ;;  %v856_v30 = vld [vmem:[#allocation5 + $0xcf0] sm:$0xff] }
 0x182   : > { %1775 = vmatmul.mubr.f32.gmra.mxu0 %v3336_v38  ;;  %v1073_v43 = vadd.f32 %v1072_v36, %v3957_v7  ;;  %1953 = vmatprep.mubr.f32.mxu1 %v3337_v44  ;;  %v3346_v36 = vld [vmem:[%s3789_s17 + $0x150] sm:$0xff]  ;;  %v721_v38 = vld [vmem:[#allocation5 + $0x8b8] sm:$0xff] }
 0x183   : > { %2060 = vmatprep.subr.mxu0 %v741_v32  ;;  %v4016_v46 = vpop.f32.mrf.mxu0  ;;  %2237 = vmatprep.subr.mxu1 %v873_v35  ;;  %v1251_v51 = vpop.f32.mrf.mxu1 }
 0x184   : > { %1954 = vmatmul.mubr.f32.gmra.mxu1 %v3338_v47  ;;  %2061 = vmatpush1.msra.mxu0 %v740_v41  ;;  %v4019_v53 = vadd.f32 %v1251_v51, %v1073_v43  ;;  %v853_v43 = vld [vmem:[#allocation5 + $0xcd8] sm:$0xff]  ;;  %v720_v47 = vld [vmem:[#allocation5 + $0x8b0] sm:$0xff]  ;;  %v3349_v51 = vld [vmem:[%s3789_s17 + $0x180] sm:$0xff] }
 0x185   : > { %2238 = vmatpush1.msra.mxu1 %v872_v42  ;;  %1780 = vmatprep.mubr.f32.mxu0 %v3339_v54  ;;  %v4022_v58 = vpop.f32.mrf.mxu1  ;;  %v3347_v42 = vld [vmem:[%s3789_s17 + $0x188] sm:$0xff]  ;;  %v849_v54 = vld [vmem:[#allocation5 + $0xcb8] sm:$0xff] }
 0x186   : > { %2239 = vmatprep.subr.mxu1 %v869_v45  ;;  %2062 = vmatprep.subr.mxu0 %v737_v48  ;;  %v1078_v62 = vpop.f32.mrf.mxu0  ;;  %v3348_v45 = vld [vmem:[%s3789_s17 + $0x198] sm:$0xff]  ;;  %v852_v48 = vld [vmem:[#allocation5 + $0xcd0] sm:$0xff] }
 0x187   : > { %2240 = vmatpush1.msra.mxu1 %v868_v49  ;;  %1781 = vmatmul.mubr.f32.gmra.mxu0 %v3340_v63  ;;  %v1079_v4 = vadd.f32 %v1078_v62, %v3957_v7  ;;  %v848_v62 = vld [vmem:[#allocation5 + $0xcb0] sm:$0xff] }
 0x188   : > { %1959 = vmatprep.mubr.f32.mxu1 %v3341_v1  ;;  %v1257_v5 = vpop.f32.mrf.mxu1  ;;  %2063 = vmatpush1.msra.mxu0 %v736_v56  ;;  %v4028_v10 = vpop.f32.mrf.mxu0 }
 0x189   : > { %1960 = vmatmul.mubr.f32.gmra.mxu1 %v3342_v6  ;;  %2064 = vmatprep.subr.mxu0 %v733_v59  ;;  %v4030_v14 = vadd.f32 %v1257_v5, %v1079_v4  ;;  %v3350_v59 = vld [vmem:[%s3789_s17 + $0x190] sm:$0xff]  ;;  %v713_v5 = vld [vmem:[#allocation5 + $0x878] sm:$0xff] }
 0x18a   : > { %2241 = vmatprep.subr.mxu1 %v865_v60  ;;  %v4032_v15 = vpop.f32.mrf.mxu1  ;;  %2065 = vmatpush1.msra.mxu0 %v732_v2  ;;  %v717_v60 = vld [vmem:[#allocation5 + $0x898] sm:$0xff]  ;;  %v3351_v2 = vld [vmem:[%s3789_s17 + $0x1c8] sm:$0xff] }
 0x18b   : > { %2242 = vmatpush1.msra.mxu1 %v864_v3  ;;  %1786 = vmatprep.mubr.f32.mxu0 %v3343_v17  ;;  %v1084_v20 = vpop.f32.mrf.mxu0  ;;  %v716_v3 = vld [vmem:[#allocation5 + $0x890] sm:$0xff]  ;;  %v845_v6 = vld [vmem:[#allocation5 + $0xc98] sm:$0xff] }
 0x18c   : > { %2066 = vmatprep.subr.mxu0 %v729_v9  ;;  %2243 = vmatprep.subr.mxu1 %v861_v13  ;;  %v1085_v25 = vadd.f32 %v1084_v20, %v3957_v7  ;;  %v3352_v13 = vld [vmem:[%s3789_s17 + $0x1c0] sm:$0xff]  ;;  %v712_v17 = vld [vmem:[#allocation5 + $0x870] sm:$0xff] }
 0x18d   : > { %1787 = vmatmul.mubr.f32.gmra.mxu0 %v3344_v22  ;;  %v1263_v26 = vpop.f32.mrf.mxu1  ;;  %1965 = vmatprep.mubr.f32.mxu1 %v3345_v29  ;;  %v4038_v32 = vpop.f32.mrf.mxu0  ;;  %v3354_v22 = vld [vmem:[%s3789_s17 + $0x1d0] sm:$0xff] }
 0x18e   : > { %2067 = vmatpush1.msra.mxu0 %v728_v16  ;;  %2244 = vmatpush1.msra.mxu1 %v860_v18  ;;  %v4040_v35 = vadd.f32 %v1263_v26, %v1085_v25  ;;  %v3353_v16 = vld [vmem:[%s3789_s17 + $0x1d8] sm:$0xff]  ;;  %v844_v18 = vld [vmem:[#allocation5 + $0xc90] sm:$0xff] }
 0x18f   : > { %2068 = vmatprep.subr.mxu0 %v725_v19  ;;  %1966 = vmatmul.mubr.f32.gmra.mxu1 %v3346_v36  ;;  %v4043_v41 = vpop.f32.mrf.mxu1  ;;  %v841_v26 = vld [vmem:[#allocation5 + $0xc78] sm:$0xff]  ;;  %v3355_v36 = vld [vmem:[%s3789_s17 + $0x208] sm:$0xff] }
 0x190   : > { %2245 = vmatprep.subr.mxu1 %v857_v23  ;;  %1792 = vmatprep.mubr.f32.mxu0 %v3347_v42  ;;  %v709_v23 = vld [vmem:[#allocation5 + $0x858] sm:$0xff] }
 0x191   : > { %2246 = vmatpush1.msra.mxu1 %v856_v30  ;;  %v1090_v44 = vpop.f32.mrf.mxu0  ;;  %2069 = vmatpush1.msra.mxu0 %v724_v34  ;;  %v708_v34 = vld [vmem:[#allocation5 + $0x850] sm:$0xff]  ;;  %v705_v42 = vld [vmem:[#allocation5 + $0x838] sm:$0xff] }
 0x192   : > { %1971 = vmatprep.mubr.f32.mxu1 %v3348_v45  ;;  %v1091_v49 = vadd.f32 %v1090_v44, %v3957_v7  ;;  %1793 = vmatmul.mubr.f32.gmra.mxu0 %v3349_v51  ;;  %v3356_v44 = vld [vmem:[%s3789_s17 + $0x200] sm:$0xff]  ;;  %v837_v45 = vld [vmem:[#allocation5 + $0xc58] sm:$0xff] }
 0x193   : > { %2070 = vmatprep.subr.mxu0 %v721_v38  ;;  %v4049_v56 = vpop.f32.mrf.mxu0  ;;  %2247 = vmatprep.subr.mxu1 %v853_v43  ;;  %v1269_v63 = vpop.f32.mrf.mxu1  ;;  %v840_v38 = vld [vmem:[#allocation5 + $0xc70] sm:$0xff] }
 0x194   : > { %1972 = vmatmul.mubr.f32.gmra.mxu1 %v3350_v59  ;;  %2071 = vmatpush1.msra.mxu0 %v720_v47  ;;  %v4052_v1 = vadd.f32 %v1269_v63, %v1091_v49  ;;  %v836_v49 = vld [vmem:[#allocation5 + $0xc50] sm:$0xff]  ;;  %v701_v63 = vld [vmem:[#allocation5 + $0x818] sm:$0xff] }
 0x195   : > { %2248 = vmatpush1.msra.mxu1 %v852_v48  ;;  %1798 = vmatprep.mubr.f32.mxu0 %v3351_v2  ;;  %v4055_v4 = vpop.f32.mrf.mxu1  ;;  %v3357_v48 = vld [vmem:[%s3789_s17 + $0x218] sm:$0xff]  ;;  %v704_v59 = vld [vmem:[#allocation5 + $0x830] sm:$0xff] }
 0x196   : > { %2249 = vmatprep.subr.mxu1 %v849_v54  ;;  %2072 = vmatprep.subr.mxu0 %v717_v60  ;;  %v1096_v9 = vpop.f32.mrf.mxu0 }
 0x197   : > { %2250 = vmatpush1.msra.mxu1 %v848_v62  ;;  %1799 = vmatmul.mubr.f32.gmra.mxu0 %v3352_v13  ;;  %v1097_v19 = vadd.f32 %v1096_v9, %v3957_v7  ;;  %v3358_v62 = vld [vmem:[%s3789_s17 + $0x210] sm:$0xff]  ;;  %v3360_v9 = vld [vmem:[%s3789_s17 + $0x258] sm:$0xff] }
 0x198   : > { %1977 = vmatprep.mubr.f32.mxu1 %v3353_v16  ;;  %v1275_v20 = vpop.f32.mrf.mxu1  ;;  %2073 = vmatpush1.msra.mxu0 %v716_v3  ;;  %v4061_v25 = vpop.f32.mrf.mxu0  ;;  %v3359_v3 = vld [vmem:[%s3789_s17 + $0x248] sm:$0xff]  ;;  %v700_v13 = vld [vmem:[#allocation5 + $0x810] sm:$0xff] }
 0x199   : > { %1978 = vmatmul.mubr.f32.gmra.mxu1 %v3354_v22  ;;  %2074 = vmatprep.subr.mxu0 %v713_v5  ;;  %v4063_v29 = vadd.f32 %v1275_v20, %v1097_v19  ;;  %v833_v5 = vld [vmem:[#allocation5 + $0xc38] sm:$0xff]  ;;  %v832_v16 = vld [vmem:[#allocation5 + $0xc30] sm:$0xff] }
 0x19a   : > { %2251 = vmatprep.subr.mxu1 %v845_v6  ;;  %v4065_v30 = vpop.f32.mrf.mxu1  ;;  %2075 = vmatpush1.msra.mxu0 %v712_v17  ;;  %v825_v19 = vld [vmem:[#allocation5 + $0xbf8] sm:$0xff] }
 0x19b   : > { %2252 = vmatpush1.msra.mxu1 %v844_v18  ;;  %1804 = vmatprep.mubr.f32.mxu0 %v3355_v36  ;;  %v3361_v18 = vld [vmem:[%s3789_s17 + $0x240] sm:$0xff]  ;;  %v829_v20 = vld [vmem:[#allocation5 + $0xc18] sm:$0xff]  ;;  %v828_v36 = vld [vmem:[#allocation5 + $0xc10] sm:$0xff] }
 0x19c   : > { %2076 = vmatprep.subr.mxu0 %v709_v23  ;;  %v1102_v43 = vpop.f32.mrf.mxu0  ;;  %2253 = vmatprep.subr.mxu1 %v841_v26  ;;  %v3362_v23 = vld [vmem:[%s3789_s17 + $0x250] sm:$0xff] }
 0x19d   : > { %1805 = vmatmul.mubr.f32.gmra.mxu0 %v3356_v44  ;;  %v1103_v47 = vadd.f32 %v1102_v43, %v3957_v7  ;;  %1983 = vmatprep.mubr.f32.mxu1 %v3357_v48  ;;  %v1281_v51 = vpop.f32.mrf.mxu1  ;;  %v824_v26 = vld [vmem:[#allocation5 + $0xbf0] sm:$0xff]  ;;  %v3363_v44 = vld [vmem:[%s3789_s17 + $0x288] sm:$0xff]  ;;  %v3364_v48 = vld [vmem:[%s3789_s17 + $0x280] sm:$0xff] }
 0x19e   : > { %2077 = vmatpush1.msra.mxu0 %v708_v34  ;;  %v4071_v54 = vpop.f32.mrf.mxu0  ;;  %2254 = vmatpush1.msra.mxu1 %v840_v38 }
 0x19f   : > { %2078 = vmatprep.subr.mxu0 %v705_v42  ;;  %v4073_v60 = vadd.f32 %v1281_v51, %v1103_v47  ;;  %1984 = vmatmul.mubr.f32.gmra.mxu1 %v3358_v62  ;;  %v4076_v2 = vpop.f32.mrf.mxu1  ;;  %v953_v42 = vld [vmem:[#allocation5 + $0xff8] sm:$0xff]  ;;  %v820_v51 = vld [vmem:[#allocation5 + $0xbd0] sm:$0xff] }
 0x1a0   : > { %2255 = vmatprep.subr.mxu1 %v837_v45  ;;  %1810 = vmatprep.mubr.f32.mxu0 %v3359_v3  ;;  %v821_v45 = vld [vmem:[#allocation5 + $0xbd8] sm:$0xff] }
 0x1a1   : > { %2256 = vmatpush1.msra.mxu1 %v836_v49  ;;  %v1108_v6 = vpop.f32.mrf.mxu0  ;;  %2079 = vmatpush1.msra.mxu0 %v704_v59  ;;  %v952_v49 = vld [vmem:[#allocation5 + $0xff0] sm:$0xff]  ;;  %v817_v3 = vld [vmem:[#allocation5 + $0xbb8] sm:$0xff] }
 0x1a2   : > { %1989 = vmatprep.mubr.f32.mxu1 %v3360_v9  ;;  %v1109_v17 = vadd.f32 %v1108_v6, %v3957_v7  ;;  %1811 = vmatmul.mubr.f32.gmra.mxu0 %v3361_v18  ;;  %v3366_v6 = vld [vmem:[%s3789_s17 + $0x290] sm:$0xff]  ;;  %v949_v9 = vld [vmem:[#allocation5 + $0xfd8] sm:$0xff]  ;;  %v3367_v18 = vld [vmem:[%s3789_s17 + $0x2c8] sm:$0xff] }
 0x1a3   : > { %2080 = vmatprep.subr.mxu0 %v701_v63  ;;  %v4082_v22 = vpop.f32.mrf.mxu0  ;;  %2257 = vmatprep.subr.mxu1 %v833_v5  ;;  %v1287_v34 = vpop.f32.mrf.mxu1  ;;  %v3365_v63 = vld [vmem:[%s3789_s17 + $0x298] sm:$0xff] }
 0x1a4   : > { %1990 = vmatmul.mubr.f32.gmra.mxu1 %v3362_v23  ;;  %2081 = vmatpush1.msra.mxu0 %v700_v13  ;;  %v4085_v38 = vadd.f32 %v1287_v34, %v1109_v17  ;;  %v816_v17 = vld [vmem:[#allocation5 + $0xbb0] sm:$0xff]  ;;  %v945_v34 = vld [vmem:[#allocation5 + $0xfb8] sm:$0xff] }
 0x1a5   : > { %2258 = vmatpush1.msra.mxu1 %v832_v16  ;;  %2082 = vmatprep.subr.mxu0 %v825_v19  ;;  %v4087_v43 = vpop.f32.mrf.mxu1  ;;  %v948_v19 = vld [vmem:[#allocation5 + $0xfd0] sm:$0xff] }
 0x1a6   : > { %2259 = vmatprep.subr.mxu1 %v829_v20  ;;  %1816 = vmatprep.mubr.f32.mxu0 %v3363_v44  ;;  %v1114_v47 = vpop.f32.mrf.mxu0  ;;  %v813_v20 = vld [vmem:[#allocation5 + $0xb98] sm:$0xff]  ;;  %v944_v44 = vld [vmem:[#allocation5 + $0xfb0] sm:$0xff] }
 0x1a7   : > { %2083 = vmatpush2.msra.mxu0 %v824_v26  ;;  %2260 = vmatpush1.msra.mxu1 %v828_v36  ;;  %v1115_v59 = vadd.f32 %v1114_v47, %v3957_v7  ;;  %v3368_v26 = vld [vmem:[%s3789_s17 + $0x2c0] sm:$0xff] }
 0x1a8   : > { %1817 = vmatmul.mubr.f32.gmra.mxu0 %v3364_v48  ;;  %v1293_v62 = vpop.f32.mrf.mxu1  ;;  %1995 = vmatprep.mubr.f32.mxu1 %v3365_v63  ;;  %v4093_v5 = vpop.f32.mrf.mxu0  ;;  %v812_v48 = vld [vmem:[#allocation5 + $0xb90] sm:$0xff]  ;;  %v3371_v63 = vld [vmem:[%s3789_s17 + $0x308] sm:$0xff] }
 0x1a9   : > { %2261 = vmatprep.subr.mxu1 %v953_v42  ;;  %1996 = vmatmul.mubr.f32.gmra.mxu1 %v3366_v6  ;;  %v4096_v13 = vadd.f32 %v1293_v62, %v1115_v59  ;;  %v3369_v42 = vld [vmem:[%s3789_s17 + $0x2d8] sm:$0xff] }
 0x1aa   : > { %2084 = vmatprep.subr.mxu0 %v821_v45  ;;  %v4098_v16 = vpop.f32.mrf.mxu1  ;;  %2262 = vmatpush2.msra.mxu1 %v952_v49  ;;  %v809_v59 = vld [vmem:[#allocation5 + $0xb78] sm:$0xff] }
 0x1ab   : > { %2085 = vmatpush2.msra.mxu0 %v820_v51  ;;  %1822 = vmatprep.mubr.f32.mxu0 %v3367_v18  ;;  %v3370_v51 = vld [vmem:[%s3789_s17 + $0x2d0] sm:$0xff] }
 0x1ac   : > { %2086 = vmatprep.subr.mxu0 %v817_v3  ;;  %v1120_v23 = vpop.f32.mrf.mxu0  ;;  %2263 = vmatprep.subr.mxu1 %v949_v9  ;;  %v941_v3 = vld [vmem:[#allocation5 + $0xf98] sm:$0xff]  ;;  %v940_v18 = vld [vmem:[#allocation5 + $0xf90] sm:$0xff] }
 0x1ad   : > { %1823 = vmatmul.mubr.f32.gmra.mxu0 %v3368_v26  ;;  %v1121_v36 = vadd.f32 %v1120_v23, %v3957_v7  ;;  %2001 = vmatprep.mubr.f32.mxu1 %v3369_v42  ;;  %v1299_v45 = vpop.f32.mrf.mxu1  ;;  %v3372_v9 = vld [vmem:[%s3789_s17 + $0x318] sm:$0xff]  ;;  %v804_v42 = vld [vmem:[#allocation5 + $0xb50] sm:$0xff] }
 0x1ae   : > { %2087 = vmatpush2.msra.mxu0 %v816_v17  ;;  %v4104_v47 = vpop.f32.mrf.mxu0  ;;  %2264 = vmatpush2.msra.mxu1 %v948_v19  ;;  %v808_v17 = vld [vmem:[#allocation5 + $0xb70] sm:$0xff]  ;;  %v805_v23 = vld [vmem:[#allocation5 + $0xb58] sm:$0xff] }
 0x1af   : > { %2088 = vmatprep.subr.mxu0 %v813_v20  ;;  %v4106_v49 = vadd.f32 %v1299_v45, %v1121_v36  ;;  %2002 = vmatmul.mubr.f32.gmra.mxu1 %v3370_v51  ;;  %v4109_v62 = vpop.f32.mrf.mxu1  ;;  %v3373_v20 = vld [vmem:[%s3789_s17 + $0x300] sm:$0xff]  ;;  %v937_v26 = vld [vmem:[#allocation5 + $0xf78] sm:$0xff]  ;;  %v3374_v36 = vld [vmem:[%s3789_s17 + $0x310] sm:$0xff] }
 0x1b0   : > { %2265 = vmatprep.subr.mxu1 %v945_v34  ;;  %1828 = vmatprep.mubr.f32.mxu0 %v3371_v63  ;;  %v936_v45 = vld [vmem:[#allocation5 + $0xf70] sm:$0xff]  ;;  %v933_v51 = vld [vmem:[#allocation5 + $0xf58] sm:$0xff]  ;;  %v3375_v63 = vld [vmem:[%s3789_s17 + $0x348] sm:$0xff] }
 0x1b1   : > { %2266 = vmatpush2.msra.mxu1 %v944_v44  ;;  %v1126_v6 = vpop.f32.mrf.mxu0  ;;  %2089 = vmatpush2.msra.mxu0 %v812_v48 }
 0x1b2   : > { %2007 = vmatprep.mubr.f32.mxu1 %v3372_v9  ;;  %v1127_v19 = vadd.f32 %v1126_v6, %v3957_v7  ;;  %1829 = vmatmul.mubr.f32.gmra.mxu0 %v3373_v20  ;;  %v3376_v9 = vld [vmem:[%s3789_s17 + $0x340] sm:$0xff]  ;;  %v3377_v20 = vld [vmem:[%s3789_s17 + $0x358] sm:$0xff] }
 0x1b3   : > { %2090 = vmatprep.subr.mxu0 %v809_v59  ;;  %v4115_v34 = vpop.f32.mrf.mxu0  ;;  %2267 = vmatprep.subr.mxu1 %v941_v3  ;;  %v1305_v44 = vpop.f32.mrf.mxu1  ;;  %v801_v3 = vld [vmem:[#allocation5 + $0xb38] sm:$0xff] }
 0x1b4   : > { %2008 = vmatmul.mubr.f32.gmra.mxu1 %v3374_v36  ;;  %2091 = vmatpush2.msra.mxu0 %v808_v17  ;;  %v4118_v48 = vadd.f32 %v1305_v44, %v1127_v19  ;;  %v932_v17 = vld [vmem:[#allocation5 + $0xf50] sm:$0xff] }
 0x1b5   : > { %2268 = vmatpush2.msra.mxu1 %v940_v18  ;;  %2092 = vmatprep.subr.mxu0 %v805_v23  ;;  %v4120_v59 = vpop.f32.mrf.mxu1  ;;  %v800_v18 = vld [vmem:[#allocation5 + $0xb30] sm:$0xff]  ;;  %v797_v23 = vld [vmem:[#allocation5 + $0xb18] sm:$0xff] }
 0x1b6   : > { %2269 = vmatprep.subr.mxu1 %v937_v26  ;;  %1834 = vmatprep.mubr.f32.mxu0 %v3375_v63  ;;  %v1132_v6 = vpop.f32.mrf.mxu0  ;;  %v3378_v44 = vld [vmem:[%s3789_s17 + $0x350] sm:$0xff] }
 0x1b7   : > { %2093 = vmatpush2.msra.mxu0 %v804_v42  ;;  %2270 = vmatpush2.msra.mxu1 %v936_v45  ;;  %v1133_v19 = vadd.f32 %v1132_v6, %v3957_v7  ;;  %v929_v42 = vld [vmem:[#allocation5 + $0xf38] sm:$0xff]  ;;  %v796_v63 = vld [vmem:[#allocation5 + $0xb10] sm:$0xff] }
 0x1b8   : > { %1835 = vmatmul.mubr.f32.gmra.mxu0 %v3376_v9  ;;  %2013 = vmatprep.mubr.f32.mxu1 %v3377_v20  ;;  %v4126_v36 = vpop.f32.mrf.mxu0  ;;  %v3379_v9 = vld [vmem:[%s3789_s17 + $0x388] sm:$0xff]  ;;  %v793_v20 = vld [vmem:[#allocation5 + $0xaf8] sm:$0xff] }
 0x1b9   : > { %2271 = vmatprep.subr.mxu1 %v933_v51  ;;  %v1311_v26 = vpop.f32.mrf.mxu1  ;;  %2014 = vmatmul.mubr.f32.gmra.mxu1 %v3378_v44  ;;  %v928_v51 = vld [vmem:[#allocation5 + $0xf30] sm:$0xff] }
 0x1ba   : > { %2094 = vmatprep.subr.mxu0 %v801_v3  ;;  %v4129_v45 = vadd.f32 %v1311_v26, %v1133_v19  ;;  %2272 = vmatpush2.msra.mxu1 %v932_v17  ;;  %v925_v3 = vld [vmem:[#allocation5 + $0xf18] sm:$0xff]  ;;  %v792_v17 = vld [vmem:[#allocation5 + $0xaf0] sm:$0xff] }
 0x1bb   : > { %2095 = vmatpush2.msra.mxu0 %v800_v18  ;;  %v4131_v6 = vpop.f32.mrf.mxu1  ;;  %1840 = vmatprep.mubr.f32.mxu0 %v3379_v9  ;;  %v3381_v26 = vld [vmem:[%s3789_s17 + $0x398] sm:$0xff]  ;;  %v924_v18 = vld [vmem:[#allocation5 + $0xf10] sm:$0xff] }
 0x1bc   : > { %4828 = vst [vmem:[#allocation16_spill] sm:$0xff] %v4129_v45  ;;  %2096 = vmatprep.subr.mxu0 %v797_v23  ;;  %v1138_v61 = vpop.f32.mrf.mxu0  ;;  %2273 = vmatprep.subr.mxu1 %v929_v42  ;;  %v921_v23 = vld [vmem:[#allocation5 + $0xef8] sm:$0xff]  ;;  %v3382_v9 = vld [vmem:[%s3789_s17 + $0x390] sm:$0xff]  ;;  %v3383_v45 = vld [vmem:[%s3789_s17 + $0x3c8] sm:$0xff] }
 0x1bd   : > { %1841 = vmatmul.mubr.f32.gmra.mxu0 %v3380_v27  ;;  %v1139_v19 = vadd.f32 %v1138_v61, %v3957_v7  ;;  %2019 = vmatprep.mubr.f32.mxu1 %v3381_v26  ;;  %v1317_v44 = vpop.f32.mrf.mxu1  ;;  %v789_v27 = vld [vmem:[#allocation5 + $0xad8] sm:$0xff] }
 0x1be   : > { %2097 = vmatpush2.msra.mxu0 %v796_v63  ;;  %v4137_v21 = vpop.f32.mrf.mxu0  ;;  %2274 = vmatpush2.msra.mxu1 %v928_v51  ;;  %v920_v63 = vld [vmem:[#allocation5 + $0xef0] sm:$0xff] }
 0x1bf   : > { %2098 = vmatprep.subr.mxu0 %v793_v20  ;;  %v4139_v42 = vadd.f32 %v1317_v44, %v1139_v19  ;;  %2020 = vmatmul.mubr.f32.gmra.mxu1 %v3382_v9  ;;  %v4142_v61 = vpop.f32.mrf.mxu1  ;;  %v788_v51 = vld [vmem:[#allocation5 + $0xad0] sm:$0xff]  ;;  %v3384_v19 = vld [vmem:[%s3789_s17 + $0x3c0] sm:$0xff]  ;;  %v3385_v44 = vld [vmem:[%s3789_s17 + $0x3d8] sm:$0xff] }
 0x1c0   : > { %2275 = vmatprep.subr.mxu1 %v925_v3  ;;  %4830 = vst [vmem:[#allocation18_spill] sm:$0xff] %v4142_v61  ;;  %2099 = vmatpush2.msra.mxu0 %v792_v17  ;;  %v785_v9 = vld [vmem:[#allocation5 + $0xab8] sm:$0xff]  ;;  %v784_v17 = vld [vmem:[#allocation5 + $0xab0] sm:$0xff] }
 0x1c1   : > { %4829 = vst [vmem:[#allocation17_spill] sm:$0xff] %v4139_v42  ;;  %2276 = vmatpush2.msra.mxu1 %v924_v18  ;;  %v1144_v26 = vpop.f32.mrf.mxu0  ;;  %1846 = vmatprep.mubr.f32.mxu0 %v3383_v45  ;;  %v917_v3 = vld [vmem:[#allocation5 + $0xed8] sm:$0xff]  ;;  %v3386_v61 = vld [vmem:[%s3789_s17 + $0x3d0] sm:$0xff] }
 0x1c2   : > { %2277 = vmatprep.subr.mxu1 %v921_v23  ;;  %v1145_v20 = vadd.f32 %v1144_v26, %v3957_v7  ;;  %1847 = vmatmul.mubr.f32.gmra.mxu0 %v3384_v19  ;;  %v916_v45 = vld [vmem:[#allocation5 + $0xed0] sm:$0xff]  ;;  %v913_v26 = vld [vmem:[#allocation5 + $0xeb8] sm:$0xff] }
 0x1c3   : > { %2025 = vmatprep.mubr.f32.mxu1 %v3385_v44  ;;  %v4148_v42 = vpop.f32.mrf.mxu0  ;;  %2100 = vmatprep.subr.mxu0 %v789_v27  ;;  %v1323_v18 = vpop.f32.mrf.mxu1  ;;  %v3387_v44 = vld [vmem:[%s3789_s17 + $0x408] sm:$0xff]  ;;  %v781_v27 = vld [vmem:[#allocation5 + $0xa98] sm:$0xff] }
 0x1c4   : > { %4831 = vst [vmem:[#allocation19_spill] sm:$0xff] %v4148_v42  ;;  %2278 = vmatpush2.msra.mxu1 %v920_v63  ;;  %2101 = vmatpush2.msra.mxu0 %v788_v51  ;;  %v4151_v23 = vadd.f32 %v1323_v18, %v1145_v20  ;;  %v3388_v42 = vld [vmem:[%s3789_s17 + $0x400] sm:$0xff]  ;;  %v780_v51 = vld [vmem:[#allocation5 + $0xa90] sm:$0xff]  ;;  %v777_v18 = vld [vmem:[#allocation5 + $0xa78] sm:$0xff] }
 0x1c5   : > { %2026 = vmatmul.mubr.f32.gmra.mxu1 %v3386_v61  ;;  %2102 = vmatprep.subr.mxu0 %v785_v9  ;;  %v4153_v19 = vpop.f32.mrf.mxu1  ;;  %v912_v61 = vld [vmem:[#allocation5 + $0xeb0] sm:$0xff]  ;;  %v3391_v9 = vld [vmem:[%s3789_s17 + $0x448] sm:$0xff] }
 0x1c6   : > { %4832 = vst [vmem:[#allocation20_spill] sm:$0xff] %v4151_v23  ;;  %2279 = vmatprep.subr.mxu1 %v917_v3  ;;  %4833 = vst [vmem:[#allocation21_spill] sm:$0xff] %v4153_v19  ;;  %1852 = vmatprep.mubr.f32.mxu0 %v3387_v44  ;;  %v1150_v63 = vpop.f32.mrf.mxu0  ;;  %v3389_v3 = vld [vmem:[%s3789_s17 + $0x418] sm:$0xff] }
 0x1c7   : > { %2103 = vmatpush2.msra.mxu0 %v784_v17  ;;  %2280 = vmatpush2.msra.mxu1 %v916_v45  ;;  %v1151_v20 = vadd.f32 %v1150_v63, %v3957_v7  ;;  %v3390_v17 = vld [vmem:[%s3789_s17 + $0x410] sm:$0xff]  ;;  %v909_v45 = vld [vmem:[#allocation5 + $0xe98] sm:$0xff] }
 0x1c8   : > { %1853 = vmatmul.mubr.f32.gmra.mxu0 %v3388_v42  ;;  %2031 = vmatprep.mubr.f32.mxu1 %v3389_v3  ;;  %v4160_v44 = vpop.f32.mrf.mxu0  ;;  %v776_v7 = vld [vmem:[#allocation5 + $0xa70] sm:$0xff]  ;;  %v773_v3 = vld [vmem:[#allocation5 + $0xa58] sm:$0xff] }
 0x1c9   : > { %2281 = vmatprep.subr.mxu1 %v913_v26  ;;  %v1329_v23 = vpop.f32.mrf.mxu1  ;;  %4834 = vst [vmem:[#allocation22_spill] sm:$0xff] %v4160_v44  ;;  %2032 = vmatmul.mubr.f32.gmra.mxu1 %v3390_v17  ;;  %v908_v26 = vld [vmem:[#allocation5 + $0xe90] sm:$0xff]  ;;  %v4836_v44 = vsub.s32 1, %v3943_v52 }
 0x1ca   : > { %2104 = vmatprep.subr.mxu0 %v781_v27  ;;  %v4163_v42 = vadd.f32 %v1329_v23, %v1151_v20  ;;  %2282 = vmatpush2.msra.mxu1 %v912_v61  ;;  %v3392_v27 = vld [vmem:[%s3789_s17 + $0x440] sm:$0xff]  ;;  %v905_v23 = vld [vmem:[#allocation5 + $0xe78] sm:$0xff]  ;;  %v772_v20 = vld [vmem:[#allocation5 + $0xa50] sm:$0xff] }
 0x1cb   : > { %2105 = vmatpush2.msra.mxu0 %v780_v51  ;;  %v4165_v63 = vpop.f32.mrf.mxu1  ;;  %1858 = vmatprep.mubr.f32.mxu0 %v3391_v9  ;;  %v4171_v19 = vrot.slane %v3950_v0, %v4836_v44  ;;  %v3393_v51 = vld [vmem:[%s3789_s17 + $0x458] sm:$0xff]  ;;  %v904_v17 = vld [vmem:[#allocation5 + $0xe70] sm:$0xff] }
 0x1cc   : > { %4835 = vst [vmem:[#allocation23_spill] sm:$0xff] %v4163_v42  ;;  %2106 = vmatprep.subr.mxu0 %v777_v18  ;;  %2283 = vmatprep.subr.mxu1 %v909_v45  ;;  %v1400_v61 = vpop.f32.mrf.mxu0  ;;  %v901_v0 = vld [vmem:[#allocation5 + $0xe58] sm:$0xff]  ;;  %v3396_v42 = vld [vmem:[%s3789_s17 + $0x480] sm:$0xff] }
 0x1cd   : > { %1859 = vmatmul.mubr.f32.gmra.mxu0 %v3392_v27  ;;  %2037 = vmatprep.mubr.f32.mxu1 %v3393_v51  ;;  %v1401_v9 = vadd.f32 %v1400_v61, %v3967_v24  ;;  %v1051_v18 = vadd.f32 %v3973_v37, %v4171_v19  ;;  %v3394_v27 = vld [vmem:[%s3789_s17 + $0x450] sm:$0xff]  ;;  %v769_v24 = vld [vmem:[#allocation5 + $0xa38] sm:$0xff]  ;;  %v3395_v37 = vld [vmem:[%s3789_s17 + $0x488] sm:$0xff] }
 0x1ce   : > { %2107 = vmatpush2.msra.mxu0 %v776_v7  ;;  %2284 = vmatpush2.msra.mxu1 %v908_v26  ;;  %v1579_v44 = vpop.f32.mrf.mxu1  ;;  %v4178_v45 = vpop.f32.mrf.mxu0  ;;  %v900_v61 = vld [vmem:[#allocation5 + $0xe50] sm:$0xff] }
 0x1cf   : > { %2108 = vmatprep.subr.mxu0 %v773_v3  ;;  %4837 = vst [vmem:[#allocation24_spill] sm:$0xff] %v4178_v45  ;;  %2038 = vmatmul.mubr.f32.gmra.mxu1 %v3394_v27  ;;  %v4181_v7 = vadd.f32 %v1579_v44, %v1401_v9  ;;  %v768_v26 = vld [vmem:[#allocation5 + $0xa30] sm:$0xff]  ;;  %v1230_v45 = vadd.f32 %v3977_v40, %v1051_v18  ;;  %v3397_v27 = vld [vmem:[%s3789_s17 + $0x498] sm:$0xff] }
 0x1d0   : > { %2285 = vmatprep.subr.mxu1 %v905_v23  ;;  %2109 = vmatpush2.msra.mxu0 %v772_v20  ;;  %v4183_v51 = vpop.f32.mrf.mxu1  ;;  %v897_v23 = vld [vmem:[#allocation5 + $0xe38] sm:$0xff]  ;;  %v1057_v44 = vadd.f32 %v3982_v50, %v4171_v19 }
 0x1d1   : > { %4838 = vst [vmem:[#allocation25_spill] sm:$0xff] %v4181_v7  ;;  %2286 = vmatpush2.msra.mxu1 %v904_v17  ;;  %4839 = vst [vmem:[#allocation26_spill] sm:$0xff] %v4183_v51  ;;  %1864 = vmatprep.mubr.f32.mxu0 %v3395_v37  ;;  %v1406_v3 = vpop.f32.mrf.mxu0  ;;  %v765_v9 = vld [vmem:[#allocation5 + $0xa18] sm:$0xff]  ;;  %v764_v37 = vld [vmem:[#allocation5 + $0xa10] sm:$0xff] }
 0x1d2   : > { %2287 = vmatprep.subr.mxu1 %v901_v0  ;;  %1865 = vmatmul.mubr.f32.gmra.mxu0 %v3396_v42  ;;  %v1407_v20 = vadd.f32 %v1406_v3, %v3975_v39  ;;  %v896_v0 = vld [vmem:[#allocation5 + $0xe30] sm:$0xff]  ;;  %v893_v40 = vld [vmem:[#allocation5 + $0xe18] sm:$0xff] }
 0x1d3   : > { %2043 = vmatprep.mubr.f32.mxu1 %v3397_v27  ;;  %v1585_v17 = vpop.f32.mrf.mxu1  ;;  %2110 = vmatprep.subr.mxu0 %v769_v24  ;;  %v1408_v7 = vpop.f32.mrf.mxu0  ;;  %v3398_v51 = vld [vmem:[%s3789_s17 + $0x490] sm:$0xff] }
 0x1d4   : > { %2288 = vmatpush2.msra.mxu1 %v900_v61  ;;  %2111 = vmatpush2.msra.mxu0 %v768_v26  ;;  %v4193_v42 = vadd.f32 %v1585_v17, %v1407_v20  ;;  %v1409_v18 = vadd.f32 %v1408_v7, %v1230_v45  ;;  %v892_v39 = vld [vmem:[#allocation5 + $0xe10] sm:$0xff]  ;;  %v1236_v61 = vadd.f32 %v3988_v57, %v1057_v44  ;;  %v3400_v7 = vld [vmem:[%s3789_s17 + $0x20] sm:$0xff]  ;;  %v3402_v57 = vld [vmem:[%s3789_s17 + $0x68] sm:$0xff] }
 0x1d5   : > { %2044 = vmatmul.mubr.f32.gmra.mxu1 %v3398_v51  ;;  %v1587_v27 = vpop.f32.mrf.mxu1  ;;  %2289 = vmatprep.subr.mxu1 %v897_v23  ;;  %v3399_v51 = vld [vmem:[%s3789_s17 + $0x28] sm:$0xff]  ;;  %v1063_v45 = vadd.f32 %v3994_v8, %v4171_v19  ;;  %v3403_v44 = vld [vmem:[%s3789_s17 + $0x30] sm:$0xff] }
 0x1d6   : > { %2112 = vmatprep.subr.mxu0 %v765_v9  ;;  %2290 = vmatpush2.msra.mxu1 %v896_v0  ;;  %v4195_v50 = vadd.f32 %v1587_v27, %v1409_v18  ;;  %v1412_v24 = vpop.f32.mrf.mxu0  ;;  %v3401_v9 = vld [vmem:[%s3789_s17 + $0x38] sm:$0xff]  ;;  %v3405_v18 = vld [vmem:[%s3789_s17 + $0x60] sm:$0xff] }
 0x1d7   : > { %2113 = vmatpush2.msra.mxu0 %v764_v37  ;;  %2114 = vmatprep.mubr.f32.mxu0 %v3399_v51  ;;  %v1413_v26 = vadd.f32 %v1412_v24, %v3985_v55  ;;  %v3404_v0 = vld [vmem:[%s3789_s17 + $0x78] sm:$0xff]  ;;  %v1069_v51 = vadd.f32 %v4005_v28, %v4171_v19 }
 0x1d8   : > { %2291 = vmatprep.subr.mxu1 %v893_v40  ;;  %2115 = vmatmul.mubr.f32.vlgmr.msra.gmra.mxu0 %v3400_v7  ;;  %v1414_v23 = vpop.f32.mrf.mxu0  ;;  %v1242_v40 = vadd.f32 %v3999_v12, %v1063_v45  ;;  %v3408_v12 = vld [vmem:[%s3789_s17 + $0xb8] sm:$0xff] }
 0x1d9   : > { %2292 = vmatpush2.msra.mxu1 %v892_v39  ;;  %v1591_v3 = vpop.f32.mrf.mxu1  ;;  %2293 = vmatprep.mubr.f32.mxu1 %v3401_v9  ;;  %v1415_v17 = vadd.f32 %v1414_v23, %v1236_v61  ;;  %v3406_v39 = vld [vmem:[%s3789_s17 + $0xa8] sm:$0xff]  ;;  %v1248_v28 = vadd.f32 %v4010_v33, %v1069_v51 }
 0x1da   : > { %2120 = vmatprep.mubr.f32.mxu0 %v3402_v57  ;;  %v4205_v20 = vadd.f32 %v1591_v3, %v1413_v26  ;;  %2294 = vmatmul.mubr.f32.vlgmr.msra.gmra.mxu1 %v3403_v44  ;;  %v3407_v26 = vld [vmem:[%s3789_s17 + $0x70] sm:$0xff]  ;;  %v3410_v9 = vld [vmem:[%s3789_s17 + $0xe8] sm:$0xff] }
 0x1db   : > { %v1593_v55 = vpop.f32.mrf.mxu1  ;;  %2299 = vmatprep.mubr.f32.mxu1 %v3404_v0  ;;  %v1075_v0 = vadd.f32 %v4016_v46, %v4171_v19  ;;  %v3414_v33 = vld [vmem:[%s3789_s17 + $0x128] sm:$0xff] }
 0x1dc   : > { %v4209_v8 = vadd.f32 %v1593_v55, %v1415_v17  ;;  %v1418_v37 = vpop.f32.mrf.mxu0  ;;  %2121 = vmatmul.mubr.f32.gmra.mxu0 %v3405_v18  ;;  %v3411_v17 = vld [vmem:[%s3789_s17 + $0xb0] sm:$0xff]  ;;  %v3413_v18 = vld [vmem:[%s3789_s17 + $0xe0] sm:$0xff] }
 0x1dd   : > { %v1419_v27 = vadd.f32 %v1418_v37, %v3997_v11  ;;  %2126 = vmatprep.mubr.f32.mxu0 %v3406_v39  ;;  %v3409_v11 = vld [vmem:[%s3789_s17 + $0xa0] sm:$0xff]  ;;  %v3412_v37 = vld [vmem:[%s3789_s17 + $0xf8] sm:$0xff]  ;;  %v1254_v51 = vadd.f32 %v4022_v58, %v1075_v0 }
 0x1de   : > { %v1597_v24 = vpop.f32.mrf.mxu1  ;;  %v1420_v61 = vpop.f32.mrf.mxu0  ;;  %2300 = vmatmul.mubr.f32.gmra.mxu1 %v3407_v26  ;;  %v3416_v26 = vld [vmem:[%s3789_s17 + $0x138] sm:$0xff] }
 0x1df   : > { %v4218_v7 = vadd.f32 %v1597_v24, %v1419_v27  ;;  %v1421_v3 = vadd.f32 %v1420_v61, %v1242_v40  ;;  %2305 = vmatprep.mubr.f32.mxu1 %v3408_v12  ;;  %v3415_v61 = vld [vmem:[%s3789_s17 + $0xf0] sm:$0xff]  ;;  %v3417_v12 = vld [vmem:[%s3789_s17 + $0x120] sm:$0xff] }
 0x1e0   : > { %v1599_v45 = vpop.f32.mrf.mxu1  ;;  %2127 = vmatmul.mubr.f32.gmra.mxu0 %v3409_v11  ;;  %v1081_v11 = vadd.f32 %v4028_v10, %v4171_v19 }
 0x1e1   : > { %v4222_v23 = vadd.f32 %v1599_v45, %v1421_v3  ;;  %2132 = vmatprep.mubr.f32.mxu0 %v3410_v9  ;;  %v1424_v57 = vpop.f32.mrf.mxu0  ;;  %v3418_v9 = vld [vmem:[%s3789_s17 + $0x168] sm:$0xff] }
 0x1e2   : > { %2306 = vmatmul.mubr.f32.gmra.mxu1 %v3411_v17  ;;  %v1425_v44 = vadd.f32 %v1424_v57, %v4008_v31  ;;  %v3419_v17 = vld [vmem:[%s3789_s17 + $0x130] sm:$0xff] }
 0x1e3   : > { %v1603_v55 = vpop.f32.mrf.mxu1  ;;  %2311 = vmatprep.mubr.f32.mxu1 %v3412_v37  ;;  %v1426_v40 = vpop.f32.mrf.mxu0  ;;  %v1260_v37 = vadd.f32 %v4032_v15, %v1081_v11  ;;  %v3427_v11 = vld [vmem:[%s3789_s17 + $0x1b0] sm:$0xff] }
 0x1e4   : > { %2133 = vmatmul.mubr.f32.gmra.mxu0 %v3413_v18  ;;  %v4232_v27 = vadd.f32 %v1603_v55, %v1425_v44  ;;  %v1427_v39 = vadd.f32 %v1426_v40, %v1248_v28  ;;  %v3420_v44 = vld [vmem:[%s3789_s17 + $0x178] sm:$0xff]  ;;  %v3421_v55 = vld [vmem:[%s3789_s17 + $0x160] sm:$0xff]  ;;  %v3422_v40 = vld [vmem:[%s3789_s17 + $0x1a8] sm:$0xff] }
 0x1e5   : > { %2138 = vmatprep.mubr.f32.mxu0 %v3414_v33  ;;  %v1605_v24 = vpop.f32.mrf.mxu1  ;;  %v1087_v33 = vadd.f32 %v4038_v32, %v4171_v19 }
 0x1e6   : > { %2312 = vmatmul.mubr.f32.gmra.mxu1 %v3415_v61  ;;  %v4236_v31 = vadd.f32 %v1605_v24, %v1427_v39  ;;  %v3423_v24 = vld [vmem:[%s3789_s17 + $0x170] sm:$0xff] }
 0x1e7   : > { %v1430_v46 = vpop.f32.mrf.mxu0  ;;  %2317 = vmatprep.mubr.f32.mxu1 %v3416_v26 }
 0x1e8   : > { %v1431_v3 = vadd.f32 %v1430_v46, %v4019_v53  ;;  %2139 = vmatmul.mubr.f32.gmra.mxu0 %v3417_v12  ;;  %v3424_v46 = vld [vmem:[%s3789_s17 + $0x1b8] sm:$0xff]  ;;  %v3426_v12 = vld [vmem:[%s3789_s17 + $0x1e8] sm:$0xff] }
 0x1e9   : > { %v1432_v45 = vpop.f32.mrf.mxu0  ;;  %2144 = vmatprep.mubr.f32.mxu0 %v3418_v9  ;;  %v1609_v57 = vpop.f32.mrf.mxu1 }
 0x1ea   : > { %v1433_v28 = vadd.f32 %v1432_v45, %v1254_v51  ;;  %2318 = vmatmul.mubr.f32.gmra.mxu1 %v3419_v17  ;;  %v4246_v58 = vadd.f32 %v1609_v57, %v1431_v3  ;;  %v3425_v3 = vld [vmem:[%s3789_s17 + $0x1a0] sm:$0xff]  ;;  %v1266_v45 = vadd.f32 %v4043_v41, %v1087_v33  ;;  %v3428_v17 = vld [vmem:[%s3789_s17 + $0x1f8] sm:$0xff]  ;;  %v3430_v41 = vld [vmem:[%s3789_s17 + $0x228] sm:$0xff] }
 0x1eb   : > { %2323 = vmatprep.mubr.f32.mxu1 %v3420_v44  ;;  %v1611_v53 = vpop.f32.mrf.mxu1 }
 0x1ec   : > { %2145 = vmatmul.mubr.f32.gmra.mxu0 %v3421_v55  ;;  %v4250_v0 = vadd.f32 %v1611_v53, %v1433_v28  ;;  %v1436_v10 = vpop.f32.mrf.mxu0  ;;  %v1093_v28 = vadd.f32 %v4049_v56, %v4171_v19  ;;  %v3429_v53 = vld [vmem:[%s3789_s17 + $0x1e0] sm:$0xff] }
 0x1ed   : > { %2150 = vmatprep.mubr.f32.mxu0 %v3422_v40  ;;  %v1437_v18 = vadd.f32 %v1436_v10, %v4030_v14  ;;  %v3431_v40 = vld [vmem:[%s3789_s17 + $0x1f0] sm:$0xff] }
 0x1ee   : > { %v1615_v39 = vpop.f32.mrf.mxu1  ;;  %2324 = vmatmul.mubr.f32.gmra.mxu1 %v3423_v24  ;;  %v1438_v61 = vpop.f32.mrf.mxu0  ;;  %v3433_v24 = vld [vmem:[%s3789_s17 + $0x220] sm:$0xff] }
 0x1ef   : > { %2329 = vmatprep.mubr.f32.mxu1 %v3424_v46  ;;  %v4259_v51 = vadd.f32 %v1615_v39, %v1437_v18  ;;  %v1439_v26 = vadd.f32 %v1438_v61, %v1260_v37  ;;  %v1272_v18 = vadd.f32 %v4055_v4, %v1093_v28  ;;  %v3432_v39 = vld [vmem:[%s3789_s17 + $0x238] sm:$0xff]  ;;  %v1099_v46 = vadd.f32 %v4061_v25, %v4171_v19 }
 0x1f0   : > { %v1617_v15 = vpop.f32.mrf.mxu1  ;;  %2151 = vmatmul.mubr.f32.gmra.mxu0 %v3425_v3 }
 0x1f1   : > { %2156 = vmatprep.mubr.f32.mxu0 %v3426_v12  ;;  %v4263_v14 = vadd.f32 %v1617_v15, %v1439_v26  ;;  %v1442_v32 = vpop.f32.mrf.mxu0  ;;  %v3434_v26 = vld [vmem:[%s3789_s17 + $0x268] sm:$0xff]  ;;  %v3435_v12 = vld [vmem:[%s3789_s17 + $0x230] sm:$0xff] }
 0x1f2   : > { %2330 = vmatmul.mubr.f32.gmra.mxu1 %v3427_v11  ;;  %v1443_v9 = vadd.f32 %v1442_v32, %v4040_v35  ;;  %v3436_v32 = vld [vmem:[%s3789_s17 + $0x278] sm:$0xff] }
 0x1f3   : > { %v1621_v57 = vpop.f32.mrf.mxu1  ;;  %2335 = vmatprep.mubr.f32.mxu1 %v3428_v17  ;;  %v1444_v44 = vpop.f32.mrf.mxu0 }
 0x1f4   : > { %2157 = vmatmul.mubr.f32.gmra.mxu0 %v3429_v53  ;;  %v4272_v55 = vadd.f32 %v1621_v57, %v1443_v9  ;;  %v1445_v10 = vadd.f32 %v1444_v44, %v1266_v45  ;;  %v3437_v45 = vld [vmem:[%s3789_s17 + $0x260] sm:$0xff]  ;;  %v1278_v9 = vadd.f32 %v4065_v30, %v1099_v46  ;;  %v3438_v57 = vld [vmem:[%s3789_s17 + $0x2a8] sm:$0xff]  ;;  %v1105_v44 = vadd.f32 %v4071_v54, %v4171_v19  ;;  %v3439_v53 = vld [vmem:[%s3789_s17 + $0x270] sm:$0xff] }
 0x1f5   : > { %2162 = vmatprep.mubr.f32.mxu0 %v3430_v41  ;;  %v1623_v37 = vpop.f32.mrf.mxu1  ;;  %v3440_v41 = vld [vmem:[%s3789_s17 + $0x2b8] sm:$0xff] }
 0x1f6   : > { %2336 = vmatmul.mubr.f32.gmra.mxu1 %v3431_v40  ;;  %v4276_v35 = vadd.f32 %v1623_v37, %v1445_v10  ;;  %v3444_v46 = vld [vmem:[%s3789_s17 + $0x2f8] sm:$0xff] }
 0x1f7   : > { %v1448_v56 = vpop.f32.mrf.mxu0  ;;  %2341 = vmatprep.mubr.f32.mxu1 %v3432_v39  ;;  %v1284_v39 = vadd.f32 %v4076_v2, %v1105_v44  ;;  %v3446_v2 = vld [vmem:[%s3789_s17 + $0x328] sm:$0xff]  ;;  %v1117_v44 = vadd.f32 %v4093_v5, %v4171_v19 }
 0x1f8   : > { %v1449_v33 = vadd.f32 %v1448_v56, %v4052_v1  ;;  %2163 = vmatmul.mubr.f32.gmra.mxu0 %v3433_v24  ;;  %v3441_v56 = vld [vmem:[%s3789_s17 + $0x2a0] sm:$0xff] }
 0x1f9   : > { %v1450_v61 = vpop.f32.mrf.mxu0  ;;  %2168 = vmatprep.mubr.f32.mxu0 %v3434_v26  ;;  %v1627_v15 = vpop.f32.mrf.mxu1 }
 0x1fa   : > { %v1451_v3 = vadd.f32 %v1450_v61, %v1272_v18  ;;  %2342 = vmatmul.mubr.f32.gmra.mxu1 %v3435_v12  ;;  %v4286_v4 = vadd.f32 %v1627_v15, %v1449_v33  ;;  %v3442_v18 = vld [vmem:[%s3789_s17 + $0x2e8] sm:$0xff]  ;;  %v3443_v33 = vld [vmem:[%s3789_s17 + $0x2b0] sm:$0xff]  ;;  %v1111_v61 = vadd.f32 %v4082_v22, %v4171_v19 }
 0x1fb   : > { %2347 = vmatprep.mubr.f32.mxu1 %v3436_v32  ;;  %v1629_v1 = vpop.f32.mrf.mxu1 }
 0x1fc   : > { %2169 = vmatmul.mubr.f32.gmra.mxu0 %v3437_v45  ;;  %v4290_v11 = vadd.f32 %v1629_v1, %v1451_v3  ;;  %v1454_v25 = vpop.f32.mrf.mxu0  ;;  %v3445_v3 = vld [vmem:[%s3789_s17 + $0x2e0] sm:$0xff]  ;;  %v3447_v45 = vld [vmem:[%s3789_s17 + $0x2f0] sm:$0xff] }
 0x1fd   : > { %2174 = vmatprep.mubr.f32.mxu0 %v3438_v57  ;;  %v1455_v28 = vadd.f32 %v1454_v25, %v4063_v29  ;;  %v1290_v25 = vadd.f32 %v4087_v43, %v1111_v61  ;;  %v1123_v61 = vadd.f32 %v4104_v47, %v4171_v19 }
 0x1fe   : > { %v1633_v17 = vpop.f32.mrf.mxu1  ;;  %2348 = vmatmul.mubr.f32.gmra.mxu1 %v3439_v53  ;;  %v1456_v10 = vpop.f32.mrf.mxu0  ;;  %v3450_v53 = vld [vmem:[%s3789_s17 + $0x368] sm:$0xff] }
 0x1ff   : > { %2353 = vmatprep.mubr.f32.mxu1 %v3440_v41  ;;  %v4299_v37 = vadd.f32 %v1633_v17, %v1455_v28  ;;  %v1457_v40 = vadd.f32 %v1456_v10, %v1278_v9  ;;  %v3448_v9 = vld [vmem:[%s3789_s17 + $0x338] sm:$0xff]  ;;  %v3449_v28 = vld [vmem:[%s3789_s17 + $0x320] sm:$0xff] }
 0x200   : > { %v1635_v30 = vpop.f32.mrf.mxu1  ;;  %2175 = vmatmul.mubr.f32.gmra.mxu0 %v3441_v56  ;;  %v3453_v56 = vld [vmem:[%s3789_s17 + $0x360] sm:$0xff] }
 0x201   : > { %2180 = vmatprep.mubr.f32.mxu0 %v3442_v18  ;;  %v4303_v29 = vadd.f32 %v1635_v30, %v1457_v40  ;;  %v3451_v40 = vld [vmem:[%s3789_s17 + $0x330] sm:$0xff]  ;;  %v3452_v30 = vld [vmem:[%s3789_s17 + $0x378] sm:$0xff] }
 0x202   : > { %v1460_v54 = vpop.f32.mrf.mxu0  ;;  %2354 = vmatmul.mubr.f32.gmra.mxu1 %v3443_v33 }
 0x203   : > { %v1461_v24 = vadd.f32 %v1460_v54, %v4073_v60  ;;  %2359 = vmatprep.mubr.f32.mxu1 %v3444_v46  ;;  %v1639_v26 = vpop.f32.mrf.mxu1  ;;  %v1296_v54 = vadd.f32 %v4098_v16, %v1117_v44  ;;  %v3455_v46 = vld [vmem:[%s3789_s17 + $0x370] sm:$0xff]  ;;  %v3461_v44 = vld [vmem:[%s3789_s17 + $0x3e0] sm:$0xff] }
 0x204   : > { %v1462_v15 = vpop.f32.mrf.mxu0  ;;  %2181 = vmatmul.mubr.f32.gmra.mxu0 %v3445_v3 }
 0x205   : > { %v4312_v12 = vadd.f32 %v1639_v26, %v1461_v24  ;;  %v1463_v32 = vadd.f32 %v1462_v15, %v1284_v39  ;;  %2186 = vmatprep.mubr.f32.mxu0 %v3446_v2  ;;  %v1641_v1 = vpop.f32.mrf.mxu1  ;;  %v3454_v39 = vld [vmem:[%s3789_s17 + $0x3a8] sm:$0xff]  ;;  %v3456_v15 = vld [vmem:[%s3789_s17 + $0x3b8] sm:$0xff]  ;;  %v3457_v2 = vld [vmem:[%s3789_s17 + $0x3a0] sm:$0xff] }
 0x206   : > { %2360 = vmatmul.mubr.f32.gmra.mxu1 %v3447_v45  ;;  %v1302_v45 = vadd.f32 %v4109_v62, %v1123_v61  ;;  %v3462_v62 = vld [vmem:[%s3789_s17 + $0x428] sm:$0xff] }
 0x207   : > { %v4316_v60 = vadd.f32 %v1641_v1, %v1463_v32  ;;  %v1466_v22 = vpop.f32.mrf.mxu0  ;;  %2365 = vmatprep.mubr.f32.mxu1 %v3448_v9  ;;  %v3458_v1 = vld [vmem:[%s3789_s17 + $0x3e8] sm:$0xff]  ;;  %v1129_v9 = vadd.f32 %v4115_v34, %v4171_v19 }
 0x208   : > { %v1467_v57 = vadd.f32 %v1466_v22, %v4085_v38  ;;  %2187 = vmatmul.mubr.f32.gmra.mxu0 %v3449_v28  ;;  %v3459_v22 = vld [vmem:[%s3789_s17 + $0x3b0] sm:$0xff] }
 0x209   : > { %v1468_v17 = vpop.f32.mrf.mxu0  ;;  %2192 = vmatprep.mubr.f32.mxu0 %v3450_v53  ;;  %v1645_v10 = vpop.f32.mrf.mxu1 }
 0x20a   : > { %v1469_v41 = vadd.f32 %v1468_v17, %v1290_v25  ;;  %2366 = vmatmul.mubr.f32.gmra.mxu1 %v3451_v40  ;;  %v4326_v43 = vadd.f32 %v1645_v10, %v1467_v57  ;;  %v3460_v57 = vld [vmem:[%s3789_s17 + $0x3f8] sm:$0xff]  ;;  %v3463_v40 = vld [vmem:[%s3789_s17 + $0x3f0] sm:$0xff] }
 0x20b   : > { %2371 = vmatprep.mubr.f32.mxu1 %v3452_v30  ;;  %v1647_v38 = vpop.f32.mrf.mxu1  ;;  %v1308_v30 = vadd.f32 %v4120_v59, %v1129_v9 }
 0x20c   : > { %2193 = vmatmul.mubr.f32.gmra.mxu0 %v3453_v56  ;;  %v4330_v18 = vadd.f32 %v1647_v38, %v1469_v41  ;;  %v1472_v5 = vpop.f32.mrf.mxu0  ;;  %v3464_v38 = vld [vmem:[%s3789_s17 + $0x438] sm:$0xff] }
 0x20d   : > { %2198 = vmatprep.mubr.f32.mxu0 %v3454_v39  ;;  %v1473_v33 = vadd.f32 %v1472_v5, %v4096_v13  ;;  %v3465_v5 = vld [vmem:[%s3789_s17 + $0x420] sm:$0xff]  ;;  %v1135_v39 = vadd.f32 %v4126_v36, %v4171_v19 }
 0x20e   : > { %v1651_v24 = vpop.f32.mrf.mxu1  ;;  %2372 = vmatmul.mubr.f32.gmra.mxu1 %v3455_v46  ;;  %v1474_v26 = vpop.f32.mrf.mxu0  ;;  %v3467_v46 = vld [vmem:[%s3789_s17 + $0x430] sm:$0xff] }
 0x20f   : > { %2377 = vmatprep.mubr.f32.mxu1 %v3456_v15  ;;  %v4339_v3 = vadd.f32 %v1651_v24, %v1473_v33  ;;  %v1475_v32 = vadd.f32 %v1474_v26, %v1296_v54  ;;  %v3466_v33 = vld [vmem:[%s3789_s17 + $0x468] sm:$0xff]  ;;  %v3468_v26 = vld [vmem:[%s3789_s17 + $0x478] sm:$0xff]  ;;  %v3469_v15 = vld [vmem:[%s3789_s17 + $0x460] sm:$0xff] }
 0x210   : > { %v1653_v16 = vpop.f32.mrf.mxu1  ;;  %2199 = vmatmul.mubr.f32.gmra.mxu0 %v3457_v2  ;;  %v3470_v2 = vld [vmem:[%s3789_s17 + $0x4a8] sm:$0xff] }
 0x211   : > { %2204 = vmatprep.mubr.f32.mxu0 %v3458_v1  ;;  %v4343_v13 = vadd.f32 %v1653_v16, %v1475_v32  ;;  %v1314_v16 = vadd.f32 %v4131_v6, %v1135_v39  ;;  %v4840_v1 = vld [vmem:[#allocation16_spill] sm:$0xff] }
 0x212   : > { %v1478_v47 = vpop.f32.mrf.mxu0  ;;  %2378 = vmatmul.mubr.f32.gmra.mxu1 %v3459_v22  ;;  %v3471_v22 = vld [vmem:[%s3789_s17 + $0x470] sm:$0xff] }
 0x213   : > { %v1479_v25 = vadd.f32 %v1478_v47, %v4106_v49  ;;  %2383 = vmatprep.mubr.f32.mxu1 %v3460_v57  ;;  %v1657_v28 = vpop.f32.mrf.mxu1  ;;  %v3472_v57 = vld [vmem:[%s3789_s17 + $0x4b8] sm:$0xff] }
 0x214   : > { %v1480_v17 = vpop.f32.mrf.mxu0  ;;  %2205 = vmatmul.mubr.f32.gmra.mxu0 %v3461_v44  ;;  %v3473_v44 = vld [vmem:[%s3789_s17 + $0x4a0] sm:$0xff] }
 0x215   : > { %v4352_v53 = vadd.f32 %v1657_v28, %v1479_v25  ;;  %v1481_v10 = vadd.f32 %v1480_v17, %v1302_v45  ;;  %2210 = vmatprep.mubr.f32.mxu0 %v3462_v62  ;;  %v1659_v41 = vpop.f32.mrf.mxu1  ;;  %v1141_v45 = vadd.f32 %v4137_v21, %v4171_v19  ;;  %v4843_v21 = vld [vmem:[#allocation17_spill] sm:$0xff] }
 0x216   : > { %2384 = vmatmul.mubr.f32.gmra.mxu1 %v3463_v40 }
 0x217   : > { %v4356_v49 = vadd.f32 %v1659_v41, %v1481_v10  ;;  %v1484_v34 = vpop.f32.mrf.mxu0  ;;  %2389 = vmatprep.mubr.f32.mxu1 %v3464_v38  ;;  %v4842_v41 = vld [vmem:[#allocation18_spill] sm:$0xff]  ;;  %v4844_v38 = vld [vmem:[#allocation19_spill] sm:$0xff] }
 0x218   : > { %v1485_v56 = vadd.f32 %v1484_v34, %v4118_v48  ;;  %2211 = vmatmul.mubr.f32.gmra.mxu0 %v3465_v5  ;;  %v1320_v40 = vadd.f32 %v4842_v41, %v1141_v45  ;;  %v3474_v34 = vld [vmem:[%s3789_s17 + $0x4b0] sm:$0xff]  ;;  %v970_v41 = vsub.s32 3, %v3943_v52 }
 0x219   : > { %v1486_v54 = vpop.f32.mrf.mxu0  ;;  %2216 = vmatprep.mubr.f32.mxu0 %v3466_v33  ;;  %v1663_v24 = vpop.f32.mrf.mxu1 }
 0x21a   : > { %v1487_v61 = vadd.f32 %v1486_v54, %v1308_v30  ;;  %2390 = vmatmul.mubr.f32.gmra.mxu1 %v3467_v46  ;;  %v4366_v59 = vadd.f32 %v1663_v24, %v1485_v56  ;;  %v1147_v56 = vadd.f32 %v4844_v38, %v4171_v19  ;;  %v3475_v38 = vld [vmem:[#allocation7] sm:$0xf] }
 0x21b   : > { %2395 = vmatprep.mubr.f32.mxu1 %v3468_v26  ;;  %v1665_v48 = vpop.f32.mrf.mxu1  ;;  %v4847_v26 = vld [vmem:[#allocation21_spill] sm:$0xff] }
 0x21c   : > { %2217 = vmatmul.mubr.f32.gmra.mxu0 %v3469_v15  ;;  %v4370_v32 = vadd.f32 %v1665_v48, %v1487_v61  ;;  %v1490_v36 = vpop.f32.mrf.mxu0  ;;  %v1326_v48 = vadd.f32 %v4847_v26, %v1147_v56  ;;  %v4848_v15 = vld [vmem:[#allocation20_spill] sm:$0xff] }
 0x21d   : > { %2222 = vmatprep.mubr.f32.mxu0 %v3470_v2  ;;  %v1491_v47 = vadd.f32 %v1490_v36, %v4840_v1  ;;  %v4849_v2 = vld [vmem:[#allocation22_spill] sm:$0xff] }
 0x21e   : > { %2396 = vmatmul.mubr.f32.gmra.mxu1 %v3471_v22  ;;  %v1492_v9 = vpop.f32.mrf.mxu0  ;;  %v1153_v1 = vadd.f32 %v4849_v2, %v4171_v19 }
 0x21f   : > { %v1669_v25 = vpop.f32.mrf.mxu1  ;;  %2401 = vmatprep.mubr.f32.mxu1 %v3472_v57  ;;  %v1493_v17 = vadd.f32 %v1492_v9, %v1314_v16  ;;  %v966_v9 = vsub.s32 2, %v3943_v52 }
 0x220   : > { %v4379_v28 = vadd.f32 %v1669_v25, %v1491_v47  ;;  %2223 = vmatmul.mubr.f32.gmra.mxu0 %v3473_v44  ;;  %v1332_v44 = vadd.f32 %v4165_v63, %v1153_v1 }
 0x221   : > { %v1671_v6 = vpop.f32.mrf.mxu1  ;;  %v4407_v56 = vrot.slane %v3475_v38, %v966_v9 }
 0x222   : > { %v4382_v10 = vadd.f32 %v1671_v6, %v1493_v17  ;;  %v1496_v62 = vpop.f32.mrf.mxu0  ;;  %2402 = vmatmul.mubr.f32.gmra.mxu1 %v3474_v34  ;;  %v4852_v6 = vld [vmem:[#allocation23_spill] sm:$0xff] }
 0x223   : > { %v1497_v30 = vadd.f32 %v1496_v62, %v4843_v21  ;;  %v1675_v5 = vpop.f32.mrf.mxu1 }
 0x224   : > { %4841 = vst [vmem:[#allocation16_spill] sm:$0xff] %v4382_v10  ;;  %v1498_v54 = vpop.f32.mrf.mxu0 }
 0x225   : > { %v4389_v39 = vadd.f32 %v1675_v5, %v1497_v30  ;;  %v1499_v33 = vadd.f32 %v1498_v54, %v1320_v40  ;;  %v1677_v24 = vpop.f32.mrf.mxu1 }
 0x227   : > { %4845 = vst [vmem:[#allocation18_spill] sm:$0xff] %v4389_v39  ;;  %v4391_v61 = vadd.f32 %v1677_v24, %v1499_v33  ;;  %v1502_v46 = vpop.f32.mrf.mxu0  ;;  %v4411_v33 = vrot.slane %v3475_v38, %v970_v41 }
 0x228   : > { %v1503_v36 = vadd.f32 %v1502_v46, %v4848_v15 }
 0x229   : > { %4846 = vst [vmem:[#allocation17_spill] sm:$0xff] %v4391_v61  ;;  %v1504_v16 = vpop.f32.mrf.mxu0  ;;  %v1681_v47 = vpop.f32.mrf.mxu1 }
 0x22a   : > { %v1505_v45 = vadd.f32 %v1504_v16, %v1326_v48  ;;  %v4397_v22 = vadd.f32 %v1681_v47, %v1503_v36 }
 0x22b   : > { %v1683_v25 = vpop.f32.mrf.mxu1 }
 0x22c   : > { %4850 = vst [vmem:[#allocation19_spill] sm:$0xff] %v4397_v22  ;;  %v4400_v57 = vadd.f32 %v1683_v25, %v1505_v45  ;;  %v1508_v17 = vpop.f32.mrf.mxu0 }
 0x22d   : > { %v1509_v62 = vadd.f32 %v1508_v17, %v4852_v6 }
 0x22e   : > { %4851 = vst [vmem:[#allocation21_spill] sm:$0xff] %v4400_v57  ;;  %v1510_v34 = vpop.f32.mrf.mxu0 }
 0x22f   : > { %v1687_v40 = vpop.f32.mrf.mxu1  ;;  %v1511_v30 = vadd.f32 %v1510_v34, %v1332_v44 }
 0x230   : > { %v4405_v21 = vadd.f32 %v1687_v40, %v1509_v62 }
 0x231   : > { %v1689_v5 = vpop.f32.mrf.mxu1 }
 0x232   : > { %4853 = vst [vmem:[#allocation20_spill] sm:$0xff] %v4405_v21  ;;  %v4409_v54 = vadd.f32 %v1689_v5, %v1511_v30  ;;  %v1758_v24 = vpop.f32.mrf.mxu0 }
 0x233   : > { %v1759_v63 = vadd.f32 %v1758_v24, %v4407_v56 }
 0x234   : > { %4854 = vst [vmem:[#allocation22_spill] sm:$0xff] %v4409_v54  ;;  %v1937_v46 = vpop.f32.mrf.mxu1  ;;  %v1760_v26 = vpop.f32.mrf.mxu0 }
 0x235   : > { %v4414_v48 = vadd.f32 %v1937_v46, %v1759_v63  ;;  %v1761_v15 = vadd.f32 %v1760_v26, %v4411_v33 }
 0x236   : > { %v1939_v36 = vpop.f32.mrf.mxu1 }
 0x237   : > { %v4417_v16 = vadd.f32 %v1939_v36, %v1761_v15  ;;  %v1764_v2 = vpop.f32.mrf.mxu0 }
 0x238   : > { %v1765_v1 = vadd.f32 %v1764_v2, %v4407_v56 }
 0x239   : > { %v1943_v47 = vpop.f32.mrf.mxu1  ;;  %v1766_v45 = vpop.f32.mrf.mxu0 }
 0x23a   : > { %v4420_v25 = vadd.f32 %v1943_v47, %v1765_v1  ;;  %v1767_v9 = vadd.f32 %v1766_v45, %v4411_v33 }
 0x23b   : > { %v1945_v17 = vpop.f32.mrf.mxu1 }
 0x23c   : > { %v4423_v44 = vadd.f32 %v1945_v17, %v1767_v9  ;;  %v1770_v6 = vpop.f32.mrf.mxu0 }
 0x23d   : > { %v1771_v62 = vadd.f32 %v1770_v6, %v4407_v56 }
 0x23e   : > { %v1772_v40 = vpop.f32.mrf.mxu0 }
 0x23f   : > { %v1949_v41 = vpop.f32.mrf.mxu1  ;;  %v1773_v30 = vadd.f32 %v1772_v40, %v4411_v33 }
 0x240   : > { %v4426_v34 = vadd.f32 %v1949_v41, %v1771_v62 }
 0x241   : > { %v1951_v38 = vpop.f32.mrf.mxu1 }
 0x242   : > { %v4429_v5 = vadd.f32 %v1951_v38, %v1773_v30  ;;  %v1776_v24 = vpop.f32.mrf.mxu0 }
 0x243   : > { %v1777_v63 = vadd.f32 %v1776_v24, %v4407_v56 }
 0x244   : > { %v1955_v46 = vpop.f32.mrf.mxu1  ;;  %v1778_v26 = vpop.f32.mrf.mxu0 }
 0x245   : > { %v4432_v15 = vadd.f32 %v1955_v46, %v1777_v63  ;;  %v1779_v36 = vadd.f32 %v1778_v26, %v4411_v33 }
 0x246   : > { %v1957_v2 = vpop.f32.mrf.mxu1 }
 0x247   : > { %v4435_v1 = vadd.f32 %v1957_v2, %v1779_v36  ;;  %v1782_v47 = vpop.f32.mrf.mxu0 }
 0x248   : > { %v1783_v45 = vadd.f32 %v1782_v47, %v4407_v56 }
 0x249   : > { %v1961_v9 = vpop.f32.mrf.mxu1  ;;  %v1784_v17 = vpop.f32.mrf.mxu0 }
 0x24a   : > { %v4438_v6 = vadd.f32 %v1961_v9, %v1783_v45  ;;  %v1785_v62 = vadd.f32 %v1784_v17, %v4411_v33 }
 0x24b   : > { %v1963_v41 = vpop.f32.mrf.mxu1 }
 0x24c   : > { %v4441_v40 = vadd.f32 %v1963_v41, %v1785_v62 }
 0x24d   : > { %v1788_v30 = vpop.f32.mrf.mxu0 }
 0x24e   : > { %v1789_v38 = vadd.f32 %v1788_v30, %v4407_v56 }
 0x24f   : > { %v1790_v24 = vpop.f32.mrf.mxu0  ;;  %v1967_v63 = vpop.f32.mrf.mxu1 }
 0x250   : > { %v1791_v46 = vadd.f32 %v1790_v24, %v4411_v33  ;;  %v4445_v26 = vadd.f32 %v1967_v63, %v1789_v38 }
 0x251   : > { %v1969_v36 = vpop.f32.mrf.mxu1 }
 0x252   : > { %v4447_v2 = vadd.f32 %v1969_v36, %v1791_v46  ;;  %v1794_v47 = vpop.f32.mrf.mxu0 }
 0x253   : > { %v1795_v45 = vadd.f32 %v1794_v47, %v4407_v56 }
 0x254   : > { %v1973_v9 = vpop.f32.mrf.mxu1  ;;  %v1796_v17 = vpop.f32.mrf.mxu0 }
 0x255   : > { %v4450_v54 = vadd.f32 %v1973_v9, %v1795_v45  ;;  %v1797_v62 = vadd.f32 %v1796_v17, %v4411_v33 }
 0x256   : > { %v1975_v41 = vpop.f32.mrf.mxu1 }
 0x257   : > { %v4453_v30 = vadd.f32 %v1975_v41, %v1797_v62  ;;  %v1800_v21 = vpop.f32.mrf.mxu0 }
 0x258   : > { %v1801_v24 = vadd.f32 %v1800_v21, %v4407_v56 }
 0x259   : > { %v1979_v38 = vpop.f32.mrf.mxu1  ;;  %v1802_v63 = vpop.f32.mrf.mxu0 }
 0x25a   : > { %v4456_v57 = vadd.f32 %v1979_v38, %v1801_v24  ;;  %v1803_v46 = vadd.f32 %v1802_v63, %v4411_v33 }
 0x25b   : > { %v1981_v36 = vpop.f32.mrf.mxu1 }
 0x25c   : > { %4855 = vst [vmem:[#allocation23_spill] sm:$0xff] %v4456_v57  ;;  %v4459_v47 = vadd.f32 %v1981_v36, %v1803_v46 }
 0x25d   : > { %v1806_v22 = vpop.f32.mrf.mxu0 }
 0x25e   : > { %4856 = vst [vmem:[#allocation27_spill] sm:$0xff] %v4459_v47  ;;  %v1807_v45 = vadd.f32 %v1806_v22, %v4407_v56 }
 0x25f   : > { %v1808_v9 = vpop.f32.mrf.mxu0  ;;  %v1985_v17 = vpop.f32.mrf.mxu1 }
 0x260   : > { %v1809_v62 = vadd.f32 %v1808_v9, %v4411_v33  ;;  %v4463_v41 = vadd.f32 %v1985_v17, %v1807_v45 }
 0x261   : > { %v1987_v61 = vpop.f32.mrf.mxu1 }
 0x262   : > { %4857 = vst [vmem:[#allocation28_spill] sm:$0xff] %v4463_v41  ;;  %v4465_v21 = vadd.f32 %v1987_v61, %v1809_v62  ;;  %v1812_v39 = vpop.f32.mrf.mxu0 }
 0x263   : > { %v1813_v24 = vadd.f32 %v1812_v39, %v4407_v56 }
 0x264   : > { %4858 = vst [vmem:[#allocation29_spill] sm:$0xff] %v4465_v21  ;;  %v1991_v38 = vpop.f32.mrf.mxu1  ;;  %v1814_v63 = vpop.f32.mrf.mxu0 }
 0x265   : > { %v4468_v10 = vadd.f32 %v1991_v38, %v1813_v24  ;;  %v1815_v46 = vadd.f32 %v1814_v63, %v4411_v33 }
 0x266   : > { %v1993_v36 = vpop.f32.mrf.mxu1 }
 0x267   : > { %4859 = vst [vmem:[#allocation30_spill] sm:$0xff] %v4468_v10  ;;  %v4471_v22 = vadd.f32 %v1993_v36, %v1815_v46 }
 0x268   : > { %v1818_v52 = vpop.f32.mrf.mxu0 }
 0x269   : > { %4860 = vst [vmem:[#allocation31_spill] sm:$0xff] %v4471_v22  ;;  %v1819_v9 = vadd.f32 %v1818_v52, %v4407_v56  ;;  %v1997_v45 = vpop.f32.mrf.mxu1 }
 0x26a   : > { %v1820_v17 = vpop.f32.mrf.mxu0 }
 0x26b   : > { %v4474_v41 = vadd.f32 %v1997_v45, %v1819_v9  ;;  %v1821_v61 = vadd.f32 %v1820_v17, %v4411_v33  ;;  %v1999_v62 = vpop.f32.mrf.mxu1 }
 0x26d   : > { %4861 = vst [vmem:[#allocation32_spill] sm:$0xff] %v4474_v41  ;;  %v4477_v39 = vadd.f32 %v1999_v62, %v1821_v61  ;;  %v1824_v21 = vpop.f32.mrf.mxu0 }
 0x26e   : > { %v1825_v24 = vadd.f32 %v1824_v21, %v4407_v56 }
 0x26f   : > { %4862 = vst [vmem:[#allocation33_spill] sm:$0xff] %v4477_v39  ;;  %v1826_v38 = vpop.f32.mrf.mxu0  ;;  %v2003_v63 = vpop.f32.mrf.mxu1 }
 0x270   : > { %v1827_v46 = vadd.f32 %v1826_v38, %v4411_v33  ;;  %v4481_v36 = vadd.f32 %v2003_v63, %v1825_v24 }
 0x271   : > { %v2005_v22 = vpop.f32.mrf.mxu1 }
 0x272   : > { %4863 = vst [vmem:[#allocation34_spill] sm:$0xff] %v4481_v36  ;;  %v4483_v52 = vadd.f32 %v2005_v22, %v1827_v46  ;;  %v1830_v10 = vpop.f32.mrf.mxu0 }
 0x273   : > { %v1831_v9 = vadd.f32 %v1830_v10, %v4407_v56  ;;  %v4868_v10 = vld [vmem:[#allocation14_spill] sm:$0xff] }
 0x274   : > { %4864 = vst [vmem:[#allocation35_spill] sm:$0xff] %v4483_v52  ;;  %v2009_v45 = vpop.f32.mrf.mxu1  ;;  %v1832_v17 = vpop.f32.mrf.mxu0  ;;  %v1045_v46 = vadd.f32 %v4868_v10, %v4171_v19 }
 0x275   : > { %v4486_v41 = vadd.f32 %v2009_v45, %v1831_v9  ;;  %v1833_v61 = vadd.f32 %v1832_v17, %v4411_v33 }
 0x276   : > { %v2011_v62 = vpop.f32.mrf.mxu1 }
 0x277   : > { %4865 = vst [vmem:[#allocation36_spill] sm:$0xff] %v4486_v41  ;;  %v4489_v21 = vadd.f32 %v2011_v62, %v1833_v61  ;;  %v4870_v62 = vld [vmem:[#allocation15_spill] sm:$0xff] }
 0x278   : > { %v1836_v39 = vpop.f32.mrf.mxu0 }
 0x279   : > { %4866 = vst [vmem:[#allocation37_spill] sm:$0xff] %v4489_v21  ;;  %v1837_v38 = vadd.f32 %v1836_v39, %v4407_v56  ;;  %v2015_v24 = vpop.f32.mrf.mxu1  ;;  %v1224_v21 = vadd.f32 %v4870_v62, %v1045_v46 }
 0x27a   : > { %v1838_v63 = vpop.f32.mrf.mxu0 }
 0x27b   : > { %v4492_v36 = vadd.f32 %v2015_v24, %v1837_v38  ;;  %v1839_v22 = vadd.f32 %v1838_v63, %v4411_v33  ;;  %v2017_v52 = vpop.f32.mrf.mxu1  ;;  %v4871_v38 = vld [vmem:[#allocation24_spill] sm:$0xff] }
 0x27c   : > { %v1403_v24 = vadd.f32 %v4871_v38, %v1224_v21 }
 0x27d   : > { %4867 = vst [vmem:[#allocation38_spill] sm:$0xff] %v4492_v36  ;;  %v4497_v9 = vadd.f32 %v2017_v52, %v1839_v22  ;;  %v1842_v45 = vpop.f32.mrf.mxu0 }
 0x27e   : > { %v1843_v17 = vadd.f32 %v1842_v45, %v4407_v56 }
 0x27f   : > { %4869 = vst [vmem:[#allocation14_spill] sm:$0xff] %v4497_v9  ;;  %v1844_v61 = vpop.f32.mrf.mxu0  ;;  %v2021_v41 = vpop.f32.mrf.mxu1  ;;  %v4872_v9 = vld [vmem:[#allocation26_spill] sm:$0xff] }
 0x280   : > { %v1845_v39 = vadd.f32 %v1844_v61, %v4411_v33  ;;  %v4502_v47 = vadd.f32 %v2021_v41, %v1843_v17  ;;  %v1582_v45 = vadd.f32 %v4872_v9, %v1403_v24  ;;  %v4873_v17 = vld [vmem:[#allocation25_spill] sm:$0xff] }
 0x281   : > { %v2023_v63 = vpop.f32.mrf.mxu1  ;;  %3095 = vtanh.f32 %v4873_v17 }
 0x282   : > { %v4505_v36 = vadd.f32 %v2023_v63, %v1845_v39  ;;  %v1848_v19 = vpop.f32.mrf.mxu0  ;;  %3097 = vtanh.f32 %v1582_v45 }
 0x283   : > { %v1849_v52 = vadd.f32 %v1848_v19, %v4407_v56  ;;  %3099 = vtanh.f32 %v4193_v42 }
 0x284   : > { %v1850_v10 = vpop.f32.mrf.mxu0  ;;  %3101 = vtanh.f32 %v4195_v50 }
 0x285   : > { %v2027_v22 = vpop.f32.mrf.mxu1  ;;  %v1851_v46 = vadd.f32 %v1850_v10, %v4411_v33  ;;  %3103 = vtanh.f32 %v4205_v20 }
 0x286   : > { %v4509_v57 = vadd.f32 %v2027_v22, %v1849_v52  ;;  %3105 = vtanh.f32 %v4209_v8 }
 0x287   : > { %v2029_v62 = vpop.f32.mrf.mxu1  ;;  %3107 = vtanh.f32 %v4218_v7 }
 0x288   : > { %v4512_v61 = vadd.f32 %v2029_v62, %v1851_v46  ;;  %v1854_v41 = vpop.f32.mrf.mxu0  ;;  %3109 = vtanh.f32 %v4222_v23 }
 0x289   : > { %v1855_v21 = vadd.f32 %v1854_v41, %v4407_v56  ;;  %v2033_v39 = vpop.f32.mrf.mxu1  ;;  %3111 = vtanh.f32 %v4232_v27 }
 0x28a   : > { %v1856_v38 = vpop.f32.mrf.mxu0  ;;  %3113 = vtanh.f32 %v4236_v31 }
 0x28b   : > { %v4517_v63 = vadd.f32 %v2033_v39, %v1855_v21  ;;  %v1857_v9 = vadd.f32 %v1856_v38, %v4411_v33  ;;  %v2035_v24 = vpop.f32.mrf.mxu1  ;;  %3115 = vtanh.f32 %v4246_v58 }
 0x28c   : > { %3117 = vtanh.f32 %v4250_v0 }
 0x28d   : > { %v4522_v19 = vadd.f32 %v2035_v24, %v1857_v9  ;;  %v1860_v52 = vpop.f32.mrf.mxu0  ;;  %3119 = vtanh.f32 %v4259_v51 }
 0x28e   : > { %v1861_v22 = vadd.f32 %v1860_v52, %v4407_v56  ;;  %v4539_v41 = vpop.eup %3095  ;;  %3121 = vtanh.f32 %v4263_v14 }
 0x28f   : > { %v1862_v10 = vpop.f32.mrf.mxu0  ;;  %v2039_v42 = vpop.f32.mrf.mxu1  ;;  %3123 = vtanh.f32 %v4272_v55 }
 0x290   : > { %v1863_v45 = vadd.f32 %v1862_v10, %v4411_v33  ;;  %v4530_v50 = vadd.f32 %v2039_v42, %v1861_v22  ;;  %v4545_v58 = vpop.eup %3097  ;;  %3125 = vtanh.f32 %v4276_v35 }
 0x291   : > { %v2041_v20 = vpop.f32.mrf.mxu1  ;;  %v4548_v0 = vpop.eup %3099  ;;  %3127 = vtanh.f32 %v4286_v4 }
 0x292   : > { %v4534_v8 = vadd.f32 %v2041_v20, %v1863_v45  ;;  %v1866_v46 = vpop.f32.mrf.mxu0  ;;  %3129 = vtanh.f32 %v4290_v11 }
 0x293   : > { %v1867_v7 = vadd.f32 %v1866_v46, %v4407_v56  ;;  %v4553_v56 = vpop.eup %3101  ;;  %3131 = vtanh.f32 %v4299_v37 }
 0x294   : > { %v1868_v62 = vpop.f32.mrf.mxu0  ;;  %v4556_v21 = vpop.eup %3103  ;;  %3133 = vtanh.f32 %v4303_v29 }
 0x295   : > { %v2045_v23 = vpop.f32.mrf.mxu1  ;;  %v1869_v31 = vadd.f32 %v1868_v62, %v4411_v33  ;;  %v4560_v39 = vpop.eup %3105  ;;  %3135 = vtanh.f32 %v4312_v12 }
 0x296   : > { %v4542_v27 = vadd.f32 %v2045_v23, %v1867_v7  ;;  %v4563_v35 = vpop.eup %3107  ;;  %3137 = vtanh.f32 %v4316_v60 }
 0x297   : > { %v2047_v17 = vpop.f32.mrf.mxu1  ;;  %v4567_v24 = vpop.eup %3109  ;;  %3139 = vtanh.f32 %v4326_v43 }
 0x298   : > { %v4551_v51 = vadd.f32 %v2047_v17, %v1869_v31  ;;  %v2116_v14 = vpop.f32.mrf.mxu0 }
 0x299   : > { %v2117_v33 = vadd.f32 %v2116_v14, %v4414_v48  ;;  %v4570_v48 = vpop.eup %3111 }
 0x29a   : > { %v2295_v55 = vpop.f32.mrf.mxu1  ;;  %v2118_v38 = vpop.f32.mrf.mxu0 }
 0x29b   : > { %v2296_v9 = vadd.f32 %v2295_v55, %v2117_v33  ;;  %v2119_v4 = vadd.f32 %v2118_v38, %v4417_v16  ;;  %v4574_v42 = vpop.eup %3113 }
 0x29c   : > { %v2297_v11 = vpop.f32.mrf.mxu1  ;;  %v2122_v52 = vpop.f32.mrf.mxu0 }
 0x29d   : > { %v2975_v37 = vmul.f32 -1.442695, %v2296_v9  ;;  %v2298_v22 = vadd.f32 %v2297_v11, %v2119_v4  ;;  %v2123_v10 = vadd.f32 %v2122_v52, %v4420_v25  ;;  %v4577_v45 = vpop.eup %3115 }
 0x29e   : > { %v2301_v29 = vpop.f32.mrf.mxu1  ;;  %v2124_v16 = vpop.f32.mrf.mxu0 }
 0x29f   : > { %3141 = vpow2.f32 %v2975_v37  ;;  %v2976_v12 = vmul.f32 -1.442695, %v2298_v22  ;;  %v2302_v20 = vadd.f32 %v2301_v29, %v2123_v10  ;;  %v2125_v46 = vadd.f32 %v2124_v16, %v4423_v44  ;;  %v4580_v7 = vpop.eup %3117 }
 0x2a0   : > { %3143 = vtanh.f32 %v4330_v18  ;;  %v2303_v60 = vpop.f32.mrf.mxu1  ;;  %v2128_v23 = vpop.f32.mrf.mxu0 }
 0x2a1   : > { %v4583_v25 = vpop.eup %3119  ;;  %3145 = vpow2.f32 %v2976_v12  ;;  %v2977_v62 = vmul.f32 -1.442695, %v2302_v20  ;;  %v2304_v43 = vadd.f32 %v2303_v60, %v2125_v46  ;;  %v2129_v31 = vadd.f32 %v2128_v23, %v4426_v34 }
 0x2a2   : > { %v4586_v17 = vpop.eup %3121  ;;  %3147 = vtanh.f32 %v4339_v3  ;;  %v2307_v14 = vpop.f32.mrf.mxu1 }
 0x2a3   : > { %v2130_v33 = vpop.f32.mrf.mxu0  ;;  %v4589_v44 = vpop.eup %3123  ;;  %3149 = vpow2.f32 %v2977_v62  ;;  %v2978_v55 = vmul.f32 -1.442695, %v2304_v43  ;;  %v2308_v18 = vadd.f32 %v2307_v14, %v2129_v31 }
 0x2a4   : > { %v2131_v38 = vadd.f32 %v2130_v33, %v4429_v5  ;;  %v4592_v9 = vpop.eup %3125  ;;  %3151 = vtanh.f32 %v4343_v13  ;;  %v2309_v4 = vpop.f32.mrf.mxu1 }
 0x2a5   : > { %v2134_v11 = vpop.f32.mrf.mxu0  ;;  %v4595_v34 = vpop.eup %3127  ;;  %3153 = vpow2.f32 %v2978_v55  ;;  %v2979_v52 = vmul.f32 -1.442695, %v2308_v18 }
 0x2a6   : > { %v2310_v3 = vadd.f32 %v2309_v4, %v2131_v38  ;;  %v2135_v37 = vadd.f32 %v2134_v11, %v4432_v15  ;;  %v4598_v22 = vpop.eup %3129  ;;  %3155 = vtanh.f32 %v4352_v53  ;;  %v2313_v10 = vpop.f32.mrf.mxu1 }
 0x2a7   : > { %v2136_v29 = vpop.f32.mrf.mxu0  ;;  %v4601_v5 = vpop.eup %3131  ;;  %3157 = vpow2.f32 %v2979_v52 }
 0x2a8   : > { %v2980_v16 = vmul.f32 -1.442695, %v2310_v3  ;;  %v2314_v13 = vadd.f32 %v2313_v10, %v2135_v37  ;;  %v2137_v12 = vadd.f32 %v2136_v29, %v4435_v1  ;;  %v4604_v20 = vpop.eup %3133  ;;  %3159 = vtanh.f32 %v4356_v49  ;;  %v2315_v46 = vpop.f32.mrf.mxu1 }
 0x2a9   : > { %v2140_v60 = vpop.f32.mrf.mxu0  ;;  %v4607_v15 = vpop.eup %3135 }
 0x2aa   : > { %3161 = vpow2.f32 %v2980_v16  ;;  %v2981_v23 = vmul.f32 -1.442695, %v2314_v13  ;;  %v2316_v53 = vadd.f32 %v2315_v46, %v2137_v12  ;;  %v2141_v62 = vadd.f32 %v2140_v60, %v4438_v6  ;;  %v4610_v43 = vpop.eup %3137  ;;  %v2319_v31 = vpop.f32.mrf.mxu1 }
 0x2ab   : > { %3163 = vtanh.f32 %v4366_v59  ;;  %v2142_v14 = vpop.f32.mrf.mxu0  ;;  %v4613_v1 = vpop.eup %3139 }
 0x2ac   : > { %3165 = vpow2.f32 %v2981_v23  ;;  %v2982_v33 = vmul.f32 -1.442695, %v2316_v53  ;;  %v2320_v49 = vadd.f32 %v2319_v31, %v2141_v62  ;;  %v2143_v55 = vadd.f32 %v2142_v14, %v4441_v40  ;;  %v3142_v18 = vpop.eup %3141  ;;  %v2321_v38 = vpop.f32.mrf.mxu1 }
 0x2ad   : > { %3167 = vtanh.f32 %v4370_v32  ;;  %v2146_v4 = vpop.f32.mrf.mxu0  ;;  %v4617_v11 = vpop.eup %3143  ;;  %v2560_v6 = vadd.f32 1.0, %v3142_v18 }
 0x2ae   : > { %3169 = vpow2.f32 %v2982_v33  ;;  %v2983_v52 = vmul.f32 -1.442695, %v2320_v49  ;;  %v2322_v59 = vadd.f32 %v2321_v38, %v2143_v55  ;;  %v3146_v3 = vpop.eup %3145  ;;  %v2147_v37 = vadd.f32 %v2146_v4, %v4445_v26  ;;  %v2325_v10 = vpop.f32.mrf.mxu1 }
 0x2af   : > { %3171 = vtanh.f32 %v4379_v28  ;;  %v2148_v29 = vpop.f32.mrf.mxu0  ;;  %v4621_v16 = vpop.eup %3147  ;;  %v2561_v40 = vadd.f32 1.0, %v3146_v3 }
 0x2b0   : > { %3173 = vrcp.f32 %v2560_v6  ;;  %v2984_v32 = vmul.f32 -1.442695, %v2322_v59  ;;  %v2149_v13 = vadd.f32 %v2148_v29, %v4447_v2  ;;  %v3150_v12 = vpop.eup %3149  ;;  %v2326_v46 = vadd.f32 %v2325_v10, %v2147_v37  ;;  %v2327_v60 = vpop.f32.mrf.mxu1  ;;  %v4875_v10 = vld [vmem:[#allocation23_spill] sm:$0xff] }
 0x2b1   : > { %3175 = vpow2.f32 %v2983_v52  ;;  %v2152_v23 = vpop.f32.mrf.mxu0  ;;  %v4624_v53 = vpop.eup %3151  ;;  %v2562_v28 = vadd.f32 1.0, %v3150_v12 }
 0x2b2   : > { %3177 = vrcp.f32 %v2561_v40  ;;  %v2328_v62 = vadd.f32 %v2327_v60, %v2149_v13  ;;  %v2153_v26 = vadd.f32 %v2152_v23, %v4450_v54  ;;  %v3154_v31 = vpop.eup %3153  ;;  %v2985_v14 = vmul.f32 -1.442695, %v2326_v46  ;;  %v2331_v33 = vpop.f32.mrf.mxu1 }
 0x2b3   : > { %3179 = vpow2.f32 %v2984_v32  ;;  %v2154_v49 = vpop.f32.mrf.mxu0  ;;  %v4627_v55 = vpop.eup %3155  ;;  %v2563_v2 = vadd.f32 1.0, %v3154_v31 }
 0x2b4   : > { %3181 = vrcp.f32 %v2562_v28  ;;  %v2986_v18 = vmul.f32 -1.442695, %v2328_v62  ;;  %v2332_v38 = vadd.f32 %v2331_v33, %v2153_v26  ;;  %v3158_v4 = vpop.eup %3157  ;;  %v2155_v6 = vadd.f32 %v2154_v49, %v4453_v30  ;;  %v2333_v52 = vpop.f32.mrf.mxu1  ;;  %v4877_v30 = vld [vmem:[#allocation27_spill] sm:$0xff] }
 0x2b5   : > { %3183 = vpow2.f32 %v2985_v14  ;;  %v2158_v59 = vpop.f32.mrf.mxu0  ;;  %v4630_v3 = vpop.eup %3159  ;;  %v2564_v54 = vadd.f32 1.0, %v3158_v4 }
 0x2b6   : > { %4874 = vst [vmem:[#allocation15_spill] sm:$0xff] %v4630_v3  ;;  %3185 = vrcp.f32 %v2563_v2  ;;  %v2987_v37 = vmul.f32 -1.442695, %v2332_v38  ;;  %v2159_v29 = vadd.f32 %v2158_v59, %v4875_v10  ;;  %v2334_v32 = vadd.f32 %v2333_v52, %v2155_v6  ;;  %v2337_v13 = vpop.f32.mrf.mxu1  ;;  %v2712_v38 = vld [vmem:[#allocation8] sm:$0x3]  ;;  %v4889_v3 = vld [vmem:[#allocation34_spill] sm:$0xff] }
 0x2b7   : > { %v3162_v40 = vpop.eup %3161  ;;  %3187 = vpow2.f32 %v2986_v18  ;;  %v2160_v12 = vpop.f32.mrf.mxu0  ;;  %v4879_v6 = vld [vmem:[#allocation28_spill] sm:$0xff] }
 0x2b8   : > { %v4633_v46 = vpop.eup %3163  ;;  %3189 = vrcp.f32 %v2564_v54  ;;  %v2565_v60 = vadd.f32 1.0, %v3162_v40  ;;  %v2338_v23 = vadd.f32 %v2337_v13, %v2159_v29  ;;  %v2161_v28 = vadd.f32 %v2160_v12, %v4877_v30  ;;  %v2339_v31 = vpop.f32.mrf.mxu1  ;;  %v4881_v40 = vld [vmem:[#allocation29_spill] sm:$0xff] }
 0x2b9   : > { %4876 = vst [vmem:[#allocation24_spill] sm:$0xff] %v4633_v46  ;;  %v3166_v62 = vpop.eup %3165  ;;  %3191 = vpow2.f32 %v2987_v37  ;;  %v2988_v26 = vmul.f32 -1.442695, %v2334_v32  ;;  %v2164_v14 = vpop.f32.mrf.mxu0  ;;  %v4882_v30 = vld [vmem:[#allocation13_spill] sm:$0xff]  ;;  %v4886_v46 = vld [vmem:[#allocation31_spill] sm:$0xff] }
 0x2ba   : > { %v4636_v33 = vpop.eup %3167  ;;  %3193 = vrcp.f32 %v2565_v60  ;;  %v2566_v49 = vadd.f32 1.0, %v3166_v62  ;;  %v2989_v2 = vmul.f32 -1.442695, %v2338_v23  ;;  %v2340_v18 = vadd.f32 %v2339_v31, %v2161_v28  ;;  %v2343_v59 = vpop.f32.mrf.mxu1 }
 0x2bb   : > { %4878 = vst [vmem:[#allocation26_spill] sm:$0xff] %v4636_v33  ;;  %v3170_v4 = vpop.eup %3169  ;;  %3195 = vpow2.f32 %v2988_v26  ;;  %v2165_v52 = vadd.f32 %v2164_v14, %v4879_v6  ;;  %v2166_v54 = vpop.f32.mrf.mxu0  ;;  %v4883_v28 = vsub.s32 0, %v4882_v30  ;;  %v4884_v14 = vld [vmem:[#allocation30_spill] sm:$0xff] }
 0x2bc   : > { %v4639_v10 = vpop.eup %3171  ;;  %3197 = vrcp.f32 %v2566_v49  ;;  %v2567_v37 = vadd.f32 1.0, %v3170_v4  ;;  %v2990_v29 = vmul.f32 -1.442695, %v2340_v18  ;;  %v2167_v32 = vadd.f32 %v2166_v54, %v4881_v40  ;;  %v2345_v60 = vpop.f32.mrf.mxu1 }
 0x2bd   : > { %4880 = vst [vmem:[#allocation25_spill] sm:$0xff] %v4639_v10  ;;  %v3174_v13 = vpop.eup %3173  ;;  %3199 = vpow2.f32 %v2989_v2  ;;  %v2344_v12 = vadd.f32 %v2343_v59, %v2165_v52  ;;  %v2170_v23 = vpop.f32.mrf.mxu0  ;;  %v4644_v62 = vrot.slane %v2712_v38, %v4883_v28  ;;  %v4885_v52 = vsub.s32 1, %v4882_v30 }
 0x2be   : > { %v3176_v26 = vpop.eup %3175  ;;  %3201 = vrcp.f32 %v2567_v37  ;;  %v2346_v31 = vadd.f32 %v2345_v60, %v2167_v32  ;;  %v2171_v6 = vadd.f32 %v2170_v23, %v4884_v14  ;;  %v2674_v49 = vmul.f32 %v3174_v13, %v4539_v41  ;;  %v2349_v40 = vpop.f32.mrf.mxu1 }
 0x2bf   : > { %v3178_v4 = vpop.eup %3177  ;;  %v2568_v18 = vadd.f32 1.0, %v3176_v26  ;;  %3203 = vpow2.f32 %v2990_v29  ;;  %v2991_v54 = vmul.f32 -1.442695, %v2344_v12  ;;  %v2172_v2 = vpop.f32.mrf.mxu0  ;;  %v4650_v59 = vrot.slane %v2712_v38, %v4885_v52  ;;  %v4887_v38 = vld [vmem:[#allocation32_spill] sm:$0xff] }
 0x2c0   : > { %v3180_v10 = vpop.eup %3179  ;;  %v2992_v28 = vmul.f32 -1.442695, %v2346_v31  ;;  %v2350_v33 = vadd.f32 %v2349_v40, %v2171_v6  ;;  %v2173_v37 = vadd.f32 %v2172_v2, %v4886_v46  ;;  %v2675_v32 = vmul.f32 %v3178_v4, %v4545_v58  ;;  %v2351_v13 = vpop.f32.mrf.mxu1 }
 0x2c1   : > { %v3182_v60 = vpop.eup %3181  ;;  %3205 = vrcp.f32 %v2568_v18  ;;  %v2569_v41 = vadd.f32 1.0, %v3180_v10  ;;  %v2176_v23 = vpop.f32.mrf.mxu0  ;;  %v2724_v29 = vmul.f32 %v4644_v62, %v2674_v49  ;;  %v4888_v49 = vld [vmem:[#allocation33_spill] sm:$0xff] }
 0x2c2   : > { %v3184_v12 = vpop.eup %3183  ;;  %3207 = vpow2.f32 %v2991_v54  ;;  %v2993_v26 = vmul.f32 -1.442695, %v2350_v33  ;;  %v2352_v30 = vadd.f32 %v2351_v13, %v2173_v37  ;;  %v2177_v14 = vadd.f32 %v2176_v23, %v4887_v38  ;;  %v2355_v6 = vpop.f32.mrf.mxu1 }
 0x2c3   : > { %v3186_v52 = vpop.eup %3185  ;;  %3209 = vrcp.f32 %v2569_v41  ;;  %v2570_v31 = vadd.f32 1.0, %v3184_v12  ;;  %v2178_v46 = vpop.f32.mrf.mxu0  ;;  %v2725_v58 = vmul.f32 %v4650_v59, %v2675_v32  ;;  %v2676_v4 = vmul.f32 %v3182_v60, %v4548_v0 }
 0x2c4   : > { %v3188_v10 = vpop.eup %3187  ;;  %3211 = vpow2.f32 %v2992_v28  ;;  %v2994_v18 = vmul.f32 -1.442695, %v2352_v30  ;;  %v2356_v40 = vadd.f32 %v2355_v6, %v2177_v14  ;;  %v2179_v2 = vadd.f32 %v2178_v46, %v4888_v49  ;;  %v2357_v37 = vpop.f32.mrf.mxu1 }
 0x2c5   : > { %v3190_v54 = vpop.eup %3189  ;;  %3213 = vrcp.f32 %v2570_v31  ;;  %v2571_v33 = vadd.f32 1.0, %v3188_v10  ;;  %v2182_v13 = vpop.f32.mrf.mxu0  ;;  %v2762_v23 = vadd.f32 %v2725_v58, %v2724_v29  ;;  %v2677_v41 = vmul.f32 %v3186_v52, %v4553_v56  ;;  %v4890_v52 = vld [vmem:[#allocation35_spill] sm:$0xff] }
 0x2c6   : > { %v3192_v12 = vpop.eup %3191  ;;  %3215 = vpow2.f32 %v2993_v26  ;;  %v2995_v38 = vmul.f32 -1.442695, %v2356_v40  ;;  %v2358_v32 = vadd.f32 %v2357_v37, %v2179_v2  ;;  %v2183_v0 = vadd.f32 %v2182_v13, %v4889_v3  ;;  %v2361_v30 = vpop.f32.mrf.mxu1  ;;  %v4891_v13 = vld [vmem:[#allocation36_spill] sm:$0xff] }
 0x2c7   : > { %v3194_v60 = vpop.eup %3193  ;;  %3217 = vrcp.f32 %v2571_v33  ;;  %v2572_v28 = vadd.f32 1.0, %v3192_v12  ;;  %2763 = vadd.xlane.f32.xlu0 %v2762_v23  ;;  %v2184_v14 = vpop.f32.mrf.mxu0  ;;  %v2726_v31 = vmul.f32 %v4644_v62, %v2676_v4  ;;  %v2727_v6 = vmul.f32 %v4650_v59, %v2677_v41 }
 0x2c8   : > { %v3196_v46 = vpop.eup %3195  ;;  %3219 = vpow2.f32 %v2994_v18  ;;  %v2996_v29 = vmul.f32 -1.442695, %v2358_v32  ;;  %v2362_v56 = vadd.f32 %v2361_v30, %v2183_v0  ;;  %v2185_v26 = vadd.f32 %v2184_v14, %v4890_v52  ;;  %v2363_v3 = vpop.f32.mrf.mxu1 }
 0x2c9   : > { %v3198_v58 = vpop.eup %3197  ;;  %3221 = vrcp.f32 %v2572_v28  ;;  %v2573_v10 = vadd.f32 1.0, %v3196_v46  ;;  %v2188_v40 = vpop.f32.mrf.mxu0  ;;  %v2765_v49 = vadd.f32 %v2727_v6, %v2726_v31  ;;  %v2678_v2 = vmul.f32 %v3190_v54, %v4556_v21  ;;  %v4892_v54 = vld [vmem:[#allocation37_spill] sm:$0xff] }
 0x2ca   : > { %v3200_v33 = vpop.eup %3199  ;;  %3223 = vpow2.f32 %v2995_v38  ;;  %v2997_v37 = vmul.f32 -1.442695, %v2362_v56  ;;  %v2364_v4 = vadd.f32 %v2363_v3, %v2185_v26  ;;  %v2189_v23 = vadd.f32 %v2188_v40, %v4891_v13  ;;  %v2367_v12 = vpop.f32.mrf.mxu1 }
 0x2cb   : > { %v3202_v41 = vpop.eup %3201  ;;  %3225 = vrcp.f32 %v2573_v10  ;;  %v2574_v18 = vadd.f32 1.0, %v3200_v33  ;;  %2766 = vadd.xlane.f32.xlu0 %v2765_v49  ;;  %v2190_v32 = vpop.f32.mrf.mxu0  ;;  %v2679_v0 = vmul.f32 %v3194_v60, %v4560_v39  ;;  %v2728_v28 = vmul.f32 %v4644_v62, %v2678_v2  ;;  %v4893_v60 = vld [vmem:[#allocation38_spill] sm:$0xff] }
 0x2cc   : > { %v3204_v30 = vpop.eup %3203  ;;  %3227 = vpow2.f32 %v2996_v29  ;;  %v2998_v14 = vmul.f32 -1.442695, %v2364_v4  ;;  %v2368_v21 = vadd.f32 %v2367_v12, %v2189_v23  ;;  %v2191_v38 = vadd.f32 %v2190_v32, %v4892_v54  ;;  %v2369_v6 = vpop.f32.mrf.mxu1 }
 0x2cd   : > { %3229 = vrcp.f32 %v2574_v18  ;;  %v2575_v31 = vadd.f32 1.0, %v3204_v30  ;;  %v2194_v46 = vpop.f32.mrf.mxu0  ;;  %v2729_v56 = vmul.f32 %v4650_v59, %v2679_v0  ;;  %v2680_v52 = vmul.f32 %v3198_v58, %v4563_v35 }
 0x2ce   : > { %v3206_v26 = vpop.eup %3205  ;;  %3231 = vpow2.f32 %v2997_v37  ;;  %v2999_v10 = vmul.f32 -1.442695, %v2368_v21  ;;  %v2370_v39 = vadd.f32 %v2369_v6, %v2191_v38  ;;  %v2195_v3 = vadd.f32 %v2194_v46, %v4893_v60  ;;  %v2373_v29 = vpop.f32.mrf.mxu1  ;;  %v4894_v37 = vld [vmem:[#allocation14_spill] sm:$0xff] }
 0x2cf   : > { %v3208_v40 = vpop.eup %3207  ;;  %3233 = vrcp.f32 %v2575_v31  ;;  %v2768_v49 = vadd.f32 %v2729_v56, %v2728_v28  ;;  %v2196_v2 = vpop.f32.mrf.mxu0  ;;  %v2681_v33 = vmul.f32 %v3202_v41, %v4567_v24  ;;  %v2730_v4 = vmul.f32 %v4644_v62, %v2680_v52 }
 0x2d0   : > { %v3210_v13 = vpop.eup %3209  ;;  %v2576_v23 = vadd.f32 1.0, %v3208_v40  ;;  %3235 = vpow2.f32 %v2998_v14  ;;  %v3000_v18 = vmul.f32 -1.442695, %v2370_v39  ;;  %v2374_v35 = vadd.f32 %v2373_v29, %v2195_v3  ;;  %v2375_v32 = vpop.f32.mrf.mxu1 }
 0x2d1   : > { %v3212_v58 = vpop.eup %3211  ;;  %3237 = vpow2.f32 %v2999_v10  ;;  %2769 = vadd.xlane.f32.xlu1 %v2768_v49  ;;  %v2197_v12 = vadd.f32 %v2196_v2, %v4894_v37  ;;  %v2200_v0 = vpop.f32.mrf.mxu0  ;;  %v2731_v30 = vmul.f32 %v4650_v59, %v2681_v33  ;;  %v2682_v28 = vmul.f32 %v3206_v26, %v4570_v48 }
 0x2d2   : > { %v3214_v21 = vpop.eup %3213  ;;  %3239 = vrcp.f32 %v2576_v23  ;;  %v2577_v24 = vadd.f32 1.0, %v3212_v58  ;;  %v3001_v41 = vmul.f32 -1.442695, %v2374_v35  ;;  %v2201_v54 = vadd.f32 %v2200_v0, %v4502_v47  ;;  %v2379_v31 = vpop.f32.mrf.mxu1 }
 0x2d3   : > { %v3216_v14 = vpop.eup %3215  ;;  %3241 = vpow2.f32 %v3000_v18  ;;  %v2376_v38 = vadd.f32 %v2375_v32, %v2197_v12  ;;  %v2771_v6 = vadd.f32 %v2731_v30, %v2730_v4  ;;  %v2202_v46 = vpop.f32.mrf.mxu0  ;;  %v2683_v56 = vmul.f32 %v3210_v13, %v4574_v42 }
 0x2d4   : > { %v3218_v52 = vpop.eup %3217  ;;  %3243 = vrcp.f32 %v2577_v24  ;;  %v2578_v10 = vadd.f32 1.0, %v3216_v14  ;;  %v2380_v39 = vadd.f32 %v2379_v31, %v2201_v54  ;;  %v2203_v48 = vadd.f32 %v2202_v46, %v4505_v36  ;;  %v2381_v3 = vpop.f32.mrf.mxu1 }
 0x2d5   : > { %v3220_v26 = vpop.eup %3219  ;;  %3245 = vpow2.f32 %v3001_v41  ;;  %v3002_v60 = vmul.f32 -1.442695, %v2376_v38  ;;  %2772 = vadd.xlane.f32.xlu1 %v2771_v6  ;;  %v2206_v47 = vpop.f32.mrf.mxu0  ;;  %v2732_v40 = vmul.f32 %v4644_v62, %v2682_v28  ;;  %v2733_v29 = vmul.f32 %v4650_v59, %v2683_v56 }
 0x2d6   : > { %v3222_v49 = vpop.eup %3221  ;;  %3247 = vrcp.f32 %v2578_v10  ;;  %v2579_v2 = vadd.f32 1.0, %v3220_v26  ;;  %v3003_v42 = vmul.f32 -1.442695, %v2380_v39  ;;  %v2382_v33 = vadd.f32 %v2381_v3, %v2203_v48  ;;  %v2385_v36 = vpop.f32.mrf.mxu1 }
 0x2d7   : > { %v3224_v4 = vpop.eup %3223  ;;  %3249 = vpow2.f32 %v3002_v60  ;;  %v2207_v13 = vadd.f32 %v2206_v47, %v4509_v57  ;;  %v2774_v23 = vadd.f32 %v2733_v29, %v2732_v40  ;;  %v2208_v18 = vpop.f32.mrf.mxu0  ;;  %v2684_v35 = vmul.f32 %v3214_v21, %v4577_v45 }
 0x2d8   : > { %v3226_v58 = vpop.eup %3225  ;;  %3251 = vrcp.f32 %v2579_v2  ;;  %v2580_v37 = vadd.f32 1.0, %v3224_v4  ;;  %v3004_v12 = vmul.f32 -1.442695, %v2382_v33  ;;  %v2209_v32 = vadd.f32 %v2208_v18, %v4512_v61  ;;  %v2387_v28 = vpop.f32.mrf.mxu1 }
 0x2d9   : > { %v3228_v0 = vpop.eup %3227  ;;  %3253 = vpow2.f32 %v3003_v42  ;;  %v2386_v30 = vadd.f32 %v2385_v36, %v2207_v13  ;;  %2775 = vadd.xlane.f32.xlu0 %v2774_v23  ;;  %v2212_v24 = vpop.f32.mrf.mxu0  ;;  %v2685_v41 = vmul.f32 %v3218_v52, %v4580_v7  ;;  %v2734_v57 = vmul.f32 %v4644_v62, %v2684_v35 }
 0x2da   : > { %v3230_v54 = vpop.eup %3229  ;;  %3255 = vrcp.f32 %v2580_v37  ;;  %v2581_v14 = vadd.f32 1.0, %v3228_v0  ;;  %v2388_v45 = vadd.f32 %v2387_v28, %v2209_v32  ;;  %v2213_v21 = vadd.f32 %v2212_v24, %v4517_v63  ;;  %v2391_v61 = vpop.f32.mrf.mxu1 }
 0x2db   : > { %v3232_v38 = vpop.eup %3231  ;;  %3257 = vpow2.f32 %v3004_v12  ;;  %v3005_v31 = vmul.f32 -1.442695, %v2386_v30  ;;  %v2735_v6 = vmul.f32 %v4650_v59, %v2685_v41  ;;  %v2214_v46 = vpop.f32.mrf.mxu0  ;;  %v2686_v56 = vmul.f32 %v3222_v49, %v4583_v25 }
 0x2dc   : > { %v3234_v10 = vpop.eup %3233  ;;  %3259 = vrcp.f32 %v2581_v14  ;;  %v2582_v7 = vadd.f32 1.0, %v3232_v38  ;;  %v3006_v52 = vmul.f32 -1.442695, %v2388_v45  ;;  %v2392_v39 = vadd.f32 %v2391_v61, %v2213_v21  ;;  %v2393_v63 = vpop.f32.mrf.mxu1 }
 0x2dd   : > { %v3236_v48 = vpop.eup %3235  ;;  %3261 = vpow2.f32 %v3005_v31  ;;  %v2777_v26 = vadd.f32 %v2735_v6, %v2734_v57  ;;  %v2215_v60 = vadd.f32 %v2214_v46, %v4522_v19  ;;  %v2218_v3 = vpop.f32.mrf.mxu0  ;;  %v2687_v47 = vmul.f32 %v3226_v58, %v4586_v17 }
 0x2de   : > { %v3238_v40 = vpop.eup %3237  ;;  %3263 = vrcp.f32 %v2582_v7  ;;  %v2583_v29 = vadd.f32 1.0, %v3236_v48  ;;  %v3007_v2 = vmul.f32 -1.442695, %v2392_v39  ;;  %v2219_v25 = vadd.f32 %v2218_v3, %v4530_v50  ;;  %v2397_v4 = vpop.f32.mrf.mxu1 }
 0x2df   : > { %v3240_v49 = vpop.eup %3239  ;;  %v2584_v42 = vadd.f32 1.0, %v3238_v40  ;;  %3265 = vpow2.f32 %v3006_v52  ;;  %2778 = vadd.xlane.f32.xlu1 %v2777_v26  ;;  %v2394_v33 = vadd.f32 %v2393_v63, %v2215_v60  ;;  %v2736_v13 = vmul.f32 %v4644_v62, %v2686_v56  ;;  %v2220_v36 = vpop.f32.mrf.mxu0 }
 0x2e0   : > { %v3242_v19 = vpop.eup %3241  ;;  %3267 = vrcp.f32 %v2583_v29  ;;  %v2398_v23 = vadd.f32 %v2397_v4, %v2219_v25  ;;  %v2737_v17 = vmul.f32 %v4650_v59, %v2687_v47  ;;  %v2221_v18 = vadd.f32 %v2220_v36, %v4534_v8  ;;  %v2399_v37 = vpop.f32.mrf.mxu1 }
 0x2e1   : > { %v3244_v35 = vpop.eup %3243  ;;  %3269 = vrcp.f32 %v2584_v42  ;;  %v2585_v58 = vadd.f32 1.0, %v3242_v19  ;;  %v3008_v50 = vmul.f32 -1.442695, %v2394_v33  ;;  %v2224_v12 = vpop.f32.mrf.mxu0  ;;  %v2688_v32 = vmul.f32 %v3230_v54, %v4589_v44 }
 0x2e2   : > { %v3246_v0 = vpop.eup %3245  ;;  %3271 = vpow2.f32 %v3007_v2  ;;  %v3009_v30 = vmul.f32 -1.442695, %v2398_v23  ;;  %v2780_v28 = vadd.f32 %v2737_v17, %v2736_v13  ;;  %v2400_v24 = vadd.f32 %v2399_v37, %v2221_v18  ;;  %v2403_v45 = vpop.f32.mrf.mxu1 }
 0x2e3   : > { %v3248_v41 = vpop.eup %3247  ;;  %3273 = vrcp.f32 %v2585_v58  ;;  %v2586_v57 = vadd.f32 1.0, %v3246_v0  ;;  %v2225_v14 = vadd.f32 %v2224_v12, %v4542_v27  ;;  %v2689_v8 = vmul.f32 %v3234_v10, %v4592_v9  ;;  %v2226_v21 = vpop.f32.mrf.mxu0 }
 0x2e4   : > { %v3250_v38 = vpop.eup %3249  ;;  %3275 = vpow2.f32 %v3008_v50  ;;  %2781 = vadd.xlane.f32.xlu0 %v2780_v28  ;;  %v3010_v31 = vmul.f32 -1.442695, %v2400_v24  ;;  %v2738_v44 = vmul.f32 %v4644_v62, %v2688_v32  ;;  %v2227_v54 = vadd.f32 %v2226_v21, %v4551_v51  ;;  %v2405_v7 = vpop.f32.mrf.mxu1  ;;  %v4896_v24 = vld [vmem:[#allocation18_spill] sm:$0xff] }
 0x2e5   : > { %v3252_v61 = vpop.eup %3251  ;;  %3277 = vrcp.f32 %v2586_v57  ;;  %v2587_v6 = vadd.f32 1.0, %v3250_v38  ;;  %v2404_v46 = vadd.f32 %v2403_v45, %v2225_v14  ;;  %v2739_v56 = vmul.f32 %v4650_v59, %v2689_v8  ;;  %v4897_v8 = vld [vmem:[#allocation17_spill] sm:$0xff] }
 0x2e6   : > { %v3254_v27 = vpop.eup %3253  ;;  %3279 = vpow2.f32 %v3009_v30  ;;  %v2406_v52 = vadd.f32 %v2405_v7, %v2227_v54  ;;  %v2690_v9 = vmul.f32 %v3240_v49, %v4595_v34  ;;  %v2691_v10 = vmul.f32 %v3244_v35, %v4598_v22  ;;  %v4895_v35 = vld [vmem:[#allocation16_spill] sm:$0xff] }
 0x2e7   : > { %v3256_v39 = vpop.eup %3255  ;;  %3281 = vrcp.f32 %v2587_v6  ;;  %v2588_v48 = vadd.f32 1.0, %v3254_v27  ;;  %v3011_v26 = vmul.f32 -1.442695, %v2404_v46  ;;  %v2783_v60 = vadd.f32 %v2739_v56, %v2738_v44  ;;  %v4899_v6 = vld [vmem:[#allocation15_spill] sm:$0xff] }
 0x2e8   : > { %v3258_v51 = vpop.eup %3257  ;;  %3283 = vpow2.f32 %v3010_v31  ;;  %v3012_v63 = vmul.f32 -1.442695, %v2406_v52  ;;  %v2740_v3 = vmul.f32 %v4644_v62, %v2690_v9  ;;  %v2741_v47 = vmul.f32 %v4650_v59, %v2691_v10  ;;  %v4900_v52 = vld [vmem:[#allocation21_spill] sm:$0xff]  ;;  %v4901_v10 = vld [vmem:[#allocation24_spill] sm:$0xff] }
 0x2e9   : > { %v3260_v40 = vpop.eup %3259  ;;  %3285 = vrcp.f32 %v2588_v48  ;;  %v2589_v29 = vadd.f32 1.0, %v3258_v51  ;;  %2784 = vadd.xlane.f32.xlu1 %v2783_v60  ;;  %v2692_v34 = vmul.f32 %v3248_v41, %v4601_v5  ;;  %v2693_v22 = vmul.f32 %v3252_v61, %v4604_v20  ;;  %v4898_v61 = vld [vmem:[#allocation19_spill] sm:$0xff]  ;;  %v4902_v51 = vld [vmem:[#allocation20_spill] sm:$0xff] }
 0x2ea   : > { %v3262_v2 = vpop.eup %3261  ;;  %3287 = vpow2.f32 %v3011_v26  ;;  %v2786_v25 = vadd.f32 %v2741_v47, %v2740_v3  ;;  %v2694_v49 = vmul.f32 %v3256_v39, %v4607_v15  ;;  %v2695_v42 = vmul.f32 %v3260_v40, %v4610_v43  ;;  %v4903_v3 = vld [vmem:[#allocation26_spill] sm:$0xff] }
 0x2eb   : > { %v3264_v33 = vpop.eup %3263  ;;  %3289 = vrcp.f32 %v2589_v29  ;;  %v2590_v4 = vadd.f32 1.0, %v3262_v2  ;;  %v2742_v13 = vmul.f32 %v4644_v62, %v2692_v34  ;;  %v2743_v36 = vmul.f32 %v4650_v59, %v2693_v22  ;;  %v4904_v22 = vld [vmem:[#allocation22_spill] sm:$0xff] }
 0x2ec   : > { %v3266_v19 = vpop.eup %3265  ;;  %3291 = vpow2.f32 %v3012_v63  ;;  %2787 = vadd.xlane.f32.xlu0 %v2786_v25  ;;  %v2744_v5 = vmul.f32 %v4644_v62, %v2694_v49  ;;  %v2745_v20 = vmul.f32 %v4650_v59, %v2695_v42  ;;  %v2696_v23 = vmul.f32 %v3264_v33, %v4613_v1  ;;  %v4905_v49 = vld [vmem:[#allocation25_spill] sm:$0xff] }
 0x2ed   : > { %v3268_v17 = vpop.eup %3267  ;;  %3293 = vrcp.f32 %v2590_v4  ;;  %v2591_v15 = vadd.f32 1.0, %v3266_v19  ;;  %v2789_v43 = vadd.f32 %v2743_v36, %v2742_v13 }
 0x2ee   : > { %v3270_v18 = vpop.eup %3269  ;;  %3295 = vtanh.f32 %v4895_v35  ;;  %v2792_v58 = vadd.f32 %v2745_v20, %v2744_v5  ;;  %v2697_v50 = vmul.f32 %v3268_v17, %v4617_v11  ;;  %v2746_v1 = vmul.f32 %v4644_v62, %v2696_v23 }
 0x2ef   : > { %v3272_v37 = vpop.eup %3271  ;;  %3297 = vrcp.f32 %v2591_v15  ;;  %2790 = vadd.xlane.f32.xlu1 %v2789_v43  ;;  %v2698_v12 = vmul.f32 %v3270_v18, %v4621_v16 }
 0x2f0   : > { %v3274_v32 = vpop.eup %3273  ;;  %v2592_v0 = vadd.f32 1.0, %v3272_v37  ;;  %2793 = vadd.xlane.f32.xlu0 %v2792_v58  ;;  %v2747_v30 = vmul.f32 %v4650_v59, %v2697_v50  ;;  %3299 = vtanh.f32 %v4896_v24 }
 0x2f1   : > { %v3276_v28 = vpop.eup %3275  ;;  %v2699_v41 = vmul.f32 %v3274_v32, %v4624_v53  ;;  %v2748_v16 = vmul.f32 %v4644_v62, %v2698_v12 }
 0x2f2   : > { %v3278_v57 = vpop.eup %3277  ;;  %3301 = vrcp.f32 %v2592_v0  ;;  %v2593_v11 = vadd.f32 1.0, %v3276_v28  ;;  %v2795_v14 = vadd.f32 %v2747_v30, %v2746_v1 }
 0x2f3   : > { %v3280_v45 = vpop.eup %3279  ;;  %3303 = vtanh.f32 %v4897_v8  ;;  %v2749_v21 = vmul.f32 %v4650_v59, %v2699_v41  ;;  %v2700_v38 = vmul.f32 %v3278_v57, %v4627_v55 }
 0x2f4   : > { %v3282_v31 = vpop.eup %3281  ;;  %3305 = vrcp.f32 %v2593_v11  ;;  %v2594_v44 = vadd.f32 1.0, %v3280_v45  ;;  %2796 = vadd.xlane.f32.xlu1 %v2795_v14 }
 0x2f5   : > { %v3284_v54 = vpop.eup %3283  ;;  %3307 = vtanh.f32 %v4898_v61  ;;  %v2798_v53 = vadd.f32 %v2749_v21, %v2748_v16  ;;  %v2701_v46 = vmul.f32 %v3282_v31, %v4899_v6  ;;  %v2750_v9 = vmul.f32 %v4644_v62, %v2700_v38 }
 0x2f6   : > { %v3286_v56 = vpop.eup %3285  ;;  %3309 = vrcp.f32 %v2594_v44  ;;  %v2595_v7 = vadd.f32 1.0, %v3284_v54  ;;  %v3013_v44 = vld [vmem:[#allocation2] ss:$0 sm:$0xff] }
 0x2f7   : > { %v3288_v27 = vpop.eup %3287  ;;  %3311 = vtanh.f32 %v4900_v52  ;;  %2799 = vadd.xlane.f32.xlu0 %v2798_v53  ;;  %v2751_v55 = vmul.f32 %v4650_v59, %v2701_v46  ;;  %v2702_v39 = vmul.f32 %v3286_v56, %v4901_v10 }
 0x2f8   : > { %v3290_v48 = vpop.eup %3289  ;;  %3313 = vrcp.f32 %v2595_v7  ;;  %v2596_v26 = vadd.f32 1.0, %v3288_v27 }
 0x2f9   : > { %v3292_v60 = vpop.eup %3291  ;;  %3315 = vtanh.f32 %v4902_v51  ;;  %v2801_v63 = vadd.f32 %v2751_v55, %v2750_v9  ;;  %v2703_v47 = vmul.f32 %v3290_v48, %v4903_v3  ;;  %v2752_v2 = vmul.f32 %v4644_v62, %v2702_v39 }
 0x2fa   : > { %v3294_v40 = vpop.eup %3293  ;;  %3317 = vrcp.f32 %v2596_v26  ;;  %v2597_v29 = vadd.f32 1.0, %v3292_v60 }
 0x2fb   : > { %v3296_v34 = vpop.eup %3295  ;;  %3319 = vtanh.f32 %v4904_v22  ;;  %2802 = vadd.xlane.f32.xlu1 %v2801_v63  ;;  %v2753_v25 = vmul.f32 %v4650_v59, %v2703_v47  ;;  %v2704_v42 = vmul.f32 %v3294_v40, %v4905_v49 }
 0x2fc   : > { %v3298_v33 = vpop.eup %3297  ;;  %3321 = vrcp.f32 %v2597_v29 }
 0x2fd   : > { %v2804_v4 = vadd.f32 %v2753_v25, %v2752_v2  ;;  %v2705_v13 = vmul.f32 %v3298_v33, %v3296_v34  ;;  %v3300_v36 = vpop.eup %3299  ;;  %v2754_v5 = vmul.f32 %v4644_v62, %v2704_v42 }
 0x2ff   : > { %v3302_v19 = vpop.eup %3301  ;;  %2805 = vadd.xlane.f32.xlu0 %v2804_v4  ;;  %v2755_v20 = vmul.f32 %v4650_v59, %v2705_v13 }
 0x300   : > { %v3304_v23 = vpop.eup %3303  ;;  %v2706_v17 = vmul.f32 %v3302_v19, %v3300_v36 }
 0x301   : > { %v3306_v15 = vpop.eup %3305  ;;  %v2807_v43 = vadd.f32 %v2755_v20, %v2754_v5 }
 0x302   : > { %v3308_v18 = vpop.eup %3307  ;;  %v2707_v35 = vmul.f32 %v3306_v15, %v3304_v23  ;;  %v2756_v37 = vmul.f32 %v4644_v62, %v2706_v17 }
 0x303   : > { %v3310_v58 = vpop.eup %3309  ;;  %2808 = vadd.xlane.f32.xlu1 %v2807_v43 }
 0x304   : > { %v3312_v50 = vpop.eup %3311  ;;  %v2757_v12 = vmul.f32 %v4650_v59, %v2707_v35  ;;  %v2708_v32 = vmul.f32 %v3310_v58, %v3308_v18 }
 0x305   : > { %v3314_v0 = vpop.eup %3313 }
 0x306   : > { %v3316_v1 = vpop.eup %3315  ;;  %v2810_v30 = vadd.f32 %v2757_v12, %v2756_v37  ;;  %v2709_v28 = vmul.f32 %v3314_v0, %v3312_v50  ;;  %v2758_v57 = vmul.f32 %v4644_v62, %v2708_v32 }
 0x307   : > { %v3318_v24 = vpop.eup %3317 }
 0x308   : > { %v3320_v41 = vpop.eup %3319  ;;  %2811 = vadd.xlane.f32.xlu0 %v2810_v30  ;;  %v2759_v11 = vmul.f32 %v4650_v59, %v2709_v28  ;;  %v2710_v14 = vmul.f32 %v3318_v24, %v3316_v1 }
 0x309   : > { %v3322_v45 = vpop.eup %3321 }
 0x30a   : > { %v2813_v8 = vadd.f32 %v2759_v11, %v2758_v57  ;;  %v2711_v16 = vmul.f32 %v3322_v45, %v3320_v41  ;;  %v2760_v21 = vmul.f32 %v4644_v62, %v2710_v14 }
 0x30c   : > { %2814 = vadd.xlane.f32.xlu1 %v2813_v8  ;;  %v2761_v38 = vmul.f32 %v4650_v59, %v2711_v16 }
 0x30e   : > { %v2816_v31 = vadd.f32 %v2761_v38, %v2760_v21 }
 0x310   : > { %2817 = vadd.xlane.f32.xlu0 %v2816_v31 }
 0x350   : > { %v2764_v62 = vpop.xlane.xlu0 %2763 }
 0x351   : > { %v2826_v59 = vadd.f32 %v3013_v44, %v2764_v62 }
 0x353   : > { %2846 = vst.msk [vmem:[%s4751_s11] sm:$0xff] %vm2845_vm0, %v2826_v59 }
 0x354   : > { %v2767_v54 = vpop.xlane.xlu0 %2766 }
 0x355   : > { %v2827_v61 = vadd.f32 %v3013_v44, %v2767_v54 }
 0x357   : > { %2847 = vst.msk [vmem:[%s4751_s11 + $0x8] sm:$0xff] %vm2845_vm0, %v2827_v61 }
 0x35a   : > { %v2770_v53 = vpop.xlane.xlu1 %2769 }
 0x35b   : > { %v2828_v6 = vadd.f32 %v3013_v44, %v2770_v53 }
 0x35d   : > { %2848 = vst.msk [vmem:[%s4751_s11 + $0x10] sm:$0xff] %vm2845_vm0, %v2828_v6 }
 0x35e   : > { %v2773_v46 = vpop.xlane.xlu1 %2772 }
 0x35f   : > { %v2829_v56 = vadd.f32 %v3013_v44, %v2773_v46 }
 0x361   : > { %2849 = vst.msk [vmem:[%s4751_s11 + $0x18] sm:$0xff] %vm2845_vm0, %v2829_v56 }
 0x362   : > { %v2776_v7 = vpop.xlane.xlu0 %2775 }
 0x363   : > { %v2830_v27 = vadd.f32 %v3013_v44, %v2776_v7 }
 0x365   : > { %2850 = vst.msk [vmem:[%s4751_s11 + $0x20] sm:$0xff] %vm2845_vm0, %v2830_v27 }
 0x368   : > { %v2779_v52 = vpop.xlane.xlu1 %2778 }
 0x369   : > { %v2831_v9 = vadd.f32 %v3013_v44, %v2779_v52 }
 0x36b   : > { %2851 = vst.msk [vmem:[%s4751_s11 + $0x28] sm:$0xff] %vm2845_vm0, %v2831_v9 }
 0x36d   : > { %v2782_v55 = vpop.xlane.xlu0 %2781 }
 0x36e   : > { %v2832_v10 = vadd.f32 %v3013_v44, %v2782_v55 }
 0x370   : > { %2852 = vst.msk [vmem:[%s4751_s11 + $0x30] sm:$0xff] %vm2845_vm0, %v2832_v10 }
 0x372   : > { %v2785_v39 = vpop.xlane.xlu1 %2784 }
 0x373   : > { %v2833_v48 = vadd.f32 %v3013_v44, %v2785_v39 }
 0x375   : > { %2853 = vst.msk [vmem:[%s4751_s11 + $0x38] sm:$0xff] %vm2845_vm0, %v2833_v48  ;;  %v2788_v26 = vpop.xlane.xlu0 %2787 }
 0x376   : > { %v2834_v60 = vadd.f32 %v3013_v44, %v2788_v26 }
 0x378   : > { %2854 = vst.msk [vmem:[%s4751_s11 + $0x40] sm:$0xff] %vm2845_vm0, %v2834_v60  ;;  %v2791_v51 = vpop.xlane.xlu1 %2790 }
 0x379   : > { %v2835_v63 = vadd.f32 %v3013_v44, %v2791_v51  ;;  %v2794_v3 = vpop.xlane.xlu0 %2793 }
 0x37a   : > { %v2836_v47 = vadd.f32 %v3013_v44, %v2794_v3 }
 0x37b   : > { %2855 = vst.msk [vmem:[%s4751_s11 + $0x48] sm:$0xff] %vm2845_vm0, %v2835_v63 }
 0x37c   : > { %2856 = vst.msk [vmem:[%s4751_s11 + $0x50] sm:$0xff] %vm2845_vm0, %v2836_v47 }
 0x37d   : > { %v2797_v40 = vpop.xlane.xlu1 %2796 }
 0x37e   : > { %v2837_v29 = vadd.f32 %v3013_v44, %v2797_v40 }
 0x380   : > { %2857 = vst.msk [vmem:[%s4751_s11 + $0x58] sm:$0xff] %vm2845_vm0, %v2837_v29  ;;  %v2800_v34 = vpop.xlane.xlu0 %2799 }
 0x381   : > { %v2838_v22 = vadd.f32 %v3013_v44, %v2800_v34 }
 0x383   : > { %2858 = vst.msk [vmem:[%s4751_s11 + $0x60] sm:$0xff] %vm2845_vm0, %v2838_v22 }
 0x384   : > { %v2803_v2 = vpop.xlane.xlu1 %2802 }
 0x385   : > { %v2839_v25 = vadd.f32 %v3013_v44, %v2803_v2 }
 0x387   : > { %2859 = vst.msk [vmem:[%s4751_s11 + $0x68] sm:$0xff] %vm2845_vm0, %v2839_v25 }
 0x388   : > { %v2806_v49 = vpop.xlane.xlu0 %2805 }
 0x389   : > { %v2840_v42 = vadd.f32 %v3013_v44, %v2806_v49 }
 0x38b   : > { %2860 = vst.msk [vmem:[%s4751_s11 + $0x70] sm:$0xff] %vm2845_vm0, %v2840_v42 }
 0x38c   : > { %v2809_v33 = vpop.xlane.xlu1 %2808 }
 0x38d   : > { %v2841_v4 = vadd.f32 %v3013_v44, %v2809_v33 }
 0x38f   : > { %2861 = vst.msk [vmem:[%s4751_s11 + $0x78] sm:$0xff] %vm2845_vm0, %v2841_v4 }
 0x391   : > { %v2812_v13 = vpop.xlane.xlu0 %2811 }
 0x392   : > { %v2842_v36 = vadd.f32 %v3013_v44, %v2812_v13 }
 0x394   : > { %2862 = vst.msk [vmem:[%s4751_s11 + $0x80] sm:$0xff] %vm2845_vm0, %v2842_v36 }
 0x395   : > { %v2815_v19 = vpop.xlane.xlu1 %2814 }
 0x396   : > { %v2843_v5 = vadd.f32 %v3013_v44, %v2815_v19 }
 0x398   : > { %2863 = vst.msk [vmem:[%s4751_s11 + $0x88] sm:$0xff] %vm2845_vm0, %v2843_v5 }
 0x399   : > { %v2818_v20 = vpop.xlane.xlu0 %2817 }
 0x39a   : > { %v2844_v23 = vadd.f32 %v3013_v44, %v2818_v20 }
 0x39c   : > { %2864 = vst.msk [vmem:[%s4751_s11 + $0x90] sm:$0xff] %vm2845_vm0, %v2844_v23 }
 0x39d PF: > { %s4906_s23 = smov %s3740_s20  ;;  %p19_p3 = scmp.ge.s32.totalorder %s3740_s20, 4  }
 0x39e   : > { %s4907_s20 = smov %s3616_s21  ;;  %s4908_s21 = smov %s3620_s22 }
 0x39f   : > { %s4909_s22 = smov %s3750_s29  ;;  %21 = sbr.rel (!%p19_p3) target bundleno = 8 (0x8), region = 92 }
 0x3a4   :  { %2887 = vsyncpa [#allocation4], 1 }
 0x3a5   :  { %2889 = vsyncpa [#allocation4 + $0x1], 1 }
 0x3a6   :  { %2890 = vsyncpa [#allocation6], 1 }
 0x3a7   :  { %2891 = vsyncpa [#allocation9], 1 }

</bundles_post_ra>
